<compile_context>
chip_gen: v7x
topology: tpu7x:2x2x1
jax: 0.10.0
libtpu: 0.0.40
codegen_flags: <defaults>
</compile_context>

<pallas_src>
import functools

import jax
import jax.numpy as jnp
from jax.experimental import pallas as pl
from jax.experimental.pallas import tpu as pltpu

EPS = 1e-5
LPAD = 16  # interior column offset in the halo scratch (bf16 sublane tile)


def _round_up(x, m):
    return ((x + m - 1) // m) * m


# ----------------------------------------------------------------------------
# In-kernel GroupNorm on a [HW, C] tile (single data pass over z)
# ----------------------------------------------------------------------------
def _group_norm(z, pool, gamma, beta, eps=EPS):
    """pool is [C, C]: 1/chans_per_group within a group, 0 elsewhere (and for
    zero-padded channels), so group stats come from two tiny [1,C]x[C,C] dots.
    Padded channels (zero weights/bias/gamma/beta) stay exactly zero."""
    inv_n = 1.0 / z.shape[0]
    s1 = jnp.sum(z, axis=0, keepdims=True) * inv_n                    # E[z]   per chan
    s2 = jnp.sum(z * z, axis=0, keepdims=True) * inv_n                # E[z^2] per chan
    mean_g = jnp.dot(s1, pool, preferred_element_type=jnp.float32)    # [1, C]
    ex2_g = jnp.dot(s2, pool, preferred_element_type=jnp.float32)     # [1, C]
    var_g = jnp.maximum(ex2_g - mean_g * mean_g, 0.0)
    scale = jax.lax.rsqrt(var_g + eps) * gamma
    shift = beta - mean_g * scale
    return z * scale + shift                                          # one fused pass


# ----------------------------------------------------------------------------
# Fused bottleneck kernel (one batch element per grid step)
# ----------------------------------------------------------------------------
def _bottleneck_kernel(x_ref,
                       w1_ref, b1_ref, g1_ref, be1_ref, p1_ref,
                       w2_ref, b2_ref, g2_ref, be2_ref,
                       w3_ref, b3_ref, g3_ref, be3_ref, p3_ref,
                       o_ref, xp_scr, *, H, W):
    f32 = jnp.float32
    bf16 = jnp.bfloat16
    HW = H * W
    C1p = w1_ref.shape[1]          # padded mid channels (multiple of 128)
    Wp = xp_scr.shape[1]           # padded scratch width (multiple of 16)

    x = x_ref[0]                                                   # [HW, Cin] f32

    # ---- stage 1: 1x1 conv + GN + ReLU (bf16 MXU operands, f32 accumulate) --
    z1 = jnp.dot(x.astype(bf16), w1_ref[...],
                 preferred_element_type=f32) + b1_ref[...]
    y1 = jnp.maximum(_group_norm(z1, p1_ref[...], g1_ref[...], be1_ref[...]),
                     0.0)                                          # [HW, C1p] f32

    # ---- stage 2: 3x3 conv (pad=1) via bf16 halo scratch + 9 tap matmuls ----
    # Scratch layout [H+2, Wp, C1p]: interior y1 lives at [1:H+1, LPAD:LPAD+W].
    # Only the guard ring around it must be zero; zero it every step (cheap),
    # the interior is fully overwritten right after.
    xp_scr[0:1, :, :] = jnp.zeros((1, Wp, C1p), bf16)              # top pad row
    xp_scr[H + 1:H + 2, :, :] = jnp.zeros((1, Wp, C1p), bf16)      # bottom pad row
    xp_scr[1:H + 1, 0:LPAD, :] = jnp.zeros((H, LPAD, C1p), bf16)   # left guard band
    xp_scr[1:H + 1, LPAD + W:Wp, :] = jnp.zeros((H, Wp - (LPAD + W), C1p), bf16)
    xp_scr[1:H + 1, LPAD:LPAD + W, :] = y1.astype(bf16).reshape(H, W, C1p)

    z2 = None
    for ky in range(3):                                            # static 3x3 taps
        for kx in range(3):
            c0 = LPAD - 1 + kx
            tap = xp_scr[ky:ky + H, c0:c0 + W, :].reshape(HW, C1p)  # bf16
            t = jnp.dot(tap, w2_ref[3 * ky + kx], preferred_element_type=f32)
            z2 = t if z2 is None else z2 + t
    z2 = z2 + b2_ref[...]
    y2 = jnp.maximum(_group_norm(z2, p1_ref[...], g2_ref[...], be2_ref[...]),
                     0.0)                                          # [HW, C1p] f32

    # ---- stage 3: 1x1 conv + GN + ReLU, then residual add + ReLU ------------
    z3 = jnp.dot(y2.astype(bf16), w3_ref[...],
                 preferred_element_type=f32) + b3_ref[...]
    y3 = jnp.maximum(_group_norm(z3, p3_ref[...], g3_ref[...], be3_ref[...]),
                     0.0)                                          # [HW, Cout]
    o_ref[0] = jnp.maximum(x + y3, 0.0).astype(o_ref.dtype)        # f32 residual


# ----------------------------------------------------------------------------
# Wrappers
# ----------------------------------------------------------------------------
def _rep_spec(a):
    zeros = (0,) * a.ndim
    return pl.BlockSpec(a.shape, lambda b, _z=zeros: _z)


def bottleneck_block_nhwc(x_nhwc, params):
    B, H, W, Cin = x_nhwc.shape
    C1p = params["w1"].shape[1]
    Cout = params["w3"].shape[1]
    assert Cin == Cout, "stride=1 BottleneckBlock requires in_planes == planes"
    HW = H * W
    Wp = _round_up(LPAD + W + 1, 16)          # halo scratch width (bf16 tile)

    x_flat = x_nhwc.reshape(B, HW, Cin)       # keep f32: exact residual path

    weight_args = (params["w1"], params["b1"], params["g1"], params["be1"],
                   params["p1"],
                   params["w2"], params["b2"], params["g2"], params["be2"],
                   params["w3"], params["b3"], params["g3"], params["be3"],
                   params["p3"])

    out_flat = pl.pallas_call(
        functools.partial(_bottleneck_kernel, H=H, W=W),
        out_shape=jax.ShapeDtypeStruct((B, HW, Cout), jnp.float32),
        grid=(B,),
        in_specs=[pl.BlockSpec((1, HW, Cin), lambda b: (b, 0, 0))]
                 + [_rep_spec(a) for a in weight_args],
        out_specs=pl.BlockSpec((1, HW, Cout), lambda b: (b, 0, 0)),
        scratch_shapes=[pltpu.VMEM((H + 2, Wp, C1p), jnp.bfloat16)],
        compiler_params=pltpu.CompilerParams(
            dimension_semantics=("parallel",),
            vmem_limit_bytes=48 * 1024 * 1024),
    )(x_flat, *weight_args)
    return out_flat.reshape(B, H, W, Cout)


def bottleneck_block_pallas(x_nchw, params):
    # NCHW interface to match the PyTorch module.  In a real extractor keep
    # NHWC end-to-end and call bottleneck_block_nhwc to avoid the transposes.
    out_nhwc = bottleneck_block_nhwc(jnp.transpose(x_nchw, (0, 2, 3, 1)), params)
    return jnp.transpose(out_nhwc, (0, 3, 1, 2))


# ----------------------------------------------------------------------------
# Host-side parameter preparation (layout + lane padding + pool matrices)
# ----------------------------------------------------------------------------
def _pad_axis(a, axis, new_size):
    pad = [(0, 0)] * a.ndim
    pad[axis] = (0, new_size - a.shape[axis])
    return jnp.pad(a, pad)


def _group_pool_matrix(C, num_groups, padded_size=None):
    cg = C // num_groups
    gid = jnp.arange(C) // cg
    pool = (gid[:, None] == gid[None, :]).astype(jnp.float32) / cg
    if padded_size is not None and padded_size != C:
        pool = jnp.zeros((padded_size, padded_size),
                         jnp.float32).at[:C, :C].set(pool)
    return pool


def make_kernel_params(p, num_groups, matmul_dtype=jnp.bfloat16):
    C1, Cin = p["w1"].shape[:2]
    Cout = p["w3"].shape[0]
    C1p = _round_up(C1, 128)
    f32 = jnp.float32

    w1 = jnp.transpose(p["w1"][:, :, 0, 0], (1, 0))            # [Cin, C1]
    w1 = _pad_axis(w1, 1, C1p).astype(matmul_dtype)            # [Cin, C1p]

    w2 = jnp.transpose(p["w2"], (2, 3, 1, 0))                  # [3,3,C1,C1] (kh,kw,ci,co)
    w2 = _pad_axis(_pad_axis(w2, 2, C1p), 3, C1p)              # [3,3,C1p,C1p]
    w2 = w2.reshape(9, C1p, C1p).astype(matmul_dtype)          # per-tap weights

    w3 = jnp.transpose(p["w3"][:, :, 0, 0], (1, 0))            # [C1, Cout]
    w3 = _pad_axis(w3, 0, C1p).astype(matmul_dtype)            # [C1p, Cout]

    vec = lambda v, n: _pad_axis(v.astype(f32), 0, n).reshape(1, n)

    return dict(
        w1=w1, b1=vec(p["b1"], C1p), g1=vec(p["g1"], C1p), be1=vec(p["be1"], C1p),
        p1=_group_pool_matrix(C1, num_groups, C1p),
        w2=w2, b2=vec(p["b2"], C1p), g2=vec(p["g2"], C1p), be2=vec(p["be2"], C1p),
        w3=w3, b3=p["b3"].astype(f32).reshape(1, Cout),
        g3=p["g3"].astype(f32).reshape(1, Cout),
        be3=p["be3"].astype(f32).reshape(1, Cout),
        p3=_group_pool_matrix(Cout, num_groups),
    )


# ----------------------------------------------------------------------------
# Plain-JAX reference (same bf16-matmul / f32-accumulate rounding points)
# ----------------------------------------------------------------------------
def _ref_group_norm(x, num_groups, gamma, beta, eps=EPS):
    B, C, H, W = x.shape
    xg = x.reshape(B, num_groups, -1)
    mean = xg.mean(-1, keepdims=True)
    var = xg.var(-1, keepdims=True)
    xn = ((xg - mean) * jax.lax.rsqrt(var + eps)).reshape(B, C, H, W)
    return xn * gamma[None, :, None, None] + beta[None, :, None, None]


def _ref_conv(x, w_oihw, b, padding, matmul_dtype):
    y = jax.lax.conv_general_dilated(
        x.astype(matmul_dtype), w_oihw.astype(matmul_dtype),
        window_strides=(1, 1),
        padding=[(padding, padding), (padding, padding)],
        dimension_numbers=("NCHW", "OIHW", "NCHW"),
        preferred_element_type=jnp.float32)
    return y + b[None, :, None, None]


def bottleneck_block_ref(x, p, num_groups, matmul_dtype=jnp.bfloat16):
    relu = lambda t: jnp.maximum(t, 0.0)
    y = relu(_ref_group_norm(_ref_conv(x, p["w1"], p["b1"], 0, matmul_dtype),
                             num_groups, p["g1"], p["be1"]))
    y = relu(_ref_group_norm(_ref_conv(y, p["w2"], p["b2"], 1, matmul_dtype),
                             num_groups, p["g2"], p["be2"]))
    y = relu(_ref_group_norm(_ref_conv(y, p["w3"], p["b3"], 0, matmul_dtype),
                             num_groups, p["g3"], p["be3"]))
    return relu(x + y)


# ----------------------------------------------------------------------------
if __name__ == "__main__":
    # stride=1 residual => in_planes == planes; planes=128 keeps the output
    # channel dim lane-dense while staying small.
    B, in_planes, planes, H, W = 2, 128, 128, 16, 16
    C1 = planes // 4               # 32
    num_groups = planes // 8       # 16

    key = jax.random.PRNGKey(0)
    ks = jax.random.split(key, 13)

    # PyTorch-style parameters (OIHW conv weights, per-channel GN affine)
    w1_t = jax.random.normal(ks[0], (C1, in_planes, 1, 1), jnp.float32) * 0.1
    b1_t = jax.random.normal(ks[1], (C1,), jnp.float32) * 0.1
    w2_t = jax.random.normal(ks[2], (C1, C1, 3, 3), jnp.float32) * 0.1
    b2_t = jax.random.normal(ks[3], (C1,), jnp.float32) * 0.1
    w3_t = jax.random.normal(ks[4], (planes, C1, 1, 1), jnp.float32) * 0.1
    b3_t = jax.random.normal(ks[5], (planes,), jnp.float32) * 0.1
    g1 = 1.0 + 0.1 * jax.random.normal(ks[6], (C1,), jnp.float32)
    be1 = 0.1 * jax.random.normal(ks[7], (C1,), jnp.float32)
    g2 = 1.0 + 0.1 * jax.random.normal(ks[8], (C1,), jnp.float32)
    be2 = 0.1 * jax.random.normal(ks[9], (C1,), jnp.float32)
    g3 = 1.0 + 0.1 * jax.random.normal(ks[10], (planes,), jnp.float32)
    be3 = 0.1 * jax.random.normal(ks[11], (planes,), jnp.float32)

    p_torch = dict(w1=w1_t, b1=b1_t, w2=w2_t, b2=b2_t, w3=w3_t, b3=b3_t,
                   g1=g1, be1=be1, g2=g2, be2=be2, g3=g3, be3=be3)
    params = make_kernel_params(p_torch, num_groups)

    x = jax.random.normal(ks[12], (B, in_planes, H, W), jnp.float32)

    out = jax.jit(bottleneck_block_pallas)(x, params)
    out = jax.block_until_ready(out)

    ref = bottleneck_block_ref(x, p_torch, num_groups)
    assert out.shape == ref.shape == (B, planes, H, W)
    # Kernel and reference share bf16 matmul operands / f32 accumulation and
    # round intermediates to bf16 at the same points; the tolerance covers
    # rare bf16 rounding-boundary flips caused by differing f32 reduction
    # orders (conv vs tap-matmul, centered vs E[x^2]-mean^2 GN variance).
    err = jnp.abs(out - ref)
    max_err = float(jnp.max(err))
    mean_err = float(jnp.mean(err))
    assert max_err < 5e-2, f"mismatch vs reference: max_err={max_err}"
    assert mean_err < 5e-3, f"mismatch vs reference: mean_err={mean_err}"

    print("KERNEL_OK")
</pallas_src>

<mosaic_0001>
module attributes {stable_mosaic.version = 11 : i64} {
  func.func @_bottleneck_kernel(%arg0: i32, %arg1: memref<1x256x128xf32, #tpu.memory_space<vmem>>, %arg2: memref<128x128xbf16, #tpu.memory_space<vmem>>, %arg3: memref<1x128xf32, #tpu.memory_space<vmem>>, %arg4: memref<1x128xf32, #tpu.memory_space<vmem>>, %arg5: memref<1x128xf32, #tpu.memory_space<vmem>>, %arg6: memref<128x128xf32, #tpu.memory_space<vmem>>, %arg7: memref<9x128x128xbf16, #tpu.memory_space<vmem>>, %arg8: memref<1x128xf32, #tpu.memory_space<vmem>>, %arg9: memref<1x128xf32, #tpu.memory_space<vmem>>, %arg10: memref<1x128xf32, #tpu.memory_space<vmem>>, %arg11: memref<128x128xbf16, #tpu.memory_space<vmem>>, %arg12: memref<1x128xf32, #tpu.memory_space<vmem>>, %arg13: memref<1x128xf32, #tpu.memory_space<vmem>>, %arg14: memref<1x128xf32, #tpu.memory_space<vmem>>, %arg15: memref<128x128xf32, #tpu.memory_space<vmem>>, %arg16: memref<1x256x128xf32, #tpu.memory_space<vmem>>, %arg17: memref<18x48x128xbf16, #tpu.memory_space<vmem>>) attributes {dimension_semantics = [#tpu.dimension_semantics<parallel>], iteration_bounds = array<i64: 2>, scalar_prefetch = 0 : i64, scratch_operands = 1 : i64, tpu.core_type = #tpu.core_type<tc>, window_params = [{transform_indices = @transform_0, window_bounds = array<i64: 1, 256, 128>}, {pipeline_mode = #tpu.pipeline_mode<synchronous>, transform_indices = @transform_1, window_bounds = array<i64: 128, 128>}, {pipeline_mode = #tpu.pipeline_mode<synchronous>, transform_indices = @transform_2, window_bounds = array<i64: 1, 128>}, {pipeline_mode = #tpu.pipeline_mode<synchronous>, transform_indices = @transform_3, window_bounds = array<i64: 1, 128>}, {pipeline_mode = #tpu.pipeline_mode<synchronous>, transform_indices = @transform_4, window_bounds = array<i64: 1, 128>}, {pipeline_mode = #tpu.pipeline_mode<synchronous>, transform_indices = @transform_5, window_bounds = array<i64: 128, 128>}, {pipeline_mode = #tpu.pipeline_mode<synchronous>, transform_indices = @transform_6, window_bounds = array<i64: 9, 128, 128>}, {pipeline_mode = #tpu.pipeline_mode<synchronous>, transform_indices = @transform_7, window_bounds = array<i64: 1, 128>}, {pipeline_mode = #tpu.pipeline_mode<synchronous>, transform_indices = @transform_8, window_bounds = array<i64: 1, 128>}, {pipeline_mode = #tpu.pipeline_mode<synchronous>, transform_indices = @transform_9, window_bounds = array<i64: 1, 128>}, {pipeline_mode = #tpu.pipeline_mode<synchronous>, transform_indices = @transform_10, window_bounds = array<i64: 128, 128>}, {pipeline_mode = #tpu.pipeline_mode<synchronous>, transform_indices = @transform_11, window_bounds = array<i64: 1, 128>}, {pipeline_mode = #tpu.pipeline_mode<synchronous>, transform_indices = @transform_12, window_bounds = array<i64: 1, 128>}, {pipeline_mode = #tpu.pipeline_mode<synchronous>, transform_indices = @transform_13, window_bounds = array<i64: 1, 128>}, {pipeline_mode = #tpu.pipeline_mode<synchronous>, transform_indices = @transform_14, window_bounds = array<i64: 128, 128>}, {transform_indices = @transform_15, window_bounds = array<i64: 1, 256, 128>}]} {
    %c0 = arith.constant 0 : index
    %c0_0 = arith.constant 0 : index
    %c0_1 = arith.constant 0 : index
    %0 = vector.load %arg1[%c0, %c0_0, %c0_1] : memref<1x256x128xf32, #tpu.memory_space<vmem>>, vector<1x256x128xf32>
    %1 = vector.shape_cast %0 : vector<1x256x128xf32> to vector<256x128xf32>
    %2 = arith.truncf %1 : vector<256x128xf32> to vector<256x128xbf16>
    %c0_2 = arith.constant 0 : index
    %c0_3 = arith.constant 0 : index
    %3 = vector.load %arg2[%c0_2, %c0_3] : memref<128x128xbf16, #tpu.memory_space<vmem>>, vector<128x128xbf16>
    %cst = arith.constant dense<0.000000e+00> : vector<256x128xf32>
    %4 = tpu.matmul %2, %3, %cst {dimension_numbers = #tpu.dot_dimension_numbers<[1], [0], [0], [1], [0, 0, 1, 1], [], []>} : vector<256x128xbf16>, vector<128x128xbf16>, vector<256x128xf32> -> vector<256x128xf32>
    %c0_4 = arith.constant 0 : index
    %c0_5 = arith.constant 0 : index
    %5 = vector.load %arg3[%c0_4, %c0_5] : memref<1x128xf32, #tpu.memory_space<vmem>>, vector<1x128xf32>
    %6 = vector.broadcast %5 : vector<1x128xf32> to vector<256x128xf32>
    %7 = arith.addf %4, %6 : vector<256x128xf32>
    %c0_6 = arith.constant 0 : index
    %c0_7 = arith.constant 0 : index
    %8 = vector.load %arg6[%c0_6, %c0_7] : memref<128x128xf32, #tpu.memory_space<vmem>>, vector<128x128xf32>
    %c0_8 = arith.constant 0 : index
    %c0_9 = arith.constant 0 : index
    %9 = vector.load %arg4[%c0_8, %c0_9] : memref<1x128xf32, #tpu.memory_space<vmem>>, vector<1x128xf32>
    %c0_10 = arith.constant 0 : index
    %c0_11 = arith.constant 0 : index
    %10 = vector.load %arg5[%c0_10, %c0_11] : memref<1x128xf32, #tpu.memory_space<vmem>>, vector<1x128xf32>
    %cst_12 = arith.constant dense<0.000000e+00> : vector<128xf32>
    %11 = vector.multi_reduction <add>, %7, %cst_12 [0] : vector<256x128xf32> to vector<128xf32>
    %12 = vector.shape_cast %11 : vector<128xf32> to vector<1x128xf32>
    %cst_13 = arith.constant 3.906250e-03 : f32
    %13 = vector.broadcast %cst_13 : f32 to vector<1x128xf32>
    %14 = arith.mulf %12, %13 : vector<1x128xf32>
    %15 = arith.mulf %7, %7 : vector<256x128xf32>
    %cst_14 = arith.constant dense<0.000000e+00> : vector<128xf32>
    %16 = vector.multi_reduction <add>, %15, %cst_14 [0] : vector<256x128xf32> to vector<128xf32>
    %17 = vector.shape_cast %16 : vector<128xf32> to vector<1x128xf32>
    %cst_15 = arith.constant 3.906250e-03 : f32
    %18 = vector.broadcast %cst_15 : f32 to vector<1x128xf32>
    %19 = arith.mulf %17, %18 : vector<1x128xf32>
    %cst_16 = arith.constant dense<0.000000e+00> : vector<1x128xf32>
    %20 = tpu.matmul %14, %8, %cst_16 {dimension_numbers = #tpu.dot_dimension_numbers<[1], [0], [0], [1], [0, 0, 1, 1], [], []>} : vector<1x128xf32>, vector<128x128xf32>, vector<1x128xf32> -> vector<1x128xf32>
    %cst_17 = arith.constant dense<0.000000e+00> : vector<1x128xf32>
    %21 = tpu.matmul %19, %8, %cst_17 {dimension_numbers = #tpu.dot_dimension_numbers<[1], [0], [0], [1], [0, 0, 1, 1], [], []>} : vector<1x128xf32>, vector<128x128xf32>, vector<1x128xf32> -> vector<1x128xf32>
    %22 = arith.mulf %20, %20 : vector<1x128xf32>
    %23 = arith.subf %21, %22 : vector<1x128xf32>
    %cst_18 = arith.constant 0.000000e+00 : f32
    %24 = vector.broadcast %cst_18 : f32 to vector<1x128xf32>
    %25 = arith.maximumf %23, %24 : vector<1x128xf32>
    %cst_19 = arith.constant 9.99999974E-6 : f32
    %26 = vector.broadcast %cst_19 : f32 to vector<1x128xf32>
    %27 = arith.addf %25, %26 : vector<1x128xf32>
    %28 = math.rsqrt %27 : vector<1x128xf32>
    %29 = arith.mulf %28, %9 : vector<1x128xf32>
    %30 = arith.mulf %20, %29 : vector<1x128xf32>
    %31 = arith.subf %10, %30 : vector<1x128xf32>
    %32 = vector.broadcast %29 : vector<1x128xf32> to vector<256x128xf32>
    %33 = arith.mulf %7, %32 : vector<256x128xf32>
    %34 = vector.broadcast %31 : vector<1x128xf32> to vector<256x128xf32>
    %35 = arith.addf %33, %34 : vector<256x128xf32>
    %cst_20 = arith.constant 0.000000e+00 : f32
    %36 = vector.broadcast %cst_20 : f32 to vector<256x128xf32>
    %37 = arith.maximumf %35, %36 : vector<256x128xf32>
    %cst_21 = arith.constant 0.000000e+00 : bf16
    %38 = vector.broadcast %cst_21 : bf16 to vector<1x48x128xbf16>
    %c0_22 = arith.constant 0 : index
    %c0_23 = arith.constant 0 : index
    %c0_24 = arith.constant 0 : index
    %39 = vector.load %arg17[%c0_22, %c0_23, %c0_24] : memref<18x48x128xbf16, #tpu.memory_space<vmem>>, vector<1x48x128xbf16>
    tpu.vector_store %arg17[%c0_22, %c0_23, %c0_24], %38 {strides = array<i32>} : memref<18x48x128xbf16, #tpu.memory_space<vmem>>, vector<1x48x128xbf16>,
    %cst_25 = arith.constant 0.000000e+00 : bf16
    %40 = vector.broadcast %cst_25 : bf16 to vector<1x48x128xbf16>
    %c17 = arith.constant 17 : index
    %c0_26 = arith.constant 0 : index
    %c0_27 = arith.constant 0 : index
    %41 = vector.load %arg17[%c17, %c0_26, %c0_27] : memref<18x48x128xbf16, #tpu.memory_space<vmem>>, vector<1x48x128xbf16>
    tpu.vector_store %arg17[%c17, %c0_26, %c0_27], %40 {strides = array<i32>} : memref<18x48x128xbf16, #tpu.memory_space<vmem>>, vector<1x48x128xbf16>,
    %cst_28 = arith.constant 0.000000e+00 : bf16
    %42 = vector.broadcast %cst_28 : bf16 to vector<16x16x128xbf16>
    %c1 = arith.constant 1 : index
    %c0_29 = arith.constant 0 : index
    %c0_30 = arith.constant 0 : index
    %43 = vector.load %arg17[%c1, %c0_29, %c0_30] : memref<18x48x128xbf16, #tpu.memory_space<vmem>>, vector<16x16x128xbf16>
    tpu.vector_store %arg17[%c1, %c0_29, %c0_30], %42 {strides = array<i32>} : memref<18x48x128xbf16, #tpu.memory_space<vmem>>, vector<16x16x128xbf16>,
    %cst_31 = arith.constant 0.000000e+00 : bf16
    %44 = vector.broadcast %cst_31 : bf16 to vector<16x16x128xbf16>
    %c1_32 = arith.constant 1 : index
    %c32 = arith.constant 32 : index
    %c0_33 = arith.constant 0 : index
    %45 = vector.load %arg17[%c1_32, %c32, %c0_33] : memref<18x48x128xbf16, #tpu.memory_space<vmem>>, vector<16x16x128xbf16>
    tpu.vector_store %arg17[%c1_32, %c32, %c0_33], %44 {strides = array<i32>} : memref<18x48x128xbf16, #tpu.memory_space<vmem>>, vector<16x16x128xbf16>,
    %46 = arith.truncf %37 : vector<256x128xf32> to vector<256x128xbf16>
    %47 = vector.shape_cast %46 : vector<256x128xbf16> to vector<16x16x128xbf16>
    %c1_34 = arith.constant 1 : index
    %c16 = arith.constant 16 : index
    %c0_35 = arith.constant 0 : index
    %48 = vector.load %arg17[%c1_34, %c16, %c0_35] : memref<18x48x128xbf16, #tpu.memory_space<vmem>>, vector<16x16x128xbf16>
    tpu.vector_store %arg17[%c1_34, %c16, %c0_35], %47 {strides = array<i32>} : memref<18x48x128xbf16, #tpu.memory_space<vmem>>, vector<16x16x128xbf16>,
    %c0_36 = arith.constant 0 : index
    %c15 = arith.constant 15 : index
    %c0_37 = arith.constant 0 : index
    %49 = vector.load %arg17[%c0_36, %c15, %c0_37] : memref<18x48x128xbf16, #tpu.memory_space<vmem>>, vector<16x16x128xbf16>
    %50 = vector.shape_cast %49 : vector<16x16x128xbf16> to vector<256x128xbf16>
    %c0_38 = arith.constant 0 : index
    %c0_39 = arith.constant 0 : index
    %c0_40 = arith.constant 0 : index
    %51 = vector.load %arg7[%c0_38, %c0_39, %c0_40] : memref<9x128x128xbf16, #tpu.memory_space<vmem>>, vector<1x128x128xbf16>
    %52 = vector.shape_cast %51 : vector<1x128x128xbf16> to vector<128x128xbf16>
    %cst_41 = arith.constant dense<0.000000e+00> : vector<256x128xf32>
    %53 = tpu.matmul %50, %52, %cst_41 {dimension_numbers = #tpu.dot_dimension_numbers<[1], [0], [0], [1], [0, 0, 1, 1], [], []>} : vector<256x128xbf16>, vector<128x128xbf16>, vector<256x128xf32> -> vector<256x128xf32>
    %c0_42 = arith.constant 0 : index
    %c16_43 = arith.constant 16 : index
    %c0_44 = arith.constant 0 : index
    %54 = vector.load %arg17[%c0_42, %c16_43, %c0_44] : memref<18x48x128xbf16, #tpu.memory_space<vmem>>, vector<16x16x128xbf16>
    %55 = vector.shape_cast %54 : vector<16x16x128xbf16> to vector<256x128xbf16>
    %c1_45 = arith.constant 1 : index
    %c0_46 = arith.constant 0 : index
    %c0_47 = arith.constant 0 : index
    %56 = vector.load %arg7[%c1_45, %c0_46, %c0_47] : memref<9x128x128xbf16, #tpu.memory_space<vmem>>, vector<1x128x128xbf16>
    %57 = vector.shape_cast %56 : vector<1x128x128xbf16> to vector<128x128xbf16>
    %cst_48 = arith.constant dense<0.000000e+00> : vector<256x128xf32>
    %58 = tpu.matmul %55, %57, %cst_48 {dimension_numbers = #tpu.dot_dimension_numbers<[1], [0], [0], [1], [0, 0, 1, 1], [], []>} : vector<256x128xbf16>, vector<128x128xbf16>, vector<256x128xf32> -> vector<256x128xf32>
    %59 = arith.addf %53, %58 : vector<256x128xf32>
    %c0_49 = arith.constant 0 : index
    %c17_50 = arith.constant 17 : index
    %c0_51 = arith.constant 0 : index
    %60 = vector.load %arg17[%c0_49, %c17_50, %c0_51] : memref<18x48x128xbf16, #tpu.memory_space<vmem>>, vector<16x16x128xbf16>
    %61 = vector.shape_cast %60 : vector<16x16x128xbf16> to vector<256x128xbf16>
    %c2 = arith.constant 2 : index
    %c0_52 = arith.constant 0 : index
    %c0_53 = arith.constant 0 : index
    %62 = vector.load %arg7[%c2, %c0_52, %c0_53] : memref<9x128x128xbf16, #tpu.memory_space<vmem>>, vector<1x128x128xbf16>
    %63 = vector.shape_cast %62 : vector<1x128x128xbf16> to vector<128x128xbf16>
    %cst_54 = arith.constant dense<0.000000e+00> : vector<256x128xf32>
    %64 = tpu.matmul %61, %63, %cst_54 {dimension_numbers = #tpu.dot_dimension_numbers<[1], [0], [0], [1], [0, 0, 1, 1], [], []>} : vector<256x128xbf16>, vector<128x128xbf16>, vector<256x128xf32> -> vector<256x128xf32>
    %65 = arith.addf %59, %64 : vector<256x128xf32>
    %c1_55 = arith.constant 1 : index
    %c15_56 = arith.constant 15 : index
    %c0_57 = arith.constant 0 : index
    %66 = vector.load %arg17[%c1_55, %c15_56, %c0_57] : memref<18x48x128xbf16, #tpu.memory_space<vmem>>, vector<16x16x128xbf16>
    %67 = vector.shape_cast %66 : vector<16x16x128xbf16> to vector<256x128xbf16>
    %c3 = arith.constant 3 : index
    %c0_58 = arith.constant 0 : index
    %c0_59 = arith.constant 0 : index
    %68 = vector.load %arg7[%c3, %c0_58, %c0_59] : memref<9x128x128xbf16, #tpu.memory_space<vmem>>, vector<1x128x128xbf16>
    %69 = vector.shape_cast %68 : vector<1x128x128xbf16> to vector<128x128xbf16>
    %cst_60 = arith.constant dense<0.000000e+00> : vector<256x128xf32>
    %70 = tpu.matmul %67, %69, %cst_60 {dimension_numbers = #tpu.dot_dimension_numbers<[1], [0], [0], [1], [0, 0, 1, 1], [], []>} : vector<256x128xbf16>, vector<128x128xbf16>, vector<256x128xf32> -> vector<256x128xf32>
    %71 = arith.addf %65, %70 : vector<256x128xf32>
    %c1_61 = arith.constant 1 : index
    %c16_62 = arith.constant 16 : index
    %c0_63 = arith.constant 0 : index
    %72 = vector.load %arg17[%c1_61, %c16_62, %c0_63] : memref<18x48x128xbf16, #tpu.memory_space<vmem>>, vector<16x16x128xbf16>
    %73 = vector.shape_cast %72 : vector<16x16x128xbf16> to vector<256x128xbf16>
    %c4 = arith.constant 4 : index
    %c0_64 = arith.constant 0 : index
    %c0_65 = arith.constant 0 : index
    %74 = vector.load %arg7[%c4, %c0_64, %c0_65] : memref<9x128x128xbf16, #tpu.memory_space<vmem>>, vector<1x128x128xbf16>
    %75 = vector.shape_cast %74 : vector<1x128x128xbf16> to vector<128x128xbf16>
    %cst_66 = arith.constant dense<0.000000e+00> : vector<256x128xf32>
    %76 = tpu.matmul %73, %75, %cst_66 {dimension_numbers = #tpu.dot_dimension_numbers<[1], [0], [0], [1], [0, 0, 1, 1], [], []>} : vector<256x128xbf16>, vector<128x128xbf16>, vector<256x128xf32> -> vector<256x128xf32>
    %77 = arith.addf %71, %76 : vector<256x128xf32>
    %c1_67 = arith.constant 1 : index
    %c17_68 = arith.constant 17 : index
    %c0_69 = arith.constant 0 : index
    %78 = vector.load %arg17[%c1_67, %c17_68, %c0_69] : memref<18x48x128xbf16, #tpu.memory_space<vmem>>, vector<16x16x128xbf16>
    %79 = vector.shape_cast %78 : vector<16x16x128xbf16> to vector<256x128xbf16>
    %c5 = arith.constant 5 : index
    %c0_70 = arith.constant 0 : index
    %c0_71 = arith.constant 0 : index
    %80 = vector.load %arg7[%c5, %c0_70, %c0_71] : memref<9x128x128xbf16, #tpu.memory_space<vmem>>, vector<1x128x128xbf16>
    %81 = vector.shape_cast %80 : vector<1x128x128xbf16> to vector<128x128xbf16>
    %cst_72 = arith.constant dense<0.000000e+00> : vector<256x128xf32>
    %82 = tpu.matmul %79, %81, %cst_72 {dimension_numbers = #tpu.dot_dimension_numbers<[1], [0], [0], [1], [0, 0, 1, 1], [], []>} : vector<256x128xbf16>, vector<128x128xbf16>, vector<256x128xf32> -> vector<256x128xf32>
    %83 = arith.addf %77, %82 : vector<256x128xf32>
    %c2_73 = arith.constant 2 : index
    %c15_74 = arith.constant 15 : index
    %c0_75 = arith.constant 0 : index
    %84 = vector.load %arg17[%c2_73, %c15_74, %c0_75] : memref<18x48x128xbf16, #tpu.memory_space<vmem>>, vector<16x16x128xbf16>
    %85 = vector.shape_cast %84 : vector<16x16x128xbf16> to vector<256x128xbf16>
    %c6 = arith.constant 6 : index
    %c0_76 = arith.constant 0 : index
    %c0_77 = arith.constant 0 : index
    %86 = vector.load %arg7[%c6, %c0_76, %c0_77] : memref<9x128x128xbf16, #tpu.memory_space<vmem>>, vector<1x128x128xbf16>
    %87 = vector.shape_cast %86 : vector<1x128x128xbf16> to vector<128x128xbf16>
    %cst_78 = arith.constant dense<0.000000e+00> : vector<256x128xf32>
    %88 = tpu.matmul %85, %87, %cst_78 {dimension_numbers = #tpu.dot_dimension_numbers<[1], [0], [0], [1], [0, 0, 1, 1], [], []>} : vector<256x128xbf16>, vector<128x128xbf16>, vector<256x128xf32> -> vector<256x128xf32>
    %89 = arith.addf %83, %88 : vector<256x128xf32>
    %c2_79 = arith.constant 2 : index
    %c16_80 = arith.constant 16 : index
    %c0_81 = arith.constant 0 : index
    %90 = vector.load %arg17[%c2_79, %c16_80, %c0_81] : memref<18x48x128xbf16, #tpu.memory_space<vmem>>, vector<16x16x128xbf16>
    %91 = vector.shape_cast %90 : vector<16x16x128xbf16> to vector<256x128xbf16>
    %c7 = arith.constant 7 : index
    %c0_82 = arith.constant 0 : index
    %c0_83 = arith.constant 0 : index
    %92 = vector.load %arg7[%c7, %c0_82, %c0_83] : memref<9x128x128xbf16, #tpu.memory_space<vmem>>, vector<1x128x128xbf16>
    %93 = vector.shape_cast %92 : vector<1x128x128xbf16> to vector<128x128xbf16>
    %cst_84 = arith.constant dense<0.000000e+00> : vector<256x128xf32>
    %94 = tpu.matmul %91, %93, %cst_84 {dimension_numbers = #tpu.dot_dimension_numbers<[1], [0], [0], [1], [0, 0, 1, 1], [], []>} : vector<256x128xbf16>, vector<128x128xbf16>, vector<256x128xf32> -> vector<256x128xf32>
    %95 = arith.addf %89, %94 : vector<256x128xf32>
    %c2_85 = arith.constant 2 : index
    %c17_86 = arith.constant 17 : index
    %c0_87 = arith.constant 0 : index
    %96 = vector.load %arg17[%c2_85, %c17_86, %c0_87] : memref<18x48x128xbf16, #tpu.memory_space<vmem>>, vector<16x16x128xbf16>
    %97 = vector.shape_cast %96 : vector<16x16x128xbf16> to vector<256x128xbf16>
    %c8 = arith.constant 8 : index
    %c0_88 = arith.constant 0 : index
    %c0_89 = arith.constant 0 : index
    %98 = vector.load %arg7[%c8, %c0_88, %c0_89] : memref<9x128x128xbf16, #tpu.memory_space<vmem>>, vector<1x128x128xbf16>
    %99 = vector.shape_cast %98 : vector<1x128x128xbf16> to vector<128x128xbf16>
    %cst_90 = arith.constant dense<0.000000e+00> : vector<256x128xf32>
    %100 = tpu.matmul %97, %99, %cst_90 {dimension_numbers = #tpu.dot_dimension_numbers<[1], [0], [0], [1], [0, 0, 1, 1], [], []>} : vector<256x128xbf16>, vector<128x128xbf16>, vector<256x128xf32> -> vector<256x128xf32>
    %101 = arith.addf %95, %100 : vector<256x128xf32>
    %c0_91 = arith.constant 0 : index
    %c0_92 = arith.constant 0 : index
    %102 = vector.load %arg8[%c0_91, %c0_92] : memref<1x128xf32, #tpu.memory_space<vmem>>, vector<1x128xf32>
    %103 = vector.broadcast %102 : vector<1x128xf32> to vector<256x128xf32>
    %104 = arith.addf %101, %103 : vector<256x128xf32>
    %c0_93 = arith.constant 0 : index
    %c0_94 = arith.constant 0 : index
    %105 = vector.load %arg6[%c0_93, %c0_94] : memref<128x128xf32, #tpu.memory_space<vmem>>, vector<128x128xf32>
    %c0_95 = arith.constant 0 : index
    %c0_96 = arith.constant 0 : index
    %106 = vector.load %arg9[%c0_95, %c0_96] : memref<1x128xf32, #tpu.memory_space<vmem>>, vector<1x128xf32>
    %c0_97 = arith.constant 0 : index
    %c0_98 = arith.constant 0 : index
    %107 = vector.load %arg10[%c0_97, %c0_98] : memref<1x128xf32, #tpu.memory_space<vmem>>, vector<1x128xf32>
    %cst_99 = arith.constant dense<0.000000e+00> : vector<128xf32>
    %108 = vector.multi_reduction <add>, %104, %cst_99 [0] : vector<256x128xf32> to vector<128xf32>
    %109 = vector.shape_cast %108 : vector<128xf32> to vector<1x128xf32>
    %cst_100 = arith.constant 3.906250e-03 : f32
    %110 = vector.broadcast %cst_100 : f32 to vector<1x128xf32>
    %111 = arith.mulf %109, %110 : vector<1x128xf32>
    %112 = arith.mulf %104, %104 : vector<256x128xf32>
    %cst_101 = arith.constant dense<0.000000e+00> : vector<128xf32>
    %113 = vector.multi_reduction <add>, %112, %cst_101 [0] : vector<256x128xf32> to vector<128xf32>
    %114 = vector.shape_cast %113 : vector<128xf32> to vector<1x128xf32>
    %cst_102 = arith.constant 3.906250e-03 : f32
    %115 = vector.broadcast %cst_102 : f32 to vector<1x128xf32>
    %116 = arith.mulf %114, %115 : vector<1x128xf32>
    %cst_103 = arith.constant dense<0.000000e+00> : vector<1x128xf32>
    %117 = tpu.matmul %111, %105, %cst_103 {dimension_numbers = #tpu.dot_dimension_numbers<[1], [0], [0], [1], [0, 0, 1, 1], [], []>} : vector<1x128xf32>, vector<128x128xf32>, vector<1x128xf32> -> vector<1x128xf32>
    %cst_104 = arith.constant dense<0.000000e+00> : vector<1x128xf32>
    %118 = tpu.matmul %116, %105, %cst_104 {dimension_numbers = #tpu.dot_dimension_numbers<[1], [0], [0], [1], [0, 0, 1, 1], [], []>} : vector<1x128xf32>, vector<128x128xf32>, vector<1x128xf32> -> vector<1x128xf32>
    %119 = arith.mulf %117, %117 : vector<1x128xf32>
    %120 = arith.subf %118, %119 : vector<1x128xf32>
    %cst_105 = arith.constant 0.000000e+00 : f32
    %121 = vector.broadcast %cst_105 : f32 to vector<1x128xf32>
    %122 = arith.maximumf %120, %121 : vector<1x128xf32>
    %cst_106 = arith.constant 9.99999974E-6 : f32
    %123 = vector.broadcast %cst_106 : f32 to vector<1x128xf32>
    %124 = arith.addf %122, %123 : vector<1x128xf32>
    %125 = math.rsqrt %124 : vector<1x128xf32>
    %126 = arith.mulf %125, %106 : vector<1x128xf32>
    %127 = arith.mulf %117, %126 : vector<1x128xf32>
    %128 = arith.subf %107, %127 : vector<1x128xf32>
    %129 = vector.broadcast %126 : vector<1x128xf32> to vector<256x128xf32>
    %130 = arith.mulf %104, %129 : vector<256x128xf32>
    %131 = vector.broadcast %128 : vector<1x128xf32> to vector<256x128xf32>
    %132 = arith.addf %130, %131 : vector<256x128xf32>
    %cst_107 = arith.constant 0.000000e+00 : f32
    %133 = vector.broadcast %cst_107 : f32 to vector<256x128xf32>
    %134 = arith.maximumf %132, %133 : vector<256x128xf32>
    %135 = arith.truncf %134 : vector<256x128xf32> to vector<256x128xbf16>
    %c0_108 = arith.constant 0 : index
    %c0_109 = arith.constant 0 : index
    %136 = vector.load %arg11[%c0_108, %c0_109] : memref<128x128xbf16, #tpu.memory_space<vmem>>, vector<128x128xbf16>
    %cst_110 = arith.constant dense<0.000000e+00> : vector<256x128xf32>
    %137 = tpu.matmul %135, %136, %cst_110 {dimension_numbers = #tpu.dot_dimension_numbers<[1], [0], [0], [1], [0, 0, 1, 1], [], []>} : vector<256x128xbf16>, vector<128x128xbf16>, vector<256x128xf32> -> vector<256x128xf32>
    %c0_111 = arith.constant 0 : index
    %c0_112 = arith.constant 0 : index
    %138 = vector.load %arg12[%c0_111, %c0_112] : memref<1x128xf32, #tpu.memory_space<vmem>>, vector<1x128xf32>
    %139 = vector.broadcast %138 : vector<1x128xf32> to vector<256x128xf32>
    %140 = arith.addf %137, %139 : vector<256x128xf32>
    %c0_113 = arith.constant 0 : index
    %c0_114 = arith.constant 0 : index
    %141 = vector.load %arg15[%c0_113, %c0_114] : memref<128x128xf32, #tpu.memory_space<vmem>>, vector<128x128xf32>
    %c0_115 = arith.constant 0 : index
    %c0_116 = arith.constant 0 : index
    %142 = vector.load %arg13[%c0_115, %c0_116] : memref<1x128xf32, #tpu.memory_space<vmem>>, vector<1x128xf32>
    %c0_117 = arith.constant 0 : index
    %c0_118 = arith.constant 0 : index
    %143 = vector.load %arg14[%c0_117, %c0_118] : memref<1x128xf32, #tpu.memory_space<vmem>>, vector<1x128xf32>
    %cst_119 = arith.constant dense<0.000000e+00> : vector<128xf32>
    %144 = vector.multi_reduction <add>, %140, %cst_119 [0] : vector<256x128xf32> to vector<128xf32>
    %145 = vector.shape_cast %144 : vector<128xf32> to vector<1x128xf32>
    %cst_120 = arith.constant 3.906250e-03 : f32
    %146 = vector.broadcast %cst_120 : f32 to vector<1x128xf32>
    %147 = arith.mulf %145, %146 : vector<1x128xf32>
    %148 = arith.mulf %140, %140 : vector<256x128xf32>
    %cst_121 = arith.constant dense<0.000000e+00> : vector<128xf32>
    %149 = vector.multi_reduction <add>, %148, %cst_121 [0] : vector<256x128xf32> to vector<128xf32>
    %150 = vector.shape_cast %149 : vector<128xf32> to vector<1x128xf32>
    %cst_122 = arith.constant 3.906250e-03 : f32
    %151 = vector.broadcast %cst_122 : f32 to vector<1x128xf32>
    %152 = arith.mulf %150, %151 : vector<1x128xf32>
    %cst_123 = arith.constant dense<0.000000e+00> : vector<1x128xf32>
    %153 = tpu.matmul %147, %141, %cst_123 {dimension_numbers = #tpu.dot_dimension_numbers<[1], [0], [0], [1], [0, 0, 1, 1], [], []>} : vector<1x128xf32>, vector<128x128xf32>, vector<1x128xf32> -> vector<1x128xf32>
    %cst_124 = arith.constant dense<0.000000e+00> : vector<1x128xf32>
    %154 = tpu.matmul %152, %141, %cst_124 {dimension_numbers = #tpu.dot_dimension_numbers<[1], [0], [0], [1], [0, 0, 1, 1], [], []>} : vector<1x128xf32>, vector<128x128xf32>, vector<1x128xf32> -> vector<1x128xf32>
    %155 = arith.mulf %153, %153 : vector<1x128xf32>
    %156 = arith.subf %154, %155 : vector<1x128xf32>
    %cst_125 = arith.constant 0.000000e+00 : f32
    %157 = vector.broadcast %cst_125 : f32 to vector<1x128xf32>
    %158 = arith.maximumf %156, %157 : vector<1x128xf32>
    %cst_126 = arith.constant 9.99999974E-6 : f32
    %159 = vector.broadcast %cst_126 : f32 to vector<1x128xf32>
    %160 = arith.addf %158, %159 : vector<1x128xf32>
    %161 = math.rsqrt %160 : vector<1x128xf32>
    %162 = arith.mulf %161, %142 : vector<1x128xf32>
    %163 = arith.mulf %153, %162 : vector<1x128xf32>
    %164 = arith.subf %143, %163 : vector<1x128xf32>
    %165 = vector.broadcast %162 : vector<1x128xf32> to vector<256x128xf32>
    %166 = arith.mulf %140, %165 : vector<256x128xf32>
    %167 = vector.broadcast %164 : vector<1x128xf32> to vector<256x128xf32>
    %168 = arith.addf %166, %167 : vector<256x128xf32>
    %cst_127 = arith.constant 0.000000e+00 : f32
    %169 = vector.broadcast %cst_127 : f32 to vector<256x128xf32>
    %170 = arith.maximumf %168, %169 : vector<256x128xf32>
    %171 = arith.addf %1, %170 : vector<256x128xf32>
    %cst_128 = arith.constant 0.000000e+00 : f32
    %172 = vector.broadcast %cst_128 : f32 to vector<256x128xf32>
    %173 = arith.maximumf %171, %172 : vector<256x128xf32>
    %c0_129 = arith.constant 0 : index
    %c0_130 = arith.constant 0 : index
    %c0_131 = arith.constant 0 : index
    %174 = vector.load %arg16[%c0_129, %c0_130, %c0_131] : memref<1x256x128xf32, #tpu.memory_space<vmem>>, vector<1x256x128xf32>
    %175 = vector.shape_cast %174 : vector<1x256x128xf32> to vector<256x128xf32>
    %176 = vector.shape_cast %173 : vector<256x128xf32> to vector<1x256x128xf32>
    tpu.vector_store %arg16[%c0_129, %c0_130, %c0_131], %176 {strides = array<i32>} : memref<1x256x128xf32, #tpu.memory_space<vmem>>, vector<1x256x128xf32>,
    return
  }
  func.func @transform_0(%arg0: i32) -> (i32, i32, i32) {
    %c0_i32 = arith.constant 0 : i32
    %c0_i32_0 = arith.constant 0 : i32
    %c0_i32_1 = arith.constant 0 : i32
    return %arg0, %c0_i32, %c0_i32_0 : i32, i32, i32
  }
  func.func @transform_1(%arg0: i32) -> (i32, i32) {
    %c0_i32 = arith.constant 0 : i32
    %c0_i32_0 = arith.constant 0 : i32
    %c0_i32_1 = arith.constant 0 : i32
    return %c0_i32, %c0_i32_0 : i32, i32
  }
  func.func @transform_2(%arg0: i32) -> (i32, i32) {
    %c0_i32 = arith.constant 0 : i32
    %c0_i32_0 = arith.constant 0 : i32
    %c0_i32_1 = arith.constant 0 : i32
    return %c0_i32, %c0_i32_0 : i32, i32
  }
  func.func @transform_3(%arg0: i32) -> (i32, i32) {
    %c0_i32 = arith.constant 0 : i32
    %c0_i32_0 = arith.constant 0 : i32
    %c0_i32_1 = arith.constant 0 : i32
    return %c0_i32, %c0_i32_0 : i32, i32
  }
  func.func @transform_4(%arg0: i32) -> (i32, i32) {
    %c0_i32 = arith.constant 0 : i32
    %c0_i32_0 = arith.constant 0 : i32
    %c0_i32_1 = arith.constant 0 : i32
    return %c0_i32, %c0_i32_0 : i32, i32
  }
  func.func @transform_5(%arg0: i32) -> (i32, i32) {
    %c0_i32 = arith.constant 0 : i32
    %c0_i32_0 = arith.constant 0 : i32
    %c0_i32_1 = arith.constant 0 : i32
    return %c0_i32, %c0_i32_0 : i32, i32
  }
  func.func @transform_6(%arg0: i32) -> (i32, i32, i32) {
    %c0_i32 = arith.constant 0 : i32
    %c0_i32_0 = arith.constant 0 : i32
    %c0_i32_1 = arith.constant 0 : i32
    %c0_i32_2 = arith.constant 0 : i32
    return %c0_i32, %c0_i32_0, %c0_i32_1 : i32, i32, i32
  }
  func.func @transform_7(%arg0: i32) -> (i32, i32) {
    %c0_i32 = arith.constant 0 : i32
    %c0_i32_0 = arith.constant 0 : i32
    %c0_i32_1 = arith.constant 0 : i32
    return %c0_i32, %c0_i32_0 : i32, i32
  }
  func.func @transform_8(%arg0: i32) -> (i32, i32) {
    %c0_i32 = arith.constant 0 : i32
    %c0_i32_0 = arith.constant 0 : i32
    %c0_i32_1 = arith.constant 0 : i32
    return %c0_i32, %c0_i32_0 : i32, i32
  }
  func.func @transform_9(%arg0: i32) -> (i32, i32) {
    %c0_i32 = arith.constant 0 : i32
    %c0_i32_0 = arith.constant 0 : i32
    %c0_i32_1 = arith.constant 0 : i32
    return %c0_i32, %c0_i32_0 : i32, i32
  }
  func.func @transform_10(%arg0: i32) -> (i32, i32) {
    %c0_i32 = arith.constant 0 : i32
    %c0_i32_0 = arith.constant 0 : i32
    %c0_i32_1 = arith.constant 0 : i32
    return %c0_i32, %c0_i32_0 : i32, i32
  }
  func.func @transform_11(%arg0: i32) -> (i32, i32) {
    %c0_i32 = arith.constant 0 : i32
    %c0_i32_0 = arith.constant 0 : i32
    %c0_i32_1 = arith.constant 0 : i32
    return %c0_i32, %c0_i32_0 : i32, i32
  }
  func.func @transform_12(%arg0: i32) -> (i32, i32) {
    %c0_i32 = arith.constant 0 : i32
    %c0_i32_0 = arith.constant 0 : i32
    %c0_i32_1 = arith.constant 0 : i32
    return %c0_i32, %c0_i32_0 : i32, i32
  }
  func.func @transform_13(%arg0: i32) -> (i32, i32) {
    %c0_i32 = arith.constant 0 : i32
    %c0_i32_0 = arith.constant 0 : i32
    %c0_i32_1 = arith.constant 0 : i32
    return %c0_i32, %c0_i32_0 : i32, i32
  }
  func.func @transform_14(%arg0: i32) -> (i32, i32) {
    %c0_i32 = arith.constant 0 : i32
    %c0_i32_0 = arith.constant 0 : i32
    %c0_i32_1 = arith.constant 0 : i32
    return %c0_i32, %c0_i32_0 : i32, i32
  }
  func.func @transform_15(%arg0: i32) -> (i32, i32, i32) {
    %c0_i32 = arith.constant 0 : i32
    %c0_i32_0 = arith.constant 0 : i32
    %c0_i32_1 = arith.constant 0 : i32
    return %arg0, %c0_i32, %c0_i32_0 : i32, i32, i32
  }
}

</mosaic_0001>

<bundles_post_ra>
// kernel: bottleneck_block_pallas.1
= control target key start
LH: loop header
LB: loop body
LE: loop exit
PB: predicated region body
PF: predicated region fallthrough
CT: control target
= control target key end

     0   :  { %s10849_s0 = inlined_call_operand.hbm [shape: f32[2,256,128], index: 0, kind: input, shape index: {}]   ;;  %s10850_s1 = inlined_call_operand.hbm [shape: bf16[128,128], index: 1, kind: input, shape index: {}]   ;;  %s10851_s2 = inlined_call_operand.vmem [shape: f32[1,128], index: 2, kind: input, shape index: {}]   ;;  %s10852_s3 = inlined_call_operand.vmem [shape: f32[1,128], index: 3, kind: input, shape index: {}]   ;;  %s10853_s4 = inlined_call_operand.vmem [shape: f32[1,128], index: 4, kind: input, shape index: {}]   ;;  %s10854_s5 = inlined_call_operand.hbm [shape: f32[128,128], index: 5, kind: input, shape index: {}]   ;;  %s10855_s6 = inlined_call_operand.hbm [shape: bf16[9,128,128], index: 6, kind: input, shape index: {}]   ;;  %s10856_s7 = inlined_call_operand.vmem [shape: f32[1,128], index: 7, kind: input, shape index: {}]   ;;  %s10857_s8 = inlined_call_operand.vmem [shape: f32[1,128], index: 8, kind: input, shape index: {}]   ;;  %s10858_s9 = inlined_call_operand.vmem [shape: f32[1,128], index: 9, kind: input, shape index: {}]   ;;  %s10859_s10 = inlined_call_operand.hbm [shape: bf16[128,128], index: 10, kind: input, shape index: {}]   ;;  %s10860_s11 = inlined_call_operand.vmem [shape: f32[1,128], index: 11, kind: input, shape index: {}]   ;;  %s10861_s12 = inlined_call_operand.vmem [shape: f32[1,128], index: 12, kind: input, shape index: {}]   ;;  %s10862_s13 = inlined_call_operand.vmem [shape: f32[1,128], index: 13, kind: input, shape index: {}]   ;;  %s10863_s14 = inlined_call_operand.hbm [shape: f32[128,128], index: 14, kind: input, shape index: {}]   ;;  %s10864_s15 = inlined_call_operand.hbm [shape: f32[2,256,128], index: 15, kind: output, shape index: {}]  }
   0x1   :  { %10928 = sst [smem:[#allocation24_spill]] %s10850_s1 }
   0x2   :  { %10929 = sst [smem:[#allocation25_spill]] %s10855_s6 }
   0x3   :  { %10930 = sst [smem:[#allocation26_spill]] %s10856_s7 }
   0x4   :  { %10931 = sst [smem:[#allocation27_spill]] %s10857_s8 }
   0x5   :  { %10932 = sst [smem:[#allocation28_spill]] %s10858_s9 }
   0x6   :  { %10933 = sst [smem:[#allocation29_spill]] %s10860_s11 }
   0x7   :  { %10934 = sst [smem:[#allocation30_spill]] %s10861_s12 }
   0x8   :  { %10935 = sst [smem:[#allocation31_spill]] %s10862_s13 }
   0x9   :  { %10936 = sst [smem:[#allocation32_spill]] %s10864_s15 }
   0xa   :  { %20 = vsyncpa [#allocation4], 0 }
   0xb   :  { %22 = vsyncpa [#allocation4 + $0x1], 0 }
   0xc   :  { %23 = vsyncpa [#allocation7], 0 }
   0xd   :  { %24 = vsyncpa [#allocation10], 0 }
   0xe   :  { %25 = vsyncpa [#allocation13], 0 }
   0xf   :  { %26 = vsyncpa [#allocation5], 0 }
  0x10   :  { %28 = vsyncpa [#allocation5 + $0x1], 0  ;;  %s8515_s18 = smov 0   ;;  %s8517_s19 = smov 0  }
  0x11   :  { %s8519_s20 = smov 0   ;;  %s8521_s21 = smov 0  }
  0x12 LB: > { %s8418_s22 = smov [#allocation6]   ;;  %s8536_s24 = sadd.s32 4294967295, %s8416_s21   ;;  %s8416_s21 = sphi %s8521_s21, %s11037_s21   ;;  %s8412_s20 = sphi %s8519_s20, %s11036_s20   ;;  %s8408_s19 = sphi %s8517_s19, %s11035_s19   ;;  %s8404_s18 = sphi %s8515_s18, %s11034_s18  }
  0x13   : > { %s397_s23 = sshll.u32 %s8418_s22, 4  ;;  %p6298_p0 = scmp.ge.s32.totalorder %s8416_s21, 1  ;;  %s8541_s23 = int_to_ptr.vmem [resolvable:$true] %s397_s23 }
  0x14   : > { %p10868_p1 = scmp.eq.s32.totalorder %s8536_s24, 0  ;;  %p385_p2 = scmp.lt.s32.totalorder %s8416_s21, 3 }
  0x15   : > { %s8419_s26 = smov [#allocation9]   ;;  %s8420_s29 = smov [#allocation8]  }
  0x16   : > { %p8543_p3 = pnand %p6298_p0, %p385_p2  ;;  %s432_s27 = sshll.u32 %s8419_s26, 4  ;;  %s8556_s27 = int_to_ptr.vmem [resolvable:$true] %s432_s27 }
  0x17   : > { %s419_s30 = sshll.u32 %s8420_s29, 4  ;;  %s10939_s1 = sld [smem:[#allocation24_spill]]  ;;  %s8558_s30 = int_to_ptr.vmem [resolvable:$true] %s419_s30 }
  0x18   : > { %s10937_s25 = scalar_select %p8543_p3, 1, 0 }
  0x19   : > { %p7942_p5 = pneg %p8543_p3 }
  0x1b   : > { %p8552_p6 = pnand %p7942_p5, %p10868_p1 }
  0x1d   : > { %s8168_s22 = scalar_lea.hbm %s10939_s1, 1024  ;;  %p8568_p8 = pneg %p8552_p6 }
  0x1e   : > { %p8169_p7 = scmp.ne.s32.totalorder %s10939_s1, %s8168_s22  ;;  %p8175_p11 = scmp.lt.u32.totalorder %s8168_s22, %s10939_s1 }
  0x20   : > { %p8171_p9 = pnand %p8568_p8, %p8169_p7 }
  0x22   : > { %p8172_p10 = pneg %p8171_p9 }
  0x24   : > { %p8177_p12 = pnand %p8175_p11, %p8172_p10 }
  0x26   : > { %8180 = shalt.err (!%p8177_p12)
}
  0x27   : > { %s8181_s13 = scalar_lea.vmem %s8541_s23, 1024  ;;  %p8189_p5 = scmp.lt.s32.totalorder %s8541_s23, %s8541_s23 }
  0x28   : > { %p8182_p13 = scmp.ne.s32.totalorder %s8541_s23, %s8181_s13  ;;  %p8190_p4 = scmp.lt.s32.totalorder %s8181_s13, %s8181_s13 }
  0x2a   : > { %p8184_p0 = pnand %p8182_p13, %p8568_p8  ;;  %p8191_p7 = por %p8190_p4, %p8189_p5 }
  0x2c   : > { %p8185_p2 = pneg %p8184_p0 }
  0x2e   : > { %p8192_p9 = pnand %p8191_p7, %p8185_p2 }
  0x30   : > { %8195 = shalt.err (!%p8192_p9)
}
  0x31   : > { %s10866_s15 = smov 64   ;;  %s10867_s12 = smov 4  }
  0x32   : > { %7945 = dma.hbm_to_vmem [thread:$0]  (!%p8552_p6), %s10939_s1, 1024, %s8541_s23, [#allocation7], %s10866_s15, %s10866_s15, %s10867_s12  }
  0x33   : > { %s10941_s6 = sld [smem:[#allocation25_spill]] }
  0x39   : > { %s8196_s13 = scalar_lea.hbm %s10941_s6, 9216 }
  0x3a   : > { %p8197_p4 = scmp.ne.s32.totalorder %s10941_s6, %s8196_s13  ;;  %p8203_p12 = scmp.lt.u32.totalorder %s8196_s13, %s10941_s6 }
  0x3c   : > { %p8199_p10 = pnand %p8197_p4, %p8568_p8 }
  0x3e   : > { %p8200_p11 = pneg %p8199_p10 }
  0x40   : > { %p8205_p13 = pnand %p8203_p12, %p8200_p11 }
  0x42   : > { %8208 = shalt.err (!%p8205_p13)
}
  0x43   : > { %s8209_s23 = scalar_lea.vmem %s8556_s27, 9216  ;;  %p8217_p7 = scmp.lt.s32.totalorder %s8556_s27, %s8556_s27 }
  0x44   : > { %p8210_p0 = scmp.ne.s32.totalorder %s8556_s27, %s8209_s23  ;;  %p8218_p9 = scmp.lt.s32.totalorder %s8209_s23, %s8209_s23 }
  0x46   : > { %p8212_p2 = pnand %p8210_p0, %p8568_p8  ;;  %p8219_p4 = por %p8218_p9, %p8217_p7 }
  0x48   : > { %p8213_p5 = pneg %p8212_p2 }
  0x4a   : > { %p8220_p10 = pnand %p8219_p4, %p8213_p5 }
  0x4c   : > { %8223 = shalt.err (!%p8220_p10)
}
  0x4d   : > { %7951 = dma.hbm_to_vmem [thread:$0]  (!%p8552_p6), %s10941_s6, 9216, %s8556_s27, [#allocation10], %s10866_s15, %s10866_s15, %s10867_s12  }
  0x4e   : > { %s8224_s16 = scalar_lea.hbm %s10854_s5, 2048 }
  0x4f   : > { %p8225_p11 = scmp.ne.s32.totalorder %s10854_s5, %s8224_s16  ;;  %p8231_p0 = scmp.lt.u32.totalorder %s8224_s16, %s10854_s5 }
  0x51   : > { %p8227_p12 = pnand %p8225_p11, %p8568_p8 }
  0x53   : > { %p8228_p13 = pneg %p8227_p12 }
  0x55   : > { %p8233_p2 = pnand %p8231_p0, %p8228_p13 }
  0x57   : > { %8236 = shalt.err (!%p8233_p2)
}
  0x58   : > { %s8237_s27 = scalar_lea.vmem %s8558_s30, 2048  ;;  %p8245_p4 = scmp.lt.s32.totalorder %s8558_s30, %s8558_s30 }
  0x59   : > { %p8238_p5 = scmp.ne.s32.totalorder %s8558_s30, %s8237_s27  ;;  %p8246_p10 = scmp.lt.s32.totalorder %s8237_s27, %s8237_s27 }
  0x5b   : > { %p8240_p7 = pnand %p8238_p5, %p8568_p8  ;;  %p8247_p11 = por %p8246_p10, %p8245_p4 }
  0x5d   : > { %p8241_p9 = pneg %p8240_p7 }
  0x5f   : > { %p8248_p12 = pnand %p8247_p11, %p8241_p9 }
  0x61   : > { %8251 = shalt.err (!%p8248_p12)
}
  0x62   : > { %s8423_s23 = smov 128   ;;  %s8424_s7 = smov 8  }
  0x63   : > { %7948 = dma.hbm_to_vmem [thread:$0]  (!%p8552_p6), %s10854_s5, 2048, %s8558_s30, [#allocation7], %s8423_s23, %s8423_s23, %s8424_s7  }
  0x64   : > { %s8425_s11 = smov [#allocation11]   ;;  %s8426_s17 = smov [#allocation12]  }
  0x65   : > { %s454_s16 = sshll.u32 %s8425_s11, 4  ;;  %s476_s22 = sshll.u32 %s8426_s17, 4  ;;  %s455_s16 = int_to_ptr.vmem [resolvable:$true] %s454_s16  ;;  %s477_s22 = int_to_ptr.vmem [resolvable:$true] %s476_s22 }
  0x66   : > { %s8252_s27 = scalar_lea.hbm %s10859_s10, 1024 }
  0x67   : > { %p8253_p13 = scmp.ne.s32.totalorder %s10859_s10, %s8252_s27  ;;  %p8259_p5 = scmp.lt.u32.totalorder %s8252_s27, %s10859_s10 }
  0x69   : > { %p8255_p0 = pnand %p8253_p13, %p8568_p8 }
  0x6b   : > { %p8256_p2 = pneg %p8255_p0 }
  0x6d   : > { %p8261_p7 = pnand %p8259_p5, %p8256_p2 }
  0x6f   : > { %8264 = shalt.err (!%p8261_p7)
}
  0x70   : > { %s8265_s30 = scalar_lea.vmem %s455_s16, 1024  ;;  %p8273_p11 = scmp.lt.s32.totalorder %s455_s16, %s455_s16 }
  0x71   : > { %p8266_p9 = scmp.ne.s32.totalorder %s455_s16, %s8265_s30  ;;  %p8274_p12 = scmp.lt.s32.totalorder %s8265_s30, %s8265_s30 }
  0x73   : > { %p8268_p4 = pnand %p8266_p9, %p8568_p8  ;;  %p8275_p1 = por %p8274_p12, %p8273_p11 }
  0x75   : > { %p8269_p10 = pneg %p8268_p4 }
  0x77   : > { %p8276_p3 = pnand %p8275_p1, %p8269_p10 }
  0x79   : > { %8279 = shalt.err (!%p8276_p3)
}
  0x7a   : > { %s10942_s15 = smov 4   ;;  %s10943_s12 = smov 64  }
  0x7b   : > { %7954 = dma.hbm_to_vmem [thread:$0]  (!%p8552_p6), %s10859_s10, 1024, %s455_s16, [#allocation10], %s10943_s12, %s10943_s12, %s10942_s15  }
  0x7c   : > { %s8280_s11 = scalar_lea.hbm %s10863_s14, 2048 }
  0x7d   : > { %p8281_p1 = scmp.ne.s32.totalorder %s10863_s14, %s8280_s11  ;;  %p8287_p0 = scmp.lt.u32.totalorder %s8280_s11, %s10863_s14 }
  0x7f   : > { %p8283_p3 = pnand %p8281_p1, %p8568_p8 }
  0x81   : > { %p8284_p13 = pneg %p8283_p3 }
  0x83   : > { %p8289_p2 = pnand %p8287_p0, %p8284_p13 }
  0x85   : > { %8292 = shalt.err (!%p8289_p2)
}
  0x86   : > { %s8293_s30 = scalar_lea.vmem %s477_s22, 2048  ;;  %p8301_p4 = scmp.lt.s32.totalorder %s477_s22, %s477_s22 }
  0x87   : > { %p8294_p5 = scmp.ne.s32.totalorder %s477_s22, %s8293_s30  ;;  %p8302_p10 = scmp.lt.s32.totalorder %s8293_s30, %s8293_s30 }
  0x89   : > { %p8296_p7 = pnand %p8294_p5, %p8568_p8  ;;  %p8303_p11 = por %p8302_p10, %p8301_p4 }
  0x8b   : > { %p8297_p9 = pneg %p8296_p7 }
  0x8d   : > { %p8304_p12 = pnand %p8303_p11, %p8297_p9 }
  0x8f   : > { %8307 = shalt.err (!%p8304_p12)
}
  0x90   : > { %7957 = dma.hbm_to_vmem [thread:$0]  (!%p8552_p6), %s10863_s14, 2048, %s477_s22, [#allocation13], %s8423_s23, %s8423_s23, %s8424_s7  }
  0x91   : > { %s6297_s28 = sadd.s32 4294967294, %s8416_s21   ;;  %s8688_s26 = sadd.s32 1, %s8416_s21  }
  0x92   : > { %s41_s12 = sadd.s32 1, %s8412_s20  ;;  %s38_s1 = ssub.s32 %s8416_s21, %s8688_s26 }
  0x93   : > { %p48_p8 = scmp.ne.s32.totalorder %s8412_s20, %s8408_s19  ;;  %p39_p1 = scmp.eq.s32.totalorder %s38_s1, 0 }
  0x94   : > { %p49_p3 = scmp.eq.s32.totalorder %s8416_s21, 0  ;;  %p54_p13 = scmp.ne.s32.totalorder %s8408_s19, %s8404_s18 }
  0x95   : > { %p372_p0 = scmp.eq.s32.totalorder %s8536_s24, 1  ;;  %p10944_p5 = scmp.eq.s32.totalorder %s8536_s24, 0 }
  0x96   : > { %s8700_s6 = scalar_select %p39_p1, %s8412_s20, %s41_s12  }
  0x97   : > { %p50_p2 = por %p49_p3, %p48_p8  ;;  %p8704_p7 = por %p10944_p5, %p54_p13 }
  0x98   : > { %p8708_p6 = por %p372_p0, %p48_p8  ;;  %p378_p9 = scmp.eq.s32.totalorder %s6297_s28, 1 }
  0x99   : > { %p7971_p4 = scmp.lt.s32.totalorder %s8416_s21, 2  ;;  %s490_s9 = sand.u32 1, %s8412_s20  }
  0x9a   : > { %s10946_s22 = scalar_select %p8708_p6, 1, 0 }
  0x9b   : > { %p8714_p10 = por %p378_p9, %p54_p13  ;;  %s6305_s17 = sshll.u32 %s490_s9, 8 }
  0x9c   : > { %s6412_s29 = sshll.u32 %s8416_s21, 12  ;;  %s494_s16 = scalar_lea.vmem [#allocation3], %s6305_s17 }
  0x9d   : > { %s10947_s11 = scalar_select %p8714_p10, 1, 0 }
  0x9e   : > { %s8722_s30 = scalar_lea.hbm %s10849_s0, %s6412_s29  ;;  %s501_s15 = sshll.u32 %s494_s16, 4  ;;  %s8728_s15 = int_to_ptr.vmem [resolvable:$true] %s501_s15 }
  0x9f   : > { %p8724_p11 = pnand %p7971_p4, %p50_p2  ;;  %s8730_s12 = scalar_lea.sflag [#allocation4], %s490_s9 }
  0xa0   : > { %s8308_s1 = scalar_lea.hbm %s8722_s30, 4096  ;;  %s8313_s13 = scalar_lea.hbm %s10849_s0, 8192 }
  0xa1   : > { %p8309_p12 = scmp.ne.s32.totalorder %s8722_s30, %s8308_s1  ;;  %p8310_p8 = pneg %p8724_p11 }
  0xa2   : > { %p8314_p13 = scmp.lt.u32.totalorder %s8722_s30, %s10849_s0  ;;  %p8315_p0 = scmp.lt.u32.totalorder %s8313_s13, %s8308_s1 }
  0xa3   : > { %p8311_p1 = pnand %p8310_p8, %p8309_p12  ;;  %p8317_p5 = scmp.lt.u32.totalorder %s8308_s1, %s8722_s30 }
  0xa4   : > { %p8316_p2 = por %p8315_p0, %p8314_p13 }
  0xa5   : > { %p8312_p3 = pneg %p8311_p1 }
  0xa6   : > { %p8318_p9 = por %p8317_p5, %p8316_p2 }
  0xa8   : > { %p8319_p4 = pnand %p8318_p9, %p8312_p3 }
  0xaa   : > { %8322 = shalt.err (!%p8319_p4)
}
  0xab   : > { %s8323_s9 = scalar_lea.vmem %s8728_s15, 4096  ;;  %s8427_s17 = smov [#allocation3]  }
  0xac   : > { %p8324_p12 = scmp.ne.s32.totalorder %s8728_s15, %s8323_s9  ;;  %s8328_s29 = sshll.u32 %s8427_s17, 4  ;;  %s8329_s29 = int_to_ptr.vmem [resolvable:$false] %s8328_s29 }
  0xad   : > { %s8330_s27 = scalar_lea.vmem %s8329_s29, 8192  ;;  %p8331_p6 = scmp.lt.s32.totalorder %s8728_s15, %s8329_s29 }
  0xae   : > { %p8326_p1 = pnand %p8324_p12, %p8310_p8  ;;  %p8332_p13 = scmp.lt.s32.totalorder %s8330_s27, %s8323_s9 }
  0xb0   : > { %p8327_p10 = pneg %p8326_p1  ;;  %p8333_p0 = por %p8332_p13, %p8331_p6 }
  0xb2   : > { %p8334_p2 = pnand %p8333_p0, %p8327_p10 }
  0xb4   : > { %8337 = shalt.err (!%p8334_p2)
}
  0xb5   : > { %7961 = dma.hbm_to_vmem [thread:$0]  (!%p8724_p11), %s8722_s30, 4096, %s8728_s15, %s8730_s12, %s8423_s23, %s8423_s23, %s8424_s7  }
  0xb6   : > { %p10949_p8 = scmp.ne.s32.totalorder %s10937_s25, 0 }
  0xb8   : > { %513 = sbr.rel (%p10949_p8) target bundleno = 2414 (0x96e), region = 80 }
  0xbf   : > { %s8764_s1 = sand.u32 1, %s8408_s19  }
  0xc0   : > { %s6309_s13 = sshll.u32 %s8764_s1, 8  ;;  %s516_s16 = scalar_lea.sflag [#allocation4], %s8764_s1 }
  0xc1   : > { %s8770_s28 = scalar_lea.vmem [#allocation3], %s6309_s13 }
  0xc2   : > { %8383 = dma.done.wait (%p8704_p7), %s516_s16, 4096  }
  0xc3   : > { %8385 = vsyncadd (%p8704_p7), %s516_s16, 4294963200  ;;  %p10950_p6 = scmp.eq.s32.totalorder %s8536_s24, 0 }
  0xc5   : > { %8387 = dma.done.wait (%p10950_p6), [#allocation7], 3072   ;;  %p10951_p10 = pmov %p10950_p6 }
  0xc6   : > { %p10952_p11 = pmov %p10950_p6 }
  0xc7   : > { %8389 = vsyncadd (%p10951_p10), [#allocation7], 4294964224 }
  0xc8   : > { %8391 = dma.done.wait (%p10952_p11), [#allocation10], 10240   ;;  %p10953_p3 = pmov %p10950_p6 }
  0xca   : > { %8393 = vsyncadd (%p10953_p3), [#allocation10], 4294957056  ;;  %p10954_p5 = pmov %p10953_p3 }
  0xcb   : > { %p10955_p9 = pmov %p10953_p3 }
  0xcc   : > { %8395 = dma.done.wait (%p10954_p5), [#allocation13], 2048  }
  0xcd   : > { %8397 = vsyncadd (%p10955_p9), [#allocation13], 4294965248  ;;  %v8025_v0 = vld [vmem:[#allocation6] sm:$0xff]   ;;  %v8026_v1 = vld [vmem:[#allocation6 + $0x8] sm:$0xff]   ;;  %v10871_v58 = vmov 0.0|0.0   ;;  %vm8429_vm0 = vmmov 0  }
  0xce   : > { %6780 = vmatprep.subr.bf16.mxu1 %v8025_v0  ;;  %v8027_v2 = vld [vmem:[#allocation6 + $0x10] sm:$0xff]   ;;  %v8028_v3 = vld [vmem:[#allocation6 + $0x18] sm:$0xff]   ;;  %v587_v4 = vld [vmem:[%s8770_s28] sm:$0xff]  ;;  %vm2043_vm1 = vsmask.f32 7424  ;;  %s11023_s17 = sld [smem:[#allocation26_spill]] }
  0xcf   : > { %6781 = vmatpush3.bf16.msra.mxu1 %v8025_v0  ;;  %v588_v5 = vld [vmem:[%s8770_s28 + $0x8] sm:$0xff]  ;;  %v8029_v7 = vld [vmem:[#allocation6 + $0x20] sm:$0xff]   ;;  %v8031_v9 = vld [vmem:[#allocation6 + $0x30] sm:$0xff]   ;;  %vm1351_vm2 = vsmask.f32 256  ;;  %s11024_s16 = sld [smem:[#allocation27_spill]] }
  0xd0   : > { %6782 = vmatprep.subr.bf16.mxu1 %v8026_v1  ;;  %v619_v6 = vpack.c.bf16 %v588_v5, %v587_v4  ;;  %v8030_v8 = vld [vmem:[#allocation6 + $0x28] sm:$0xff]   ;;  %v8032_v10 = vld [vmem:[#allocation6 + $0x38] sm:$0xff]   ;;  %v589_v11 = vld [vmem:[%s8770_s28 + $0x10] sm:$0xff]  ;;  %s11025_s7 = sld [smem:[#allocation28_spill]]  ;;  %s11027_s15 = sld [smem:[#allocation29_spill]] }
  0xd1   : > { %v590_v12 = vld [vmem:[%s8770_s28 + $0x18] sm:$0xff]  ;;  %v591_v13 = vld [vmem:[%s8770_s28 + $0x20] sm:$0xff]  ;;  %v592_v14 = vld [vmem:[%s8770_s28 + $0x28] sm:$0xff]  ;;  %s6163_s30 = scalar_lea.sflag [#allocation5], %s8764_s1  ;;  %p11031_p4 = scmp.ne.s32.totalorder %s10946_s22, 0 }
  0xd2   : > { %6796 = vmatprep.mubr.bf16.mxu1 %v619_v6  ;;  %v620_v15 = vpack.c.bf16 %v590_v12, %v589_v11  ;;  %v621_v16 = vpack.c.bf16 %v592_v14, %v591_v13  ;;  %v593_v17 = vld [vmem:[%s8770_s28 + $0x30] sm:$0xff]  ;;  %v594_v18 = vld [vmem:[%s8770_s28 + $0x38] sm:$0xff]  ;;  %v595_v19 = vld [vmem:[%s8770_s28 + $0x40] sm:$0xff]  ;;  %s8432_s12 = smov [#allocation14]  }
  0xd3   : > { %6783 = vmatpush3.bf16.msra.mxu1 %v8026_v1  ;;  %v596_v20 = vld [vmem:[%s8770_s28 + $0x48] sm:$0xff]  ;;  %v622_v21 = vpack.c.bf16 %v594_v18, %v593_v17  ;;  %v597_v23 = vld [vmem:[%s8770_s28 + $0x50] sm:$0xff]  ;;  %v598_v24 = vld [vmem:[%s8770_s28 + $0x58] sm:$0xff]  ;;  %v10873_v17 = vmov 0.0   ;;  %s8342_s9 = sshll.u32 %s8432_s12, 4  ;;  %s8343_s9 = int_to_ptr.vmem [resolvable:$false] %s8342_s9 }
  0xd4   : > { %6784 = vmatprep.subr.bf16.mxu1 %v8027_v2  ;;  %v623_v22 = vpack.c.bf16 %v596_v20, %v595_v19  ;;  %v599_v25 = vld [vmem:[%s8770_s28 + $0x60] sm:$0xff]  ;;  %v600_v26 = vld [vmem:[%s8770_s28 + $0x68] sm:$0xff]  ;;  %v624_v27 = vpack.c.bf16 %v598_v24, %v597_v23  ;;  %v601_v29 = vld [vmem:[%s8770_s28 + $0x70] sm:$0xff] }
  0xd5   : > { %v625_v28 = vpack.c.bf16 %v600_v26, %v599_v25  ;;  %v602_v30 = vld [vmem:[%s8770_s28 + $0x78] sm:$0xff]  ;;  %v603_v31 = vld [vmem:[%s8770_s28 + $0x80] sm:$0xff]  ;;  %v604_v32 = vld [vmem:[%s8770_s28 + $0x88] sm:$0xff] }
  0xd6   : > { %v626_v33 = vpack.c.bf16 %v602_v30, %v601_v29  ;;  %v627_v34 = vpack.c.bf16 %v604_v32, %v603_v31  ;;  %v605_v35 = vld [vmem:[%s8770_s28 + $0x90] sm:$0xff]  ;;  %v606_v36 = vld [vmem:[%s8770_s28 + $0x98] sm:$0xff]  ;;  %v607_v37 = vld [vmem:[%s8770_s28 + $0xa0] sm:$0xff] }
  0xd7   : > { %6785 = vmatpush3.bf16.msra.mxu1 %v8027_v2  ;;  %v608_v38 = vld [vmem:[%s8770_s28 + $0xa8] sm:$0xff]  ;;  %v628_v39 = vpack.c.bf16 %v606_v36, %v605_v35  ;;  %v609_v41 = vld [vmem:[%s8770_s28 + $0xb0] sm:$0xff]  ;;  %v610_v42 = vld [vmem:[%s8770_s28 + $0xb8] sm:$0xff] }
  0xd8   : > { %6786 = vmatprep.subr.bf16.mxu1 %v8028_v3  ;;  %v629_v40 = vpack.c.bf16 %v608_v38, %v607_v37  ;;  %v611_v43 = vld [vmem:[%s8770_s28 + $0xc0] sm:$0xff]  ;;  %v612_v44 = vld [vmem:[%s8770_s28 + $0xc8] sm:$0xff]  ;;  %v630_v45 = vpack.c.bf16 %v610_v42, %v609_v41  ;;  %v613_v47 = vld [vmem:[%s8770_s28 + $0xd0] sm:$0xff] }
  0xd9   : > { %v631_v46 = vpack.c.bf16 %v612_v44, %v611_v43  ;;  %v614_v48 = vld [vmem:[%s8770_s28 + $0xd8] sm:$0xff]  ;;  %v615_v49 = vld [vmem:[%s8770_s28 + $0xe0] sm:$0xff]  ;;  %v616_v50 = vld [vmem:[%s8770_s28 + $0xe8] sm:$0xff] }
  0xda   : > { %v632_v51 = vpack.c.bf16 %v614_v48, %v613_v47  ;;  %v633_v52 = vpack.c.bf16 %v616_v50, %v615_v49  ;;  %v617_v53 = vld [vmem:[%s8770_s28 + $0xf0] sm:$0xff]  ;;  %v618_v54 = vld [vmem:[%s8770_s28 + $0xf8] sm:$0xff]  ;;  %v867_v56 = vld [vmem:[#allocation8] sm:$0xff] }
  0xdb   : > { %6787 = vmatpush3.bf16.msra.mxu1 %v8028_v3  ;;  %v634_v55 = vpack.c.bf16 %v618_v54, %v617_v53  ;;  %v868_v57 = vld [vmem:[#allocation8 + $0x8] sm:$0xff]  ;;  %v869_v60 = vld [vmem:[#allocation8 + $0x10] sm:$0xff]  ;;  %v870_v61 = vld [vmem:[#allocation8 + $0x18] sm:$0xff] }
  0xdc   : > { %6788 = vmatprep.subr.bf16.mxu1 %v8029_v7  ;;  %v8821_v59 = vpack.c.bf16 %v868_v57, %v867_v56  ;;  %v8825_v62 = vpack.c.bf16 %v870_v61, %v869_v60  ;;  %v871_v63 = vld [vmem:[#allocation8 + $0x20] sm:$0xff]  ;;  %v872_v0 = vld [vmem:[#allocation8 + $0x28] sm:$0xff]  ;;  %v873_v2 = vld [vmem:[#allocation8 + $0x30] sm:$0xff] }
  0xdd   : > { %v8829_v1 = vpack.c.bf16 %v872_v0, %v871_v63  ;;  %v874_v3 = vld [vmem:[#allocation8 + $0x38] sm:$0xff]  ;;  %v875_v5 = vld [vmem:[#allocation8 + $0x40] sm:$0xff]  ;;  %v876_v6 = vld [vmem:[#allocation8 + $0x48] sm:$0xff] }
  0xde   : > { %v8833_v4 = vpack.c.bf16 %v874_v3, %v873_v2  ;;  %v879_v11 = vld [vmem:[#allocation8 + $0x60] sm:$0xff]  ;;  %v880_v12 = vld [vmem:[#allocation8 + $0x68] sm:$0xff]  ;;  %v881_v14 = vld [vmem:[#allocation8 + $0x70] sm:$0xff] }
  0xdf   : > { %6789 = vmatpush3.bf16.msra.mxu1 %v8029_v7  ;;  %v8837_v7 = vpack.c.bf16 %v876_v6, %v875_v5  ;;  %v8845_v13 = vpack.c.bf16 %v880_v12, %v879_v11  ;;  %v8858_v18 = vld [vmem:[%s10851_s2] ss:$0 sm:$0xff] }
  0xe0   : > { %6790 = vmatprep.subr.bf16.mxu1 %v8030_v8 }
  0xe3   : > { %6791 = vmatpush3.bf16.msra.mxu1 %v8030_v8  ;;  %v877_v8 = vld [vmem:[#allocation8 + $0x50] sm:$0xff] }
  0xe4   : > { %6792 = vmatprep.subr.bf16.mxu1 %v8031_v9 }
  0xe7   : > { %6793 = vmatpush3.bf16.msra.mxu1 %v8031_v9  ;;  %v878_v9 = vld [vmem:[#allocation8 + $0x58] sm:$0xff] }
  0xe8   : > { %6794 = vmatprep.subr.bf16.mxu1 %v8032_v10 }
  0xeb   : > { %6795 = vmatpush3.bf16.msra.mxu1 %v8032_v10  ;;  %v8841_v10 = vpack.c.bf16 %v878_v9, %v877_v8 }
  0xec   : > { %7518 = vmatprep.subr.bf16.mxu1 %v10871_v58 }
  0xee   : > { %6797 = vmatmul.mubr.bf16.vlgmr.msra.gmra.mrb[0].mxu1 %v620_v15  ;;  %v882_v15 = vld [vmem:[#allocation8 + $0x78] sm:$0xff] }
  0xef   : > { %6800 = vmatprep.mubr.bf16.mxu1 %v621_v16  ;;  %7520 = vmatpush3.bf16.msra.mxu1 %v8821_v59  ;;  %v8849_v16 = vpack.c.bf16 %v882_v15, %v881_v14 }
  0xf0   : > { %7521 = vmatprep.subr.bf16.mxu1 %v10871_v58 }
  0xf3   : > { %7523 = vmatpush3.bf16.msra.mxu1 %v8825_v62 }
  0xf4   : > { %7524 = vmatprep.subr.bf16.mxu1 %v10871_v58 }
  0xf6   : > { %6801 = vmatmul.mubr.bf16.gmra.mrb[4].mxu1 %v622_v21 }
  0xf7   : > { %6804 = vmatprep.mubr.bf16.mxu1 %v623_v22  ;;  %7526 = vmatpush3.bf16.msra.mxu1 %v8829_v1 }
  0xf8   : > { %7527 = vmatprep.subr.bf16.mxu1 %v10871_v58 }
  0xfb   : > { %7529 = vmatpush3.bf16.msra.mxu1 %v8833_v4 }
  0xfc   : > { %7530 = vmatprep.subr.bf16.mxu1 %v10871_v58 }
  0xfe   : > { %6805 = vmatmul.mubr.bf16.gmra.mrb[8].mxu1 %v624_v27 }
  0xff   : > { %6808 = vmatprep.mubr.bf16.mxu1 %v625_v28  ;;  %7532 = vmatpush3.bf16.msra.mxu1 %v8837_v7 }
 0x100   : > { %7533 = vmatprep.subr.bf16.mxu1 %v10871_v58 }
 0x103   : > { %7535 = vmatpush3.bf16.msra.mxu1 %v8841_v10 }
 0x104   : > { %7536 = vmatprep.subr.bf16.mxu1 %v10871_v58 }
 0x106   : > { %6809 = vmatmul.mubr.bf16.gmra.mrb[12].mxu1 %v626_v33 }
 0x107   : > { %6812 = vmatprep.mubr.bf16.mxu1 %v627_v34  ;;  %7538 = vmatpush3.bf16.msra.mxu1 %v8845_v13 }
 0x108   : > { %7539 = vmatprep.subr.bf16.mxu1 %v10871_v58 }
 0x10b   : > { %7541 = vmatpush3.bf16.msra.mxu1 %v8849_v16 }
 0x10c   : > { %7542 = vmatprep.subr.bf16.mxu1 %v10871_v58 }
 0x10e   : > { %6813 = vmatmul.mubr.bf16.gmra.mrb[16].mxu1 %v628_v39 }
 0x10f   : > { %6816 = vmatprep.mubr.bf16.mxu1 %v629_v40 }
 0x116   : > { %6817 = vmatmul.mubr.bf16.gmra.mrb[20].mxu1 %v630_v45 }
 0x117   : > { %6820 = vmatprep.mubr.bf16.mxu1 %v631_v46 }
 0x11e   : > { %6821 = vmatmul.mubr.bf16.gmra.mrb[24].mxu1 %v632_v51 }
 0x11f   : > { %6824 = vmatprep.mubr.bf16.mxu1 %v633_v52 }
 0x126   : > { %6825 = vmatmul.mubr.bf16.gmra.mrb[28].mxu1 %v634_v55 }
 0x127   : > { %6860 = vmatprep.mubr.msk.f32.mxu1 %vm8429_vm0, %v10873_v17 }
 0x1c1   : > { %v6798_v19 = vpop.f32.mrb[0].mxu1 }
 0x1c2   : > { %v740_v20 = vpop.f32.mrb[1].mxu1  ;;  %v8864_v24 = vadd.f32 %v6798_v19, %v8858_v18 }
 0x1c3   : > { %v8861_v21 = vadd.f32 %v8858_v18, %v740_v20  ;;  %v6799_v22 = vpop.f32.mrb[2].mxu1 }
 0x1c4   : > { %v743_v23 = vpop.f32.mrb[3].mxu1  ;;  %v8872_v27 = vadd.f32 %v6799_v22, %v8858_v18  ;;  %v925_v30 = vmul.f32 %v8864_v24, %v8864_v24 }
 0x1c5   : > { %v8867_v25 = vadd.f32 %v8858_v18, %v743_v23  ;;  %v923_v26 = vmul.f32 %v8861_v21, %v8861_v21 }
 0x1c6   : > { %v926_v35 = vmul.f32 %v8872_v27, %v8872_v27 }
 0x1c7   : > { %v885_v28 = vadd.f32 %v8867_v25, %v8861_v21  ;;  %v924_v29 = vmul.f32 %v8867_v25, %v8867_v25 }
 0x1c9   : > { %v886_v31 = vadd.f32 %v885_v28, %v8864_v24  ;;  %v955_v32 = vadd.f32 %v924_v29, %v923_v26  ;;  %v6802_v33 = vpop.f32.mrb[4].mxu1 }
 0x1ca   : > { %v756_v34 = vpop.f32.mrb[5].mxu1  ;;  %v8888_v40 = vadd.f32 %v6802_v33, %v8858_v18 }
 0x1cb   : > { %v956_v36 = vadd.f32 %v955_v32, %v925_v30  ;;  %v8884_v37 = vadd.f32 %v8858_v18, %v756_v34  ;;  %v887_v38 = vadd.f32 %v886_v31, %v8872_v27  ;;  %v6803_v39 = vpop.f32.mrb[6].mxu1 }
 0x1cc   : > { %v759_v41 = vpop.f32.mrb[7].mxu1  ;;  %v8897_v47 = vadd.f32 %v6803_v39, %v8858_v18  ;;  %v929_v50 = vmul.f32 %v8888_v40, %v8888_v40 }
 0x1cd   : > { %v888_v42 = vadd.f32 %v887_v38, %v8884_v37  ;;  %v927_v43 = vmul.f32 %v8884_v37, %v8884_v37  ;;  %v957_v44 = vadd.f32 %v956_v36, %v926_v35  ;;  %v8894_v45 = vadd.f32 %v8858_v18, %v759_v41 }
 0x1ce   : > { %v930_v55 = vmul.f32 %v8897_v47, %v8897_v47 }
 0x1cf   : > { %v958_v46 = vadd.f32 %v957_v44, %v927_v43  ;;  %v889_v48 = vadd.f32 %v888_v42, %v8894_v45  ;;  %v928_v49 = vmul.f32 %v8894_v45, %v8894_v45 }
 0x1d1   : > { %v890_v51 = vadd.f32 %v889_v48, %v8888_v40  ;;  %v959_v52 = vadd.f32 %v958_v46, %v928_v49  ;;  %v6806_v53 = vpop.f32.mrb[8].mxu1 }
 0x1d2   : > { %v772_v54 = vpop.f32.mrb[9].mxu1  ;;  %v8912_v63 = vadd.f32 %v6806_v53, %v8858_v18 }
 0x1d3   : > { %v960_v56 = vadd.f32 %v959_v52, %v929_v50  ;;  %v8908_v57 = vadd.f32 %v8858_v18, %v772_v54  ;;  %v891_v60 = vadd.f32 %v890_v51, %v8897_v47  ;;  %v6807_v61 = vpop.f32.mrb[10].mxu1 }
 0x1d4   : > { %v775_v0 = vpop.f32.mrb[11].mxu1  ;;  %v8921_v9 = vadd.f32 %v6807_v61, %v8858_v18  ;;  %v933_v14 = vmul.f32 %v8912_v63, %v8912_v63 }
 0x1d5   : > { %v892_v2 = vadd.f32 %v891_v60, %v8908_v57  ;;  %v931_v3 = vmul.f32 %v8908_v57, %v8908_v57  ;;  %v961_v5 = vadd.f32 %v960_v56, %v930_v55  ;;  %v8918_v6 = vadd.f32 %v8858_v18, %v775_v0 }
 0x1d6   : > { %v934_v23 = vmul.f32 %v8921_v9, %v8921_v9 }
 0x1d7   : > { %v962_v8 = vadd.f32 %v961_v5, %v931_v3  ;;  %v893_v11 = vadd.f32 %v892_v2, %v8918_v6  ;;  %v932_v12 = vmul.f32 %v8918_v6, %v8918_v6 }
 0x1d9   : > { %v894_v15 = vadd.f32 %v893_v11, %v8912_v63  ;;  %v963_v19 = vadd.f32 %v962_v8, %v932_v12  ;;  %v6810_v20 = vpop.f32.mrb[12].mxu1 }
 0x1da   : > { %v788_v22 = vpop.f32.mrb[13].mxu1  ;;  %v8936_v31 = vadd.f32 %v6810_v20, %v8858_v18 }
 0x1db   : > { %v964_v26 = vadd.f32 %v963_v19, %v933_v14  ;;  %v8932_v28 = vadd.f32 %v8858_v18, %v788_v22  ;;  %v895_v29 = vadd.f32 %v894_v15, %v8921_v9  ;;  %v6811_v30 = vpop.f32.mrb[14].mxu1 }
 0x1dc   : > { %v791_v32 = vpop.f32.mrb[15].mxu1  ;;  %v8945_v39 = vadd.f32 %v6811_v30, %v8858_v18  ;;  %v937_v43 = vmul.f32 %v8936_v31, %v8936_v31 }
 0x1dd   : > { %v896_v33 = vadd.f32 %v895_v29, %v8932_v28  ;;  %v935_v34 = vmul.f32 %v8932_v28, %v8932_v28  ;;  %v965_v35 = vadd.f32 %v964_v26, %v934_v23  ;;  %v8942_v36 = vadd.f32 %v8858_v18, %v791_v32 }
 0x1de   : > { %v938_v50 = vmul.f32 %v8945_v39, %v8945_v39 }
 0x1df   : > { %v966_v38 = vadd.f32 %v965_v35, %v935_v34  ;;  %v897_v41 = vadd.f32 %v896_v33, %v8942_v36  ;;  %v936_v42 = vmul.f32 %v8942_v36, %v8942_v36 }
 0x1e1   : > { %v898_v44 = vadd.f32 %v897_v41, %v8936_v31  ;;  %v967_v46 = vadd.f32 %v966_v38, %v936_v42  ;;  %v6814_v48 = vpop.f32.mrb[16].mxu1 }
 0x1e2   : > { %v804_v49 = vpop.f32.mrb[17].mxu1  ;;  %v8960_v55 = vadd.f32 %v6814_v48, %v8858_v18 }
 0x1e3   : > { %v968_v51 = vadd.f32 %v967_v46, %v937_v43  ;;  %v8956_v52 = vadd.f32 %v8858_v18, %v804_v49  ;;  %v899_v53 = vadd.f32 %v898_v44, %v8945_v39  ;;  %v6815_v54 = vpop.f32.mrb[18].mxu1 }
 0x1e4   : > { %v807_v56 = vpop.f32.mrb[19].mxu1  ;;  %v8969_v5 = vadd.f32 %v6815_v54, %v8858_v18  ;;  %v941_v12 = vmul.f32 %v8960_v55, %v8960_v55 }
 0x1e5   : > { %v900_v60 = vadd.f32 %v899_v53, %v8956_v52  ;;  %v939_v61 = vmul.f32 %v8956_v52, %v8956_v52  ;;  %v969_v0 = vadd.f32 %v968_v51, %v938_v50  ;;  %v8966_v2 = vadd.f32 %v8858_v18, %v807_v56 }
 0x1e6   : > { %v942_v22 = vmul.f32 %v8969_v5, %v8969_v5 }
 0x1e7   : > { %v970_v3 = vadd.f32 %v969_v0, %v939_v61  ;;  %v901_v8 = vadd.f32 %v900_v60, %v8966_v2  ;;  %v940_v11 = vmul.f32 %v8966_v2, %v8966_v2 }
 0x1e9   : > { %v902_v14 = vadd.f32 %v901_v8, %v8960_v55  ;;  %v971_v15 = vadd.f32 %v970_v3, %v940_v11  ;;  %v6818_v19 = vpop.f32.mrb[20].mxu1 }
 0x1ea   : > { %v820_v20 = vpop.f32.mrb[21].mxu1  ;;  %v8984_v32 = vadd.f32 %v6818_v19, %v8858_v18 }
 0x1eb   : > { %v972_v23 = vadd.f32 %v971_v15, %v941_v12  ;;  %v8980_v26 = vadd.f32 %v8858_v18, %v820_v20  ;;  %v903_v29 = vadd.f32 %v902_v14, %v8969_v5  ;;  %v6819_v30 = vpop.f32.mrb[22].mxu1 }
 0x1ec   : > { %v823_v33 = vpop.f32.mrb[23].mxu1  ;;  %v8993_v43 = vadd.f32 %v6819_v30, %v8858_v18  ;;  %v945_v48 = vmul.f32 %v8984_v32, %v8984_v32 }
 0x1ed   : > { %v904_v34 = vadd.f32 %v903_v29, %v8980_v26  ;;  %v943_v35 = vmul.f32 %v8980_v26, %v8980_v26  ;;  %v973_v38 = vadd.f32 %v972_v23, %v942_v22  ;;  %v8990_v41 = vadd.f32 %v8858_v18, %v823_v33 }
 0x1ee   : > { %v946_v54 = vmul.f32 %v8993_v43, %v8993_v43 }
 0x1ef   : > { %v974_v42 = vadd.f32 %v973_v38, %v943_v35  ;;  %v905_v44 = vadd.f32 %v904_v34, %v8990_v41  ;;  %v944_v46 = vmul.f32 %v8990_v41, %v8990_v41 }
 0x1f1   : > { %v906_v49 = vadd.f32 %v905_v44, %v8984_v32  ;;  %v975_v50 = vadd.f32 %v974_v42, %v944_v46  ;;  %v6822_v51 = vpop.f32.mrb[24].mxu1 }
 0x1f2   : > { %v836_v53 = vpop.f32.mrb[25].mxu1  ;;  %v9014_v15 = vadd.f32 %v6822_v51, %v8858_v18 }
 0x1f3   : > { %v976_v56 = vadd.f32 %v975_v50, %v945_v48  ;;  %v9004_v60 = vadd.f32 %v8858_v18, %v836_v53  ;;  %v907_v61 = vadd.f32 %v906_v49, %v8993_v43  ;;  %v6823_v0 = vpop.f32.mrb[26].mxu1 }
 0x1f4   : > { %v839_v3 = vpop.f32.mrb[27].mxu1  ;;  %v9018_v22 = vadd.f32 %v6823_v0, %v8858_v18  ;;  %v949_v49 = vmul.f32 %v9014_v15, %v9014_v15 }
 0x1f5   : > { %v908_v8 = vadd.f32 %v907_v61, %v9004_v60  ;;  %v947_v11 = vmul.f32 %v9004_v60, %v9004_v60  ;;  %v977_v12 = vadd.f32 %v976_v56, %v946_v54  ;;  %v9011_v14 = vadd.f32 %v8858_v18, %v839_v3 }
 0x1f6   : > { %v950_v61 = vmul.f32 %v9018_v22, %v9018_v22 }
 0x1f7   : > { %v909_v19 = vadd.f32 %v908_v8, %v9011_v14  ;;  %v978_v20 = vadd.f32 %v977_v12, %v947_v11  ;;  %v948_v29 = vmul.f32 %v9011_v14, %v9011_v14 }
 0x1f9   : > { %v910_v23 = vadd.f32 %v909_v19, %v9014_v15  ;;  %v6826_v30 = vpop.f32.mrb[28].mxu1  ;;  %v979_v44 = vadd.f32 %v978_v20, %v948_v29 }
 0x1fa   : > { %v852_v33 = vpop.f32.mrb[29].mxu1  ;;  %v9034_v50 = vadd.f32 %v6826_v30, %v8858_v18 }
 0x1fb   : > { %v9024_v34 = vadd.f32 %v8858_v18, %v852_v33  ;;  %v911_v35 = vadd.f32 %v910_v23, %v9018_v22  ;;  %v6827_v38 = vpop.f32.mrb[30].mxu1  ;;  %v980_v53 = vadd.f32 %v979_v44, %v949_v49 }
 0x1fc   : > { %v855_v42 = vpop.f32.mrb[31].mxu1  ;;  %v9038_v54 = vadd.f32 %v6827_v38, %v8858_v18  ;;  %v953_v33 = vmul.f32 %v9034_v50, %v9034_v50 }
 0x1fd   : > { %v912_v46 = vadd.f32 %v911_v35, %v9024_v34  ;;  %v9029_v48 = vadd.f32 %v8858_v18, %v855_v42  ;;  %v951_v3 = vmul.f32 %v9024_v34, %v9024_v34  ;;  %v981_v8 = vadd.f32 %v980_v53, %v950_v61  ;;  %v8035_v61 = vld [vmem:[#allocation9 + $0x80] sm:$0xff]  }
 0x1fe   : > { %v954_v44 = vmul.f32 %v9038_v54, %v9038_v54  ;;  %6994 = vmatprep.subr.bf16.mxu0 %v8035_v61 }
 0x1ff   : > { %v913_v51 = vadd.f32 %v912_v46, %v9029_v48  ;;  %v982_v19 = vadd.f32 %v981_v8, %v951_v3  ;;  %v952_v23 = vmul.f32 %v9029_v48, %v9029_v48  ;;  %6995 = vmatpush3.bf16.msra.mxu0 %v8035_v61  ;;  %v8040_v3 = vld [vmem:[#allocation9 + $0x60] sm:$0xff]   ;;  %v8041_v8 = vld [vmem:[#allocation9 + $0x98] sm:$0xff]  }
 0x201   : > { %v914_v56 = vadd.f32 %v913_v51, %v9034_v50  ;;  %v983_v29 = vadd.f32 %v982_v19, %v952_v23  ;;  %v8044_v19 = vld [vmem:[#allocation9 + $0x70] sm:$0xff]   ;;  %v8431_v23 = vmov 0  }
 0x202   : > { %1248 = vst [vmem:[#allocation2 + $0x8] sm:$0xff] %v8431_v23  ;;  %1247 = vst [vmem:[#allocation2] sm:$0xff] %v8431_v23 }
 0x203   : > { %v915_v0 = vadd.f32 %v914_v56, %v9038_v54  ;;  %v984_v38 = vadd.f32 %v983_v29, %v953_v33  ;;  %v8033_v56 = vld [vmem:[#allocation9 + $0x40] sm:$0xff]   ;;  %1249 = vst [vmem:[#allocation2 + $0x10] sm:$0xff] %v8431_v23  ;;  %1251 = vst [vmem:[#allocation2 + $0x198] sm:$0xff] %v8431_v23  ;;  %v8047_v29 = vld [vmem:[#allocation9 + $0xb0] sm:$0xff]  }
 0x204   : > { %1253 = vst [vmem:[#allocation2 + $0x1a8] sm:$0xff] %v8431_v23  ;;  %1255 = vst [vmem:[#allocation2 + $0x18] sm:$0xff] %v8431_v23  ;;  %v8048_v33 = vld [vmem:[#allocation9 + $0xb8] sm:$0xff]  }
 0x205   : > { %v916_v11 = vrot.slane %v915_v0, 4  ;;  %v985_v46 = vadd.f32 %v984_v38, %v954_v44  ;;  %1256 = vst [vmem:[#allocation2 + $0x30] sm:$0xff] %v8431_v23  ;;  %1257 = vst [vmem:[#allocation2 + $0x48] sm:$0xff] %v8431_v23 }
 0x206   : > { %1258 = vst [vmem:[#allocation2 + $0x60] sm:$0xff] %v8431_v23  ;;  %1259 = vst [vmem:[#allocation2 + $0x78] sm:$0xff] %v8431_v23 }
 0x207   : > { %v917_v12 = vadd.f32 %v916_v11, %v915_v0  ;;  %v986_v49 = vrot.slane %v985_v46, 4  ;;  %v8038_v0 = vld [vmem:[#allocation9 + $0x58] sm:$0xff]   ;;  %v8042_v11 = vld [vmem:[#allocation9 + $0x68] sm:$0xff]   ;;  %1260 = vst [vmem:[#allocation2 + $0x90] sm:$0xff] %v8431_v23  ;;  %1261 = vst [vmem:[#allocation2 + $0xa8] sm:$0xff] %v8431_v23 }
 0x208   : > { %1262 = vst [vmem:[#allocation2 + $0xc0] sm:$0xff] %v8431_v23  ;;  %1263 = vst [vmem:[#allocation2 + $0xd8] sm:$0xff] %v8431_v23 }
 0x209   : > { %v918_v20 = vrot.slane %v917_v12, 2  ;;  %v987_v51 = vadd.f32 %v986_v49, %v985_v46  ;;  %1264 = vst [vmem:[#allocation2 + $0xf0] sm:$0xff] %v8431_v23  ;;  %1265 = vst [vmem:[#allocation2 + $0x108] sm:$0xff] %v8431_v23  ;;  %v9071_v46 = vld [vmem:[#allocation9 + $0xc0] sm:$0xff]  }
 0x20a   : > { %1266 = vst [vmem:[#allocation2 + $0x120] sm:$0xff] %v8431_v23  ;;  %1267 = vst [vmem:[#allocation2 + $0x138] sm:$0xff] %v8431_v23 }
 0x20b   : > { %v919_v18 = vadd.f32 %v918_v20, %v917_v12  ;;  %v8043_v12 = vld [vmem:[#allocation9 + $0xa0] sm:$0xff]   ;;  %v8045_v20 = vld [vmem:[#allocation9 + $0xa8] sm:$0xff]   ;;  %1268 = vst [vmem:[#allocation2 + $0x150] sm:$0xff] %v8431_v23  ;;  %1269 = vst [vmem:[#allocation2 + $0x168] sm:$0xff] %v8431_v23 }
 0x20c   : > { %1270 = vst [vmem:[#allocation2 + $0x180] sm:$0xff] %v8431_v23  ;;  %1271 = vst [vmem:[#allocation2 + $0x28] sm:$0xff] %v8431_v23 }
 0x20d   : > { %v920_v30 = vrot.slane %v919_v18, 1  ;;  %1272 = vst [vmem:[#allocation2 + $0x40] sm:$0xff] %v8431_v23  ;;  %1273 = vst [vmem:[#allocation2 + $0x58] sm:$0xff] %v8431_v23 }
 0x20e   : > { %1274 = vst [vmem:[#allocation2 + $0x70] sm:$0xff] %v8431_v23  ;;  %1275 = vst [vmem:[#allocation2 + $0x88] sm:$0xff] %v8431_v23 }
 0x20f   : > { %v921_v35 = vadd.f32 %v920_v30, %v919_v18  ;;  %1276 = vst [vmem:[#allocation2 + $0xa0] sm:$0xff] %v8431_v23  ;;  %1277 = vst [vmem:[#allocation2 + $0xb8] sm:$0xff] %v8431_v23  ;;  %v8046_v18 = vld [vmem:[#allocation9 + $0x78] sm:$0xff]   ;;  %v2012_v30 = vld [vmem:[#allocation2 + $0x10] sm:$0x1] }
 0x210   : > { %1278 = vst [vmem:[#allocation2 + $0xd0] sm:$0xff] %v8431_v23  ;;  %1279 = vst [vmem:[#allocation2 + $0xe8] sm:$0xff] %v8431_v23  ;;  %v2052_v38 = vshll.u32 %v2012_v30, 16 }
 0x211   : > { %v922_v42 = vmul.f32 0.00390625, %v921_v35  ;;  %1280 = vst [vmem:[#allocation2 + $0x100] sm:$0xff] %v8431_v23  ;;  %1281 = vst [vmem:[#allocation2 + $0x118] sm:$0xff] %v8431_v23  ;;  %v2049_v35 = vrot.slane %v8431_v23, 1 }
 0x212   : > { %1282 = vst [vmem:[#allocation2 + $0x130] sm:$0xff] %v8431_v23  ;;  %1283 = vst [vmem:[#allocation2 + $0x148] sm:$0xff] %v8431_v23  ;;  %v2054_v44 = vrot.slane %v2052_v38, 1 }
 0x213   : > { %6861 = vmatmul.mubr.f32.vlgmr.msra.gmra.mrb[32].mxu1 %v922_v42  ;;  %1284 = vst [vmem:[#allocation2 + $0x160] sm:$0xff] %v8431_v23  ;;  %1285 = vst [vmem:[#allocation2 + $0x178] sm:$0xff] %v8431_v23  ;;  %v9069_v42 = vrot.slane %v8431_v23, 7 }
 0x214   : > { %7544 = vmatpush3.bf16.msra.mxu1 %v8821_v59  ;;  %6895 = vmatprep.mubr.msk.f32.mxu1 %vm8429_vm0, %v10873_v17  ;;  %v988_v59 = vrot.slane %v987_v51, 2  ;;  %1286 = vst [vmem:[#allocation2 + $0x190] sm:$0xff] %v8431_v23  ;;  %v2055_v49 = vsel %vm2043_vm1, %v2049_v35, %v2054_v44 }
 0x215   : > { %7545 = vmatprep.subr.bf16.mxu1 %v10871_v58  ;;  %7010 = vmatprep.mubr.bf16.mxu0 %v2055_v49 }
 0x216   : > { %v989_v53 = vadd.f32 %v988_v59, %v987_v51  ;;  %v9075_v51 = vld [vmem:[#allocation9] sm:$0xff]  }
 0x218   : > { %7547 = vmatpush3.bf16.msra.mxu1 %v8825_v62  ;;  %v990_v62 = vrot.slane %v989_v53, 1 }
 0x219   : > { %7548 = vmatprep.subr.bf16.mxu1 %v10871_v58 }
 0x21c   : > { %7550 = vmatpush3.bf16.msra.mxu1 %v8829_v1  ;;  %v991_v1 = vadd.f32 %v990_v62, %v989_v53 }
 0x21d   : > { %7551 = vmatprep.subr.bf16.mxu1 %v10871_v58 }
 0x220   : > { %7553 = vmatpush3.bf16.msra.mxu1 %v8833_v4  ;;  %v992_v4 = vmul.f32 0.00390625, %v991_v1 }
 0x221   : > { %7554 = vmatprep.subr.bf16.mxu1 %v10871_v58 }
 0x224   : > { %7556 = vmatpush3.bf16.msra.mxu1 %v8837_v7  ;;  %v8034_v7 = vld [vmem:[#allocation9 + $0x48] sm:$0xff]  }
 0x225   : > { %7557 = vmatprep.subr.bf16.mxu1 %v10871_v58 }
 0x228   : > { %7559 = vmatpush3.bf16.msra.mxu1 %v8841_v10  ;;  %v8036_v10 = vld [vmem:[#allocation9 + $0x50] sm:$0xff]  }
 0x229   : > { %7560 = vmatprep.subr.bf16.mxu1 %v10871_v58 }
 0x22c   : > { %7562 = vmatpush3.bf16.msra.mxu1 %v8845_v13  ;;  %v8037_v13 = vld [vmem:[#allocation9 + $0x88] sm:$0xff]  }
 0x22d   : > { %7563 = vmatprep.subr.bf16.mxu1 %v10871_v58  ;;  %6996 = vmatprep.subr.bf16.mxu0 %v8037_v13 }
 0x22e   : > { %6997 = vmatpush3.bf16.msra.mxu0 %v8037_v13 }
 0x230   : > { %7565 = vmatpush3.bf16.msra.mxu1 %v8849_v16  ;;  %v8039_v16 = vld [vmem:[#allocation9 + $0x90] sm:$0xff]  }
 0x231   : > { %6898 = vmatprep.subr.bf16.mxu1 %v8033_v56  ;;  %6998 = vmatprep.subr.bf16.mxu0 %v8039_v16 }
 0x232   : > { %6999 = vmatpush3.bf16.msra.mxu0 %v8039_v16 }
 0x233   : > { %6896 = vmatmul.mubr.f32.vlgmr.msra.gmra.mrb[34].mxu1 %v992_v4  ;;  %7000 = vmatprep.subr.bf16.mxu0 %v8041_v8 }
 0x234   : > { %6899 = vmatpush3.bf16.msra.mxu1 %v8033_v56  ;;  %6914 = vmatprep.mubr.bf16.mxu1 %v8431_v23 }
 0x235   : > { %6900 = vmatprep.subr.bf16.mxu1 %v8034_v7 }
 0x236   : > { %7001 = vmatpush3.bf16.msra.mxu0 %v8041_v8 }
 0x237   : > { %7002 = vmatprep.subr.bf16.mxu0 %v8043_v12 }
 0x238   : > { %6901 = vmatpush3.bf16.msra.mxu1 %v8034_v7 }
 0x239   : > { %6902 = vmatprep.subr.bf16.mxu1 %v8036_v10 }
 0x23a   : > { %7003 = vmatpush3.bf16.msra.mxu0 %v8043_v12  ;;  %v9085_v12 = vld [vmem:[#allocation2 + $0x40] sm:$0x1] }
 0x23b   : > { %7004 = vmatprep.subr.bf16.mxu0 %v8045_v20 }
 0x23c   : > { %6903 = vmatpush3.bf16.msra.mxu1 %v8036_v10  ;;  %v1141_v10 = vlaneseq }
 0x23d   : > { %6904 = vmatprep.subr.bf16.mxu1 %v8038_v0 }
 0x23e   : > { %7005 = vmatpush3.bf16.msra.mxu0 %v8045_v20  ;;  %v1142_v13 = vshrl.u32 %v1141_v10, 7 }
 0x23f   : > { %7006 = vmatprep.subr.bf16.mxu0 %v8047_v29 }
 0x240   : > { %6905 = vmatpush3.bf16.msra.mxu1 %v8038_v0  ;;  %v883_v0 = vld [vmem:[%s10852_s3] sm:$0x1]  ;;  %v9081_v16 = vsub.s32 0, %v1142_v13 }
 0x241   : > { %6906 = vmatprep.subr.bf16.mxu1 %v8040_v3 }
 0x242   : > { %7007 = vmatpush3.bf16.msra.mxu0 %v8047_v29  ;;  %10956 = vst [vmem:[#allocation20_spill] sm:$0xff] %v9081_v16  ;;  %v2076_v29 = vshll.u32 %v9085_v12, 16 }
 0x243   : > { %7008 = vmatprep.subr.bf16.mxu0 %v8048_v33 }
 0x244   : > { %6907 = vmatpush3.bf16.msra.mxu1 %v8040_v3 }
 0x245   : > { %6908 = vmatprep.subr.bf16.mxu1 %v8042_v11 }
 0x246   : > { %7009 = vmatpush3.bf16.msra.mxu0 %v8048_v33 }
 0x247   : > { %7042 = vmatprep.subr.bf16.mxu0 %v9071_v46 }
 0x248   : > { %6909 = vmatpush3.bf16.msra.mxu1 %v8042_v11  ;;  %v9083_v11 = vld [vmem:[#allocation2 + $0x28] sm:$0x1] }
 0x249   : > { %6910 = vmatprep.subr.bf16.mxu1 %v8044_v19 }
 0x24c   : > { %6911 = vmatpush3.bf16.msra.mxu1 %v8044_v19  ;;  %v884_v19 = vld [vmem:[%s10853_s4] sm:$0x1] }
 0x24d   : > { %6912 = vmatprep.subr.bf16.mxu1 %v8046_v18 }
 0x250   : > { %6913 = vmatpush3.bf16.msra.mxu1 %v8046_v18  ;;  %v2064_v18 = vshll.u32 %v9083_v11, 16 }
 0x251   : > { %6946 = vmatprep.subr.bf16.mxu1 %v9075_v51 }
 0x2e6   : > { %v1059_v59 = vpop.f32.mrb[32].mxu1 }
 0x2e7   : > { %v6862_v53 = vpop.f32.mrb[33].mxu1  ;;  %v1133_v62 = vmul.f32 %v1059_v59, %v1059_v59 }
 0x306   : > { %v1129_v1 = vpop.f32.mrb[34].mxu1 }
 0x307   : > { %v1134_v4 = vsub.f32 %v1129_v1, %v1133_v62  ;;  %v6897_v56 = vpop.f32.mrb[35].mxu1 }
 0x309   : > { %v1135_v7 = vmax.f32 %v1134_v4, 0.0 }
 0x30b   : > { %v1136_v61 = vadd.f32 1e-05, %v1135_v7 }
 0x30d   : > { %8113 = vrsqrt.f32 %v1136_v61 }
 0x317   : > { %v8114_v3 = vpop.eup %8113 }
 0x318   : > { %v1138_v8 = vmul.f32 %v8114_v3, %v883_v0 }
 0x31a   : > { %v1139_v20 = vmul.f32 %v1138_v8, %v1059_v59  ;;  %v1144_v23 = vrot.slane %v1138_v8, %v9081_v16 }
 0x31c   : > { %v1140_v30 = vsub.f32 %v884_v19, %v1139_v20  ;;  %v1145_v33 = vmul.f32 %v1144_v23, %v8861_v21  ;;  %v1146_v35 = vmul.f32 %v1144_v23, %v8867_v25  ;;  %v1147_v38 = vmul.f32 %v1144_v23, %v8864_v24 }
 0x31d   : > { %v1148_v44 = vmul.f32 %v1144_v23, %v8872_v27  ;;  %v1149_v49 = vmul.f32 %v1144_v23, %v8884_v37  ;;  %v1150_v53 = vmul.f32 %v1144_v23, %v8894_v45  ;;  %v1151_v59 = vmul.f32 %v1144_v23, %v8888_v40 }
 0x31e   : > { %v1181_v62 = vrot.slane %v1140_v30, %v9081_v16  ;;  %v1152_v1 = vmul.f32 %v1144_v23, %v8897_v47  ;;  %v1153_v4 = vmul.f32 %v1144_v23, %v8908_v57  ;;  %v1154_v21 = vmul.f32 %v1144_v23, %v8918_v6 }
 0x31f   : > { %v1155_v25 = vmul.f32 %v1144_v23, %v8912_v63  ;;  %v1156_v24 = vmul.f32 %v1144_v23, %v8921_v9  ;;  %v1157_v27 = vmul.f32 %v1144_v23, %v8932_v28  ;;  %v1158_v37 = vmul.f32 %v1144_v23, %v8942_v36 }
 0x320   : > { %v1159_v45 = vmul.f32 %v1144_v23, %v8936_v31  ;;  %v1160_v40 = vmul.f32 %v1144_v23, %v8945_v39  ;;  %v1161_v56 = vmul.f32 %v1144_v23, %v8956_v52  ;;  %v1162_v47 = vmul.f32 %v1144_v23, %v8966_v2 }
 0x321   : > { %v1163_v57 = vmul.f32 %v1144_v23, %v8960_v55  ;;  %v1164_v6 = vmul.f32 %v1144_v23, %v8969_v5  ;;  %v1165_v63 = vmul.f32 %v1144_v23, %v8980_v26  ;;  %v1166_v9 = vmul.f32 %v1144_v23, %v8990_v41 }
 0x322   : > { %v1167_v28 = vmul.f32 %v1144_v23, %v8984_v32  ;;  %v1168_v36 = vmul.f32 %v1144_v23, %v8993_v43  ;;  %v1169_v31 = vmul.f32 %v1144_v23, %v9004_v60  ;;  %v1170_v39 = vmul.f32 %v1144_v23, %v9011_v14 }
 0x323   : > { %v1171_v52 = vmul.f32 %v1144_v23, %v9014_v15  ;;  %v1172_v2 = vmul.f32 %v1144_v23, %v9018_v22  ;;  %v1173_v55 = vmul.f32 %v1144_v23, %v9024_v34  ;;  %v1174_v5 = vmul.f32 %v1144_v23, %v9029_v48 }
 0x324   : > { %v1175_v26 = vmul.f32 %v1144_v23, %v9034_v50  ;;  %v1176_v41 = vmul.f32 %v1144_v23, %v9038_v54  ;;  %v9126_v7 = vadd.f32 %v1181_v62, %v1145_v33  ;;  %v9128_v32 = vadd.f32 %v1181_v62, %v1146_v35 }
 0x325   : > { %v9130_v43 = vadd.f32 %v1181_v62, %v1147_v38  ;;  %v9132_v60 = vadd.f32 %v1181_v62, %v1148_v44  ;;  %v9134_v14 = vadd.f32 %v1181_v62, %v1149_v49  ;;  %v1188_v15 = vadd.f32 %v1181_v62, %v1150_v53 }
 0x326   : > { %v1189_v22 = vadd.f32 %v1181_v62, %v1151_v59  ;;  %v1190_v61 = vadd.f32 %v1181_v62, %v1152_v1  ;;  %v1191_v34 = vadd.f32 %v1181_v62, %v1153_v4  ;;  %v1192_v10 = vadd.f32 %v1181_v62, %v1154_v21 }
 0x327   : > { %v1193_v48 = vadd.f32 %v1181_v62, %v1155_v25  ;;  %v1194_v13 = vadd.f32 %v1181_v62, %v1156_v24  ;;  %v1195_v50 = vadd.f32 %v1181_v62, %v1157_v27  ;;  %v1196_v0 = vadd.f32 %v1181_v62, %v1158_v37 }
 0x328   : > { %v1197_v54 = vadd.f32 %v1181_v62, %v1159_v45  ;;  %v1198_v3 = vadd.f32 %v1181_v62, %v1160_v40  ;;  %v1199_v8 = vadd.f32 %v1181_v62, %v1161_v56  ;;  %v1200_v19 = vadd.f32 %v1181_v62, %v1162_v47 }
 0x329   : > { %v1201_v20 = vadd.f32 %v1181_v62, %v1163_v57  ;;  %v1202_v23 = vadd.f32 %v1181_v62, %v1164_v6  ;;  %v1203_v30 = vadd.f32 %v1181_v62, %v1165_v63  ;;  %v1204_v33 = vadd.f32 %v1181_v62, %v1166_v9 }
 0x32a   : > { %v1205_v35 = vadd.f32 %v1181_v62, %v1167_v28  ;;  %v1206_v38 = vadd.f32 %v1181_v62, %v1168_v36  ;;  %v1207_v44 = vadd.f32 %v1181_v62, %v1169_v31  ;;  %v1208_v49 = vadd.f32 %v1181_v62, %v1170_v39 }
 0x32b   : > { %v1209_v53 = vadd.f32 %v1181_v62, %v1171_v52  ;;  %v1210_v59 = vadd.f32 %v1181_v62, %v1172_v2  ;;  %v1211_v1 = vadd.f32 %v1181_v62, %v1173_v55  ;;  %v1212_v4 = vadd.f32 %v1181_v62, %v1174_v5 }
 0x32c   : > { %v1213_v21 = vadd.f32 %v1181_v62, %v1175_v26  ;;  %v1214_v25 = vadd.f32 %v1181_v62, %v1176_v41  ;;  %v1215_v24 = vmax.f32 %v9126_v7, 0.0  ;;  %v1216_v27 = vmax.f32 %v9128_v32, 0.0 }
 0x32d   : > { %v1217_v37 = vmax.f32 %v9130_v43, 0.0  ;;  %v1218_v45 = vmax.f32 %v9132_v60, 0.0  ;;  %v1219_v40 = vmax.f32 %v9134_v14, 0.0  ;;  %v1220_v56 = vmax.f32 %v1188_v15, 0.0 }
 0x32e   : > { %v1221_v47 = vmax.f32 %v1189_v22, 0.0  ;;  %v1222_v57 = vmax.f32 %v1190_v61, 0.0  ;;  %v1223_v6 = vmax.f32 %v1191_v34, 0.0  ;;  %v1224_v63 = vmax.f32 %v1192_v10, 0.0 }
 0x32f   : > { %v1225_v9 = vmax.f32 %v1193_v48, 0.0  ;;  %v1226_v28 = vmax.f32 %v1194_v13, 0.0  ;;  %v1227_v36 = vmax.f32 %v1195_v50, 0.0  ;;  %v1228_v31 = vmax.f32 %v1196_v0, 0.0 }
 0x330   : > { %v1229_v62 = vmax.f32 %v1197_v54, 0.0  ;;  %v1230_v39 = vmax.f32 %v1198_v3, 0.0  ;;  %v1231_v52 = vmax.f32 %v1199_v8, 0.0  ;;  %v1232_v2 = vmax.f32 %v1200_v19, 0.0  ;;  %v8054_v8 = vld [vmem:[#allocation9 + $0x8] sm:$0xff]  }
 0x331   : > { %v1233_v55 = vmax.f32 %v1201_v20, 0.0  ;;  %v1234_v5 = vmax.f32 %v1202_v23, 0.0  ;;  %v1235_v26 = vmax.f32 %v1203_v30, 0.0  ;;  %v1236_v41 = vmax.f32 %v1204_v33, 0.0 }
 0x332   : > { %v1237_v7 = vmax.f32 %v1205_v35, 0.0  ;;  %v1238_v32 = vmax.f32 %v1206_v38, 0.0  ;;  %v1239_v43 = vmax.f32 %v1207_v44, 0.0  ;;  %v1240_v60 = vmax.f32 %v1208_v49, 0.0 }
 0x333   : > { %v1241_v14 = vmax.f32 %v1209_v53, 0.0  ;;  %v1242_v15 = vmax.f32 %v1210_v59, 0.0  ;;  %v1243_v22 = vmax.f32 %v1211_v1, 0.0  ;;  %v1244_v61 = vmax.f32 %v1212_v4, 0.0  ;;  %v8056_v4 = vld [vmem:[#allocation9 + $0x10] sm:$0xff]  }
 0x334   : > { %v1245_v34 = vmax.f32 %v1213_v21, 0.0  ;;  %v1246_v10 = vmax.f32 %v1214_v25, 0.0  ;;  %v9141_v48 = vpack.c.bf16 %v1216_v27, %v1215_v24  ;;  %v9143_v13 = vpack.c.bf16 %v1218_v45, %v1217_v37 }
 0x335   : > { %v9145_v50 = vpack.c.bf16 %v1220_v56, %v1219_v40  ;;  %v9147_v0 = vpack.c.bf16 %v1222_v57, %v1221_v47  ;;  %v9149_v54 = vpack.c.bf16 %v1224_v63, %v1223_v6  ;;  %v9151_v3 = vpack.c.bf16 %v1226_v28, %v1225_v9  ;;  %v2018_v56 = vld [vmem:[#allocation2 + $0x58] sm:$0x1]  ;;  %v2020_v57 = vld [vmem:[#allocation2 + $0x70] sm:$0x1]  ;;  %v8057_v63 = vld [vmem:[#allocation9 + $0x18] sm:$0xff]  }
 0x336   : > { %v9153_v19 = vpack.c.bf16 %v1228_v31, %v1227_v36  ;;  %v9155_v20 = vpack.c.bf16 %v1230_v39, %v1229_v62  ;;  %v9157_v23 = vpack.c.bf16 %v1232_v2, %v1231_v52  ;;  %v9159_v30 = vpack.c.bf16 %v1234_v5, %v1233_v55  ;;  %1303 = vst [vmem:[#allocation2 + $0x20] sm:$0xff] %v9141_v48  ;;  %v8051_v39 = vld [vmem:[#allocation9 + $0xd0] sm:$0xff]   ;;  %v8059_v5 = vld [vmem:[#allocation9 + $0x20] sm:$0xff]  }
 0x337   : > { %1304 = vst [vmem:[#allocation2 + $0x38] sm:$0xff] %v9143_v13  ;;  %6915 = vmatmul.mubr.bf16.vlgmr.msra.gmra.mrb[36].mxu1 %v9141_v48  ;;  %v9164_v33 = vpack.c.bf16 %v1236_v41, %v1235_v26  ;;  %v9166_v35 = vpack.c.bf16 %v1238_v32, %v1237_v7  ;;  %v9168_v38 = vpack.c.bf16 %v1240_v60, %v1239_v43  ;;  %1305 = vst [vmem:[#allocation2 + $0x50] sm:$0xff] %v9145_v50  ;;  %v2022_v7 = vld [vmem:[#allocation2 + $0x88] sm:$0x1]  ;;  %v2024_v32 = vld [vmem:[#allocation2 + $0xa0] sm:$0x1] }
 0x338   : > { %v9170_v44 = vpack.c.bf16 %v1242_v15, %v1241_v14  ;;  %1306 = vst [vmem:[#allocation2 + $0x68] sm:$0xff] %v9147_v0  ;;  %1307 = vst [vmem:[#allocation2 + $0x80] sm:$0xff] %v9149_v54  ;;  %6918 = vmatprep.mubr.bf16.mxu1 %v9143_v13  ;;  %v9177_v49 = vpack.c.bf16 %v1244_v61, %v1243_v22  ;;  %v1302_v53 = vpack.c.bf16 %v1246_v10, %v1245_v34  ;;  %v8052_v43 = vld [vmem:[#allocation9 + $0xd8] sm:$0xff]   ;;  %v8060_v22 = vld [vmem:[#allocation9 + $0x28] sm:$0xff]  }
 0x339   : > { %1308 = vst [vmem:[#allocation2 + $0x98] sm:$0xff] %v9151_v3  ;;  %1309 = vst [vmem:[#allocation2 + $0xb0] sm:$0xff] %v9153_v19  ;;  %v1372_v59 = vshll.u32 %v9141_v48, 16  ;;  %6947 = vmatpush3.bf16.msra.mxu1 %v9075_v51  ;;  %v1384_v1 = vshll.u32 %v9143_v13, 16  ;;  %v1369_v21 = vshrl.u32 %v9141_v48, 16  ;;  %v2066_v25 = vrot.slane %v2064_v18, 1 }
 0x33a   : > { %1310 = vst [vmem:[#allocation2 + $0xc8] sm:$0xff] %v9155_v20  ;;  %1311 = vst [vmem:[#allocation2 + $0xe0] sm:$0xff] %v9157_v23  ;;  %6948 = vmatprep.subr.bf16.mxu1 %v8054_v8  ;;  %v10898_v24 = vshll.u32 %v9145_v50, 16  ;;  %v1381_v27 = vshrl.u32 %v9143_v13, 16  ;;  %v2078_v45 = vrot.slane %v2076_v29, 1  ;;  %v10897_v40 = vshll.u32 %v9147_v0, 16 }
 0x33b   : > { %1312 = vst [vmem:[#allocation2 + $0xf8] sm:$0xff] %v9159_v30  ;;  %1313 = vst [vmem:[#allocation2 + $0x110] sm:$0xff] %v9164_v33  ;;  %v2061_v51 = vrot.slane %v1372_v59, 1  ;;  %v2073_v37 = vrot.slane %v1384_v1, 1  ;;  %v8050_v18 = vld [vmem:[#allocation9 + $0xc8] sm:$0xff]   ;;  %v2088_v29 = vshll.u32 %v2018_v56, 16 }
 0x33c   : > { %1314 = vst [vmem:[#allocation2 + $0x128] sm:$0xff] %v9166_v35  ;;  %1315 = vst [vmem:[#allocation2 + $0x140] sm:$0xff] %v9168_v38  ;;  %v2085_v12 = vrot.slane %v10898_v24, 1  ;;  %v2097_v28 = vrot.slane %v10897_v40, 1  ;;  %v2100_v36 = vshll.u32 %v2020_v57, 16  ;;  %v10904_v31 = vshrl.u32 %v9145_v50, 16 }
 0x33d   : > { %1316 = vst [vmem:[#allocation2 + $0x158] sm:$0xff] %v9170_v44  ;;  %1317 = vst [vmem:[#allocation2 + $0x170] sm:$0xff] %v9177_v49  ;;  %v2062_v47 = vor.u32 %v2061_v51, %v1369_v21  ;;  %6949 = vmatpush3.bf16.msra.mxu1 %v8054_v8  ;;  %v2074_v11 = vor.u32 %v2073_v37, %v1381_v27  ;;  %v10901_v62 = vshrl.u32 %v9147_v0, 16  ;;  %v2090_v2 = vrot.slane %v2088_v29, 1 }
 0x33e   : > { %1318 = vst [vmem:[#allocation2 + $0x188] sm:$0xff] %v1302_v53  ;;  %6950 = vmatprep.subr.bf16.mxu1 %v8056_v4  ;;  %v2086_v52 = vor.u32 %v2085_v12, %v10904_v31  ;;  %v10893_v55 = vshll.u32 %v9149_v54, 16  ;;  %v10892_v41 = vshll.u32 %v9151_v3, 16  ;;  %v2112_v15 = vshll.u32 %v2022_v7, 16 }
 0x33f   : > { %v2067_v6 = vsel %vm2043_vm1, %v2062_v47, %v2066_v25  ;;  %6919 = vmatmul.mubr.bf16.gmra.mrb[40].mxu1 %v9145_v50  ;;  %v2079_v9 = vsel %vm2043_vm1, %v2074_v11, %v2078_v45  ;;  %v2098_v26 = vor.u32 %v2097_v28, %v10901_v62  ;;  %v2124_v10 = vshll.u32 %v2024_v32, 16  ;;  %v8062_v45 = vld [vmem:[#allocation9 + $0x30] sm:$0xff]   ;;  %v2026_v11 = vld [vmem:[#allocation2 + $0xb8] sm:$0x1]  ;;  %v2030_v32 = vld [vmem:[#allocation2 + $0xe8] sm:$0x1] }
 0x340   : > { %7011 = vmatmul.mubr.bf16.vlgmr.msra.gmra.mrb[0].mxu0 %v2067_v6  ;;  %6922 = vmatprep.mubr.bf16.mxu1 %v9147_v0  ;;  %v2091_v60 = vsel %vm2043_vm1, %v2086_v52, %v2090_v2  ;;  %v2109_v14 = vrot.slane %v10893_v55, 1  ;;  %v2121_v34 = vrot.slane %v10892_v41, 1  ;;  %v10895_v8 = vshrl.u32 %v9149_v54, 16  ;;  %v8058_v6 = vld [vmem:[#allocation9 + $0xe8] sm:$0xff]  }
 0x341   : > { %7043 = vmatpush3.bf16.msra.mxu0 %v9071_v46  ;;  %7014 = vmatprep.mubr.bf16.mxu0 %v2079_v9  ;;  %v2102_v46 = vrot.slane %v2100_v36, 1  ;;  %v10894_v53 = vshrl.u32 %v9151_v3, 16  ;;  %v2114_v25 = vrot.slane %v2112_v15, 1  ;;  %v10889_v37 = vshll.u32 %v9153_v19, 16  ;;  %v8063_v9 = vld [vmem:[#allocation9 + $0x38] sm:$0xff]  }
 0x342   : > { %7044 = vmatprep.subr.bf16.mxu0 %v8050_v18  ;;  %6951 = vmatpush3.bf16.msra.mxu1 %v8056_v4  ;;  %v8055_v4 = vld [vmem:[#allocation9 + $0xe0] sm:$0xff]   ;;  %v2110_v51 = vor.u32 %v2109_v14, %v10895_v8  ;;  %v2126_v47 = vrot.slane %v2124_v10, 1  ;;  %v10888_v57 = vshll.u32 %v9155_v20, 16  ;;  %v10891_v52 = vshrl.u32 %v9153_v19, 16  ;;  %v2032_v15 = vld [vmem:[#allocation2 + $0x100] sm:$0x1] }
 0x343   : > { %6952 = vmatprep.subr.bf16.mxu1 %v8057_v63  ;;  %v2103_v61 = vsel %vm2043_vm1, %v2098_v26, %v2102_v46  ;;  %v2122_v56 = vor.u32 %v2121_v34, %v10894_v53  ;;  %v2133_v29 = vrot.slane %v10889_v37, 1  ;;  %v10890_v2 = vshrl.u32 %v9155_v20, 16  ;;  %v2038_v34 = vld [vmem:[#allocation2 + $0x148] sm:$0x1]  ;;  %v9375_v37 = vld [vmem:[#allocation2 + $0x140] sm:$0xff] }
 0x344   : > { %v2115_v12 = vsel %vm2043_vm1, %v2110_v51, %v2114_v25  ;;  %v2145_v36 = vrot.slane %v10888_v57, 1  ;;  %v10876_v7 = vshll.u32 %v9157_v23, 16  ;;  %v10875_v14 = vshll.u32 %v9159_v30, 16  ;;  %v9393_v24 = vld [vmem:[#allocation2 + $0x170] sm:$0xff] }
 0x345   : > { %7045 = vmatpush3.bf16.msra.mxu0 %v8050_v18  ;;  %v2028_v18 = vld [vmem:[#allocation2 + $0xd0] sm:$0x1]  ;;  %v2127_v28 = vsel %vm2043_vm1, %v2122_v56, %v2126_v47  ;;  %v2134_v26 = vor.u32 %v2133_v29, %v10891_v52  ;;  %v2160_v10 = vshll.u32 %v2030_v32, 16  ;;  %v10884_v29 = vshll.u32 %v9164_v33, 16 }
 0x346   : > { %7046 = vmatprep.subr.bf16.mxu0 %v8051_v39  ;;  %6953 = vmatpush3.bf16.msra.mxu1 %v8057_v63  ;;  %v2136_v63 = vshll.u32 %v2026_v11, 16  ;;  %v2157_v25 = vrot.slane %v10876_v7, 1  ;;  %v2169_v11 = vrot.slane %v10875_v14, 1  ;;  %v10918_v48 = vshrl.u32 %v9177_v49, 16 }
 0x347   : > { %6923 = vmatmul.mubr.bf16.gmra.mrb[44].mxu1 %v9149_v54  ;;  %6954 = vmatprep.subr.bf16.mxu1 %v8059_v5 }
 0x348   : > { %7015 = vmatmul.mubr.bf16.gmra.mrb[4].mxu0 %v2091_v60  ;;  %6926 = vmatprep.mubr.bf16.mxu1 %v9151_v3  ;;  %v2138_v46 = vrot.slane %v2136_v63, 1  ;;  %v2040_v63 = vld [vmem:[#allocation2 + $0x160] sm:$0x1] }
 0x349   : > { %7018 = vmatprep.mubr.bf16.mxu0 %v2103_v61  ;;  %7047 = vmatpush3.bf16.msra.mxu0 %v8051_v39  ;;  %v2148_v39 = vshll.u32 %v2028_v18, 16  ;;  %v2036_v61 = vld [vmem:[#allocation2 + $0x130] sm:$0x1]  ;;  %v2220_v17 = vshll.u32 %v2040_v63, 16  ;;  %v10885_v63 = vshrl.u32 %v9166_v35, 16 }
 0x34a   : > { %7048 = vmatprep.subr.bf16.mxu0 %v8052_v43  ;;  %6955 = vmatpush3.bf16.msra.mxu1 %v8059_v5  ;;  %v8061_v5 = vld [vmem:[#allocation9 + $0xf0] sm:$0xff]   ;;  %v2139_v51 = vsel %vm2043_vm1, %v2134_v26, %v2138_v46  ;;  %v2196_v18 = vshll.u32 %v2036_v61, 16  ;;  %v2042_v26 = vld [vmem:[#allocation2 + $0x178] sm:$0x1]  ;;  %v9269_v46 = vld [vmem:[#allocation9 + $0x100] sm:$0xff]  }
 0x34b   : > { %6956 = vmatprep.subr.bf16.mxu1 %v8060_v22  ;;  %v2150_v60 = vrot.slane %v2148_v39, 1  ;;  %v10883_v39 = vshll.u32 %v9166_v35, 16  ;;  %v2232_v14 = vshll.u32 %v2042_v26, 16  ;;  %v1383_v26 = vrot.slane %v1381_v27, 7 }
 0x34d   : > { %7049 = vmatpush3.bf16.msra.mxu0 %v8052_v43  ;;  %v2146_v43 = vor.u32 %v2145_v36, %v10890_v2  ;;  %v2162_v36 = vrot.slane %v2160_v10, 1 }
 0x34e   : > { %7050 = vmatprep.subr.bf16.mxu0 %v8055_v4  ;;  %6957 = vmatpush3.bf16.msra.mxu1 %v8060_v22  ;;  %v2034_v22 = vld [vmem:[#allocation2 + $0x118] sm:$0x1] }
 0x34f   : > { %6927 = vmatmul.mubr.bf16.gmra.mrb[48].mxu1 %v9153_v19  ;;  %6958 = vmatprep.subr.bf16.mxu1 %v8062_v45  ;;  %v2184_v56 = vshll.u32 %v2034_v22, 16  ;;  %v2151_v47 = vsel %vm2043_vm1, %v2146_v43, %v2150_v60  ;;  %v10879_v43 = vshll.u32 %v9168_v38, 16  ;;  %v10878_v60 = vshll.u32 %v9170_v44, 16 }
 0x350   : > { %7019 = vmatmul.mubr.bf16.gmra.mrb[8].mxu0 %v2115_v12  ;;  %6930 = vmatprep.mubr.bf16.mxu1 %v9155_v20  ;;  %v10877_v12 = vshrl.u32 %v9157_v23, 16 }
 0x351   : > { %7022 = vmatprep.mubr.bf16.mxu0 %v2127_v28  ;;  %7051 = vmatpush3.bf16.msra.mxu0 %v8055_v4  ;;  %v8064_v4 = vld [vmem:[#allocation9 + $0xf8] sm:$0xff]   ;;  %v10887_v28 = vshrl.u32 %v9159_v30, 16 }
 0x352   : > { %7052 = vmatprep.subr.bf16.mxu0 %v8058_v6  ;;  %6959 = vmatpush3.bf16.msra.mxu1 %v8062_v45  ;;  %v2172_v45 = vshll.u32 %v2032_v15, 16  ;;  %v2158_v32 = vor.u32 %v2157_v25, %v10877_v12  ;;  %v1321_v15 = vld [vmem:[#allocation2 + $0x18] sm:$0x80]  ;;  %v2193_v25 = vrot.slane %v10883_v39, 1 }
 0x353   : > { %6960 = vmatprep.subr.bf16.mxu1 %v8063_v9  ;;  %v2170_v22 = vor.u32 %v2169_v11, %v10887_v28  ;;  %v1365_v7 = vshrl.u32 %v1321_v15, 16  ;;  %v10881_v15 = vshrl.u32 %v9168_v38, 16 }
 0x354   : > { %v2174_v61 = vrot.slane %v2172_v45, 1  ;;  %v2163_v11 = vsel %vm2043_vm1, %v2158_v32, %v2162_v36  ;;  %v10886_v45 = vshrl.u32 %v9164_v33, 16  ;;  %v9294_v36 = vld [vmem:[#allocation2 + $0x18] sm:$0x80] }
 0x355   : > { %7053 = vmatpush3.bf16.msra.mxu0 %v8058_v6  ;;  %v2208_v6 = vshll.u32 %v2038_v34, 16  ;;  %v2186_v34 = vrot.slane %v2184_v56, 1  ;;  %v2205_v56 = vrot.slane %v10879_v43, 1  ;;  %v9316_v43 = vld [vmem:[#allocation2 + $0x80] sm:$0xff] }
 0x356   : > { %7054 = vmatprep.subr.bf16.mxu0 %v8061_v5  ;;  %6961 = vmatpush3.bf16.msra.mxu1 %v8063_v9  ;;  %v1319_v9 = vld [vmem:[#allocation2] sm:$0x80]  ;;  %v10900_v13 = vshll.u32 %v9316_v43, 16 }
 0x357   : > { %6931 = vmatmul.mubr.bf16.gmra.mrb[52].mxu1 %v9157_v23  ;;  %7566 = vmatprep.subr.bf16.mxu1 %v10871_v58  ;;  %v1353_v10 = vshrl.u32 %v1319_v9, 16  ;;  %v2210_v58 = vrot.slane %v2208_v6, 1  ;;  %v2175_v6 = vsel %vm2043_vm1, %v2170_v22, %v2174_v61  ;;  %v10882_v22 = vshll.u32 %v9177_v49, 16 }
 0x358   : > { %7023 = vmatmul.mubr.bf16.gmra.mrb[12].mxu0 %v2139_v51  ;;  %6934 = vmatprep.mubr.bf16.mxu1 %v9159_v30  ;;  %v2181_v51 = vrot.slane %v10884_v29, 1  ;;  %v2222_v61 = vrot.slane %v2220_v17, 1  ;;  %v2206_v27 = vor.u32 %v2205_v56, %v10881_v15  ;;  %v3351_v52 = vrot.slane %v10900_v13, 1 }
 0x359   : > { %7026 = vmatprep.mubr.bf16.mxu0 %v2151_v47  ;;  %7055 = vmatpush3.bf16.msra.mxu0 %v8061_v5  ;;  %v1323_v5 = vld [vmem:[#allocation2 + $0x30] sm:$0x80]  ;;  %v2198_v47 = vrot.slane %v2196_v18, 1  ;;  %v1371_v18 = vrot.slane %v1369_v21, 7  ;;  %v1355_v9 = vrot.slane %v1353_v10, 7  ;;  %v10880_v21 = vshrl.u32 %v9170_v44, 16 }
 0x35a   : > { %7056 = vmatprep.subr.bf16.mxu0 %v8064_v4  ;;  %v1377_v12 = vshrl.u32 %v1323_v5, 16  ;;  %v2182_v32 = vor.u32 %v2181_v51, %v10886_v45  ;;  %v2194_v5 = vor.u32 %v2193_v25, %v10885_v63  ;;  %v9305_v10 = vrot.slane %v2232_v14, 1  ;;  %v9369_v63 = vld [vmem:[#allocation2 + $0x128] sm:$0xff] }
 0x35b   : > { %v9320_v17 = vor.u32 %v1372_v59, %v1371_v18  ;;  %v9324_v14 = vsel %vm1351_vm2, %v1355_v9, %v9069_v42  ;;  %v9326_v25 = vrot.slane %v1365_v7, 7  ;;  %v9339_v18 = vld [vmem:[#allocation2 + $0xb0] sm:$0xff]  ;;  %v9344_v7 = vrot.slane %v10882_v22, 1 }
 0x35c   : > { %v9328_v56 = vrot.slane %v1377_v12, 7  ;;  %v2187_v15 = vsel %vm2043_vm1, %v2182_v32, %v2186_v34  ;;  %v2199_v42 = vsel %vm2043_vm1, %v2194_v5, %v2198_v47  ;;  %v2211_v34 = vsel %vm2043_vm1, %v2206_v27, %v2210_v58  ;;  %v9355_v32 = vld [vmem:[#allocation2 + $0xe0] sm:$0xff]  ;;  %v9362_v58 = vld [vmem:[#allocation2 + $0xf8] sm:$0xff] }
 0x35d   : > { %7057 = vmatpush3.bf16.msra.mxu0 %v8064_v4  ;;  %v2217_v4 = vrot.slane %v10878_v60, 1  ;;  %v9314_v60 = vld [vmem:[#allocation2 + $0x68] sm:$0xff]  ;;  %v10906_v22 = vshrl.u32 %v9316_v43, 16  ;;  %v10910_v29 = vshrl.u32 %v9339_v18, 16  ;;  %v10917_v28 = vshrl.u32 %v9355_v32, 16 }
 0x35e   : > { %7090 = vmatprep.subr.bf16.mxu0 %v9269_v46  ;;  %v10899_v12 = vshll.u32 %v9314_v60, 16  ;;  %v10905_v5 = vshrl.u32 %v9314_v60, 16  ;;  %v10914_v57 = vshll.u32 %v9355_v32, 16  ;;  %v10912_v55 = vshll.u32 %v9362_v58, 16 }
 0x35f   : > { %6935 = vmatmul.mubr.bf16.gmra.mrb[56].mxu1 %v9164_v33  ;;  %v2218_v51 = vor.u32 %v2217_v4, %v10880_v21  ;;  %v9330_v4 = vld [vmem:[#allocation2 + $0x98] sm:$0xff]  ;;  %v9334_v21 = vor.u32 %v1384_v1, %v1383_v26  ;;  %v9348_v1 = vld [vmem:[#allocation2 + $0xc8] sm:$0xff]  ;;  %v10913_v40 = vshll.u32 %v9369_v63, 16  ;;  %v9403_v62 = vor.u32 %v3351_v52, %v10906_v22 }
 0x360   : > { %7027 = vmatmul.mubr.bf16.gmra.mrb[16].mxu0 %v2163_v11  ;;  %6938 = vmatprep.mubr.bf16.mxu1 %v9166_v35  ;;  %v9307_v11 = vld [vmem:[#allocation2 + $0x50] sm:$0xff]  ;;  %v10902_v47 = vshll.u32 %v9330_v4, 16  ;;  %v10908_v39 = vshrl.u32 %v9330_v4, 16  ;;  %v10921_v27 = vshrl.u32 %v9348_v1, 16  ;;  %v3339_v2 = vrot.slane %v10899_v12, 1  ;;  %v9395_v12 = vld [vmem:[#allocation2 + $0x188] sm:$0xff] }
 0x361   : > { %7030 = vmatprep.mubr.bf16.mxu0 %v2175_v6  ;;  %v10896_v59 = vshll.u32 %v9307_v11, 16  ;;  %v2223_v9 = vsel %vm2043_vm1, %v2218_v51, %v2222_v61  ;;  %v10903_v26 = vshrl.u32 %v9307_v11, 16  ;;  %v10907_v61 = vshll.u32 %v9339_v18, 16 }
 0x362   : > { %v10909_v51 = vshll.u32 %v9348_v1, 16  ;;  %v3363_v8 = vrot.slane %v10902_v47, 1  ;;  %v9399_v13 = vor.u32 %v3339_v2, %v10905_v5  ;;  %v10919_v2 = vshrl.u32 %v9369_v63, 16 }
 0x363   : > { %v3327_v45 = vrot.slane %v10896_v59, 1  ;;  %v3375_v31 = vrot.slane %v10907_v61, 1  ;;  %v10922_v5 = vshrl.u32 %v9375_v37, 16  ;;  %v10924_v22 = vshll.u32 %v9393_v24, 16 }
 0x364   : > { %v3387_v52 = vrot.slane %v10909_v51, 1  ;;  %v3399_v61 = vrot.slane %v10914_v57, 1  ;;  %v3411_v51 = vrot.slane %v10912_v55, 1  ;;  %v2512_v55 = vld [vmem:[#allocation2 + $0x30] sm:$0x80] }
 0x365   : > { %v9387_v53 = vor.u32 %v3327_v45, %v10903_v26  ;;  %v10915_v45 = vshll.u32 %v9375_v37, 16  ;;  %v9409_v26 = vor.u32 %v3363_v8, %v10908_v39  ;;  %v9423_v8 = vor.u32 %v3375_v31, %v10910_v29 }
 0x366   : > { %v9430_v39 = vor.u32 %v3387_v52, %v10921_v27  ;;  %v3435_v31 = vrot.slane %v10913_v40, 1  ;;  %v10957_v40 = vshrl.u32 %v9362_v58, 16  ;;  %v2555_v27 = vshrl.u32 %v2512_v55, 16 }
 0x367   : > { %6939 = vmatmul.mubr.bf16.gmra.mrb[60].mxu1 %v9168_v38 }
 0x368   : > { %7031 = vmatmul.mubr.bf16.gmra.mrb[20].mxu0 %v2187_v15  ;;  %6942 = vmatprep.mubr.bf16.mxu1 %v9170_v44  ;;  %v9367_v15 = vld [vmem:[#allocation2 + $0x110] sm:$0xff] }
 0x369   : > { %7034 = vmatprep.mubr.bf16.mxu0 %v2199_v42  ;;  %v9377_v42 = vld [vmem:[#allocation2 + $0x158] sm:$0xff]  ;;  %v10911_v59 = vshll.u32 %v9367_v15, 16  ;;  %v10920_v6 = vshrl.u32 %v9367_v15, 16 }
 0x36a   : > { %v10916_v47 = vshll.u32 %v9377_v42, 16  ;;  %v10923_v29 = vshrl.u32 %v9377_v42, 16 }
 0x36b   : > { %v3423_v41 = vrot.slane %v10911_v59, 1  ;;  %v2230_v59 = vor.u32 %v9344_v7, %v10918_v48  ;;  %v1327_v48 = vld [vmem:[#allocation2 + $0x60] sm:$0x80] }
 0x36c   : > { %v3459_v52 = vrot.slane %v10916_v47, 1  ;;  %v2514_v47 = vld [vmem:[#allocation2 + $0x48] sm:$0x80] }
 0x36d   : > { %v9456_v57 = vor.u32 %v3423_v41, %v10920_v6  ;;  %v10959_v41 = vshrl.u32 %v9294_v36, 16  ;;  %v1375_v36 = vsel %vm1351_vm2, %v9326_v25, %v9320_v17  ;;  %v2235_v16 = vsel %vm2043_vm1, %v2230_v59, %v9305_v10  ;;  %v1329_v59 = vld [vmem:[#allocation2 + $0x78] sm:$0x80] }
 0x36e   : > { %v9469_v7 = vor.u32 %v3459_v52, %v10923_v29  ;;  %v10963_v52 = vshrl.u32 %v9145_v50, 16 }
 0x36f   : > { %6943 = vmatmul.mubr.bf16.gmra.mrb[64].mxu1 %v9177_v49 }
 0x370   : > { %7035 = vmatmul.mubr.bf16.gmra.mrb[24].mxu0 %v2211_v34  ;;  %6962 = vmatprep.mubr.bf16.mxu1 %v9324_v14  ;;  %v9441_v34 = vor.u32 %v3399_v61, %v10917_v28  ;;  %v3447_v14 = vrot.slane %v10915_v45, 1  ;;  %v9460_v61 = vor.u32 %v3435_v31, %v10919_v2  ;;  %v1325_v45 = vld [vmem:[#allocation2 + $0x48] sm:$0x80]  ;;  %10958 = vst [vmem:[#allocation21_spill] sm:$0xff] %v9469_v7  ;;  %v10927_v31 = vshrl.u32 %v9395_v12, 16 }
 0x371   : > { %7038 = vmatprep.mubr.bf16.mxu0 %v2223_v9  ;;  %v9452_v9 = vor.u32 %v3411_v51, %v10957_v40  ;;  %v3471_v40 = vrot.slane %v10924_v22, 1  ;;  %v2545_v51 = vrot.slane %v10959_v41, 7  ;;  %v10960_v2 = vshll.u32 %v9395_v12, 16 }
 0x372   : > { %v9465_v28 = vor.u32 %v3447_v14, %v10922_v5  ;;  %v10961_v14 = vshrl.u32 %v9393_v24, 16  ;;  %v1395_v29 = vrot.slane %v10963_v52, 7  ;;  %v1389_v41 = vshrl.u32 %v1325_v45, 16 }
 0x373   : > { %v3483_v6 = vrot.slane %v10960_v2, 1  ;;  %v10965_v2 = vshrl.u32 %v9147_v0, 16  ;;  %v2553_v25 = vsel %vm1351_vm2, %v2545_v51, %v9320_v17  ;;  %v2567_v45 = vshrl.u32 %v2514_v47, 16 }
 0x374   : > { %v9480_v5 = vor.u32 %v3471_v40, %v10961_v14  ;;  %v1387_v40 = vsel %vm1351_vm2, %v9328_v56, %v9334_v21  ;;  %v1401_v14 = vshrl.u32 %v1327_v48, 16  ;;  %v1391_v10 = vrot.slane %v1389_v41, 7  ;;  %v8066_v41 = vld [vmem:[#allocation9 + $0x108] sm:$0xff]  }
 0x375   : > { %v9489_v22 = vor.u32 %v3483_v6, %v10927_v31  ;;  %v1407_v55 = vrot.slane %v10965_v2, 7  ;;  %v10966_v6 = vshrl.u32 %v9307_v11, 16  ;;  %v10967_v2 = vshll.u32 %v9145_v50, 16 }
 0x376   : > { %10962 = vst [vmem:[#allocation22_spill] sm:$0xff] %v9480_v5  ;;  %v2557_v56 = vrot.slane %v2555_v27, 7  ;;  %v1403_v48 = vrot.slane %v1401_v14, 7  ;;  %v1331_v5 = vld [vmem:[#allocation2 + $0x90] sm:$0x80]  ;;  %v2569_v7 = vrot.slane %v2567_v45, 7 }
 0x377   : > { %10964 = vst [vmem:[#allocation23_spill] sm:$0xff] %v9489_v22  ;;  %6963 = vmatmul.mubr.bf16.vlgmr.msra.gmra.mrb[36].mxu1 %v1375_v36  ;;  %v2573_v52 = vrot.slane %v10966_v6, 7  ;;  %v1398_v31 = vor.u32 %v10967_v2, %v1395_v29  ;;  %v10968_v36 = vshll.u32 %v9147_v0, 16  ;;  %v10969_v17 = vshll.u32 %v9307_v11, 16 }
 0x378   : > { %7039 = vmatmul.mubr.bf16.gmra.mrb[28].mxu0 %v2235_v16  ;;  %6966 = vmatprep.mubr.bf16.mxu1 %v1387_v40  ;;  %v2516_v16 = vld [vmem:[#allocation2 + $0x60] sm:$0x80]  ;;  %v1413_v51 = vshrl.u32 %v1329_v59, 16  ;;  %v2518_v40 = vld [vmem:[#allocation2 + $0x78] sm:$0x80]  ;;  %v1425_v0 = vshrl.u32 %v1331_v5, 16  ;;  %v2565_v14 = vsel %vm1351_vm2, %v2557_v56, %v9334_v21 }
 0x379   : > { %7058 = vmatprep.mubr.bf16.mxu0 %v2553_v25  ;;  %v1410_v22 = vor.u32 %v10968_v36, %v1407_v55  ;;  %v9508_v47 = vor.u32 %v10969_v17, %v2573_v52  ;;  %v10970_v25 = vshrl.u32 %v9149_v54, 16  ;;  %v1399_v29 = vsel %vm1351_vm2, %v1391_v10, %v1398_v31  ;;  %v8067_v56 = vld [vmem:[#allocation9 + $0x110] sm:$0xff]  }
 0x37a   : > { %v2579_v6 = vshrl.u32 %v2516_v16, 16  ;;  %v10971_v27 = vshrl.u32 %v9151_v3, 16  ;;  %v10972_v52 = vshrl.u32 %v9314_v60, 16  ;;  %v2591_v31 = vshrl.u32 %v2518_v40, 16 }
 0x37b   : > { %v1419_v50 = vrot.slane %v10970_v25, 7  ;;  %v1411_v45 = vsel %vm1351_vm2, %v1403_v48, %v1410_v22  ;;  %v2577_v59 = vsel %vm1351_vm2, %v2569_v7, %v9508_v47  ;;  %v10973_v5 = vshrl.u32 %v9316_v43, 16  ;;  %v1333_v48 = vld [vmem:[#allocation2 + $0xa8] sm:$0x80] }
 0x37c   : > { %v1431_v55 = vrot.slane %v10971_v27, 7  ;;  %v2585_v2 = vrot.slane %v10972_v52, 7  ;;  %v10974_v21 = vshll.u32 %v9149_v54, 16  ;;  %v1415_v22 = vrot.slane %v1413_v51, 7  ;;  %v2520_v27 = vld [vmem:[#allocation2 + $0x90] sm:$0x80] }
 0x37d   : > { %v2597_v10 = vrot.slane %v10973_v5, 7  ;;  %v10975_v16 = vshll.u32 %v9151_v3, 16  ;;  %v2581_v25 = vrot.slane %v2579_v6, 7  ;;  %v10976_v7 = vshll.u32 %v9314_v60, 16 }
 0x37e   : > { %v1422_v36 = vor.u32 %v10974_v21, %v1419_v50  ;;  %v1437_v51 = vshrl.u32 %v1333_v48, 16  ;;  %v2522_v50 = vld [vmem:[#allocation2 + $0xa8] sm:$0x80]  ;;  %v10978_v52 = vshrl.u32 %v9153_v19, 16  ;;  %v10981_v48 = vshrl.u32 %v9339_v18, 16 }
 0x37f   : > { %6967 = vmatmul.mubr.bf16.gmra.mrb[40].mxu1 %v1399_v29  ;;  %v1434_v17 = vor.u32 %v10975_v16, %v1431_v55  ;;  %v9531_v40 = vor.u32 %v10976_v7, %v2585_v2  ;;  %v1427_v29 = vrot.slane %v1425_v0, 7  ;;  %v2603_v55 = vshrl.u32 %v2520_v27, 16 }
 0x380   : > { %7059 = vmatmul.mubr.bf16.vlgmr.msra.gmra.mrb[0].mxu0 %v2565_v14  ;;  %6970 = vmatprep.mubr.bf16.mxu1 %v1411_v45  ;;  %v1335_v14 = vld [vmem:[#allocation2 + $0xc0] sm:$0x80]  ;;  %v10977_v45 = vshll.u32 %v9316_v43, 16  ;;  %v1443_v3 = vrot.slane %v10978_v52, 7  ;;  %v1423_v6 = vsel %vm1351_vm2, %v1415_v22, %v1422_v36  ;;  %v10979_v0 = vshrl.u32 %v9155_v20, 16 }
 0x381   : > { %7091 = vmatpush3.bf16.msra.mxu0 %v9269_v46  ;;  %7062 = vmatprep.mubr.bf16.mxu0 %v2577_v59  ;;  %v2593_v46 = vrot.slane %v2591_v31, 7  ;;  %v1449_v2 = vshrl.u32 %v1335_v14, 16  ;;  %v8068_v59 = vld [vmem:[#allocation9 + $0x118] sm:$0xff]   ;;  %v2589_v31 = vsel %vm1351_vm2, %v2581_v25, %v9531_v40  ;;  %v2615_v22 = vshrl.u32 %v2522_v50, 16 }
 0x382   : > { %7092 = vmatprep.subr.bf16.mxu0 %v8066_v41  ;;  %v9535_v54 = vor.u32 %v10977_v45, %v2597_v10  ;;  %v1455_v5 = vrot.slane %v10979_v0, 7  ;;  %v10980_v10 = vshrl.u32 %v9330_v4, 16  ;;  %v2621_v16 = vrot.slane %v10981_v48, 7  ;;  %v1337_v0 = vld [vmem:[#allocation2 + $0xd8] sm:$0x80] }
 0x383   : > { %v10982_v7 = vshll.u32 %v9153_v19, 16  ;;  %v1439_v27 = vrot.slane %v1437_v51, 7  ;;  %v10983_v14 = vshll.u32 %v9155_v20, 16  ;;  %v2605_v52 = vrot.slane %v2603_v55, 7 }
 0x384   : > { %v2609_v21 = vrot.slane %v10980_v10, 7  ;;  %v2601_v36 = vsel %vm1351_vm2, %v2593_v46, %v9535_v54  ;;  %v10984_v46 = vshll.u32 %v9330_v4, 16  ;;  %v1451_v50 = vrot.slane %v1449_v2, 7 }
 0x385   : > { %7093 = vmatpush3.bf16.msra.mxu0 %v8066_v41  ;;  %v1435_v41 = vsel %vm1351_vm2, %v1427_v29, %v1434_v17  ;;  %v1446_v25 = vor.u32 %v10982_v7, %v1443_v3  ;;  %v2524_v17 = vld [vmem:[#allocation2 + $0xc0] sm:$0x80]  ;;  %v8069_v29 = vld [vmem:[#allocation9 + $0x120] sm:$0xff]   ;;  %v1458_v45 = vor.u32 %v10983_v14, %v1455_v5  ;;  %v2526_v3 = vld [vmem:[#allocation2 + $0xd8] sm:$0x80]  ;;  %v10986_v10 = vshrl.u32 %v9157_v23, 16 }
 0x386   : > { %7094 = vmatprep.subr.bf16.mxu0 %v8067_v56  ;;  %v2627_v51 = vshrl.u32 %v2524_v17, 16  ;;  %v1461_v5 = vshrl.u32 %v1337_v0, 16  ;;  %v10987_v2 = vshrl.u32 %v9159_v30, 16  ;;  %v10989_v17 = vshrl.u32 %v9355_v32, 16 }
 0x387   : > { %6971 = vmatmul.mubr.bf16.gmra.mrb[44].mxu1 %v1423_v6  ;;  %v9557_v6 = vor.u32 %v10984_v46, %v2609_v21  ;;  %v1467_v20 = vrot.slane %v10986_v10, 7  ;;  %v1447_v55 = vsel %vm1351_vm2, %v1439_v27, %v1446_v25  ;;  %v8070_v21 = vld [vmem:[#allocation9 + $0x128] sm:$0xff]   ;;  %v2639_v27 = vshrl.u32 %v2526_v3, 16 }
 0x388   : > { %7063 = vmatmul.mubr.bf16.gmra.mrb[4].mxu0 %v2589_v31  ;;  %6974 = vmatprep.mubr.bf16.mxu1 %v1435_v41  ;;  %v1339_v31 = vld [vmem:[#allocation2 + $0xf0] sm:$0x80]  ;;  %v2617_v41 = vrot.slane %v2615_v22, 7  ;;  %v1479_v48 = vrot.slane %v10987_v2, 7  ;;  %v2645_v14 = vrot.slane %v10989_v17, 7  ;;  %v10990_v46 = vshll.u32 %v9157_v23, 16 }
 0x389   : > { %7066 = vmatprep.mubr.bf16.mxu0 %v2601_v36  ;;  %7095 = vmatpush3.bf16.msra.mxu0 %v8067_v56  ;;  %v10985_v56 = vshll.u32 %v9339_v18, 16  ;;  %v1473_v36 = vshrl.u32 %v1339_v31, 16  ;;  %v2613_v22 = vsel %vm1351_vm2, %v2605_v52, %v9557_v6  ;;  %v1463_v0 = vrot.slane %v1461_v5, 7  ;;  %v2528_v31 = vld [vmem:[#allocation2 + $0xf0] sm:$0x80] }
 0x38a   : > { %7096 = vmatprep.subr.bf16.mxu0 %v8068_v59  ;;  %v1470_v52 = vor.u32 %v10990_v46, %v1467_v20  ;;  %v2629_v10 = vrot.slane %v2627_v51, 7  ;;  %v1341_v2 = vld [vmem:[#allocation2 + $0x108] sm:$0x80]  ;;  %v2651_v20 = vshrl.u32 %v2528_v31, 16  ;;  %v10997_v31 = vshrl.u32 %v9367_v15, 16 }
 0x38b   : > { %v9561_v19 = vor.u32 %v10985_v56, %v2621_v16  ;;  %v1459_v16 = vsel %vm1351_vm2, %v1451_v50, %v1458_v45  ;;  %v8071_v45 = vld [vmem:[#allocation9 + $0x130] sm:$0xff]   ;;  %v10991_v50 = vshll.u32 %v9159_v30, 16  ;;  %v1475_v3 = vrot.slane %v1473_v36, 7  ;;  %v2530_v5 = vld [vmem:[#allocation2 + $0x108] sm:$0x80] }
 0x38c   : > { %v1471_v51 = vsel %vm1351_vm2, %v1463_v0, %v1470_v52  ;;  %v10995_v36 = vshrl.u32 %v9166_v35, 16  ;;  %v2663_v0 = vshrl.u32 %v2530_v5, 16 }
 0x38d   : > { %7097 = vmatpush3.bf16.msra.mxu0 %v8068_v59  ;;  %v10988_v59 = vshrl.u32 %v9348_v1, 16  ;;  %v2625_v25 = vsel %vm1351_vm2, %v2617_v41, %v9561_v19  ;;  %v1482_v56 = vor.u32 %v10991_v50, %v1479_v48  ;;  %v10992_v41 = vshll.u32 %v9348_v1, 16 }
 0x38e   : > { %7098 = vmatprep.subr.bf16.mxu0 %v8069_v29  ;;  %v1485_v48 = vshrl.u32 %v1341_v2, 16  ;;  %v1503_v17 = vrot.slane %v10995_v36, 7  ;;  %v2669_v50 = vrot.slane %v10997_v31, 7  ;;  %v1345_v36 = vld [vmem:[#allocation2 + $0x138] sm:$0x80] }
 0x38f   : > { %6975 = vmatmul.mubr.bf16.gmra.mrb[48].mxu1 %v1447_v55  ;;  %v2633_v7 = vrot.slane %v10988_v59, 7  ;;  %v10994_v59 = vshrl.u32 %v9164_v33, 16 }
 0x390   : > { %7067 = vmatmul.mubr.bf16.gmra.mrb[8].mxu0 %v2613_v22  ;;  %6978 = vmatprep.mubr.bf16.mxu1 %v1459_v16  ;;  %v1343_v22 = vld [vmem:[#allocation2 + $0x120] sm:$0x80]  ;;  %v2641_v16 = vrot.slane %v2639_v27, 7  ;;  %v1487_v2 = vrot.slane %v1485_v48, 7 }
 0x391   : > { %7070 = vmatprep.mubr.bf16.mxu0 %v2625_v25  ;;  %7099 = vmatpush3.bf16.msra.mxu0 %v8069_v29  ;;  %v9583_v55 = vor.u32 %v10992_v41, %v2633_v7  ;;  %v10993_v29 = vshll.u32 %v9355_v32, 16  ;;  %v1491_v30 = vrot.slane %v10994_v59, 7  ;;  %v1497_v25 = vshrl.u32 %v1343_v22, 16  ;;  %v8072_v7 = vld [vmem:[#allocation9 + $0x138] sm:$0xff]   ;;  %v2532_v22 = vld [vmem:[#allocation2 + $0x120] sm:$0x80] }
 0x392   : > { %7100 = vmatprep.subr.bf16.mxu0 %v8070_v21  ;;  %v10998_v41 = vshll.u32 %v9164_v33, 16  ;;  %v2653_v59 = vrot.slane %v2651_v20, 7  ;;  %v11001_v33 = vshll.u32 %v9367_v15, 16  ;;  %v2675_v48 = vshrl.u32 %v2532_v22, 16 }
 0x393   : > { %v9587_v23 = vor.u32 %v10993_v29, %v2645_v14  ;;  %v2637_v27 = vsel %vm1351_vm2, %v2629_v10, %v9583_v55  ;;  %v1483_v14 = vsel %vm1351_vm2, %v1475_v3, %v1482_v56  ;;  %v9605_v56 = vld [vmem:[#allocation9 + $0x140] sm:$0xff]   ;;  %v10999_v3 = vshll.u32 %v9166_v35, 16 }
 0x394   : > { %v1494_v10 = vor.u32 %v10998_v41, %v1491_v30  ;;  %v9615_v30 = vor.u32 %v11001_v33, %v2669_v50 }
 0x395   : > { %7101 = vmatpush3.bf16.msra.mxu0 %v8070_v21  ;;  %v10996_v21 = vshrl.u32 %v9362_v58, 16  ;;  %v2649_v52 = vsel %vm1351_vm2, %v2641_v16, %v9587_v23  ;;  %v1506_v29 = vor.u32 %v10999_v3, %v1503_v17  ;;  %v11000_v16 = vshll.u32 %v9362_v58, 16 }
 0x396   : > { %7102 = vmatprep.subr.bf16.mxu0 %v8071_v45  ;;  %v1495_v20 = vsel %vm1351_vm2, %v1487_v2, %v1494_v10  ;;  %v1509_v17 = vshrl.u32 %v1345_v36, 16  ;;  %v11005_v2 = vshrl.u32 %v9375_v37, 16  ;;  %v11006_v3 = vshll.u32 %v9168_v38, 16 }
 0x397   : > { %6979 = vmatmul.mubr.bf16.gmra.mrb[52].mxu1 %v1471_v51  ;;  %v2657_v46 = vrot.slane %v10996_v21, 7  ;;  %v1499_v51 = vrot.slane %v1497_v25, 7  ;;  %v11002_v21 = vshrl.u32 %v9168_v38, 16  ;;  %v11003_v25 = vshrl.u32 %v9170_v44, 16 }
 0x398   : > { %7071 = vmatmul.mubr.bf16.gmra.mrb[12].mxu0 %v2637_v27  ;;  %6982 = vmatprep.mubr.bf16.mxu1 %v1483_v14  ;;  %v1347_v27 = vld [vmem:[#allocation2 + $0x150] sm:$0x80]  ;;  %v2534_v14 = vld [vmem:[#allocation2 + $0x138] sm:$0x80]  ;;  %v2693_v22 = vrot.slane %v11005_v2, 7  ;;  %v11007_v36 = vshll.u32 %v9170_v44, 16 }
 0x399   : > { %7074 = vmatprep.mubr.bf16.mxu0 %v2649_v52  ;;  %7103 = vmatpush3.bf16.msra.mxu0 %v8071_v45  ;;  %v9611_v5 = vor.u32 %v11000_v16, %v2657_v46  ;;  %v2665_v45 = vrot.slane %v2663_v0, 7  ;;  %v1515_v35 = vrot.slane %v11002_v21, 7  ;;  %v1521_v52 = vshrl.u32 %v1347_v27, 16 }
 0x39a   : > { %7104 = vmatprep.subr.bf16.mxu0 %v8072_v7  ;;  %v1527_v46 = vrot.slane %v11003_v25, 7  ;;  %v1507_v31 = vsel %vm1351_vm2, %v1499_v51, %v1506_v29  ;;  %v2687_v10 = vshrl.u32 %v2534_v14, 16  ;;  %v2677_v51 = vrot.slane %v2675_v48, 7 }
 0x39b   : > { %v2661_v0 = vsel %vm1351_vm2, %v2653_v59, %v9611_v5  ;;  %v2673_v41 = vsel %vm1351_vm2, %v2665_v45, %v9615_v30  ;;  %v1518_v16 = vor.u32 %v11006_v3, %v1515_v35  ;;  %v1511_v59 = vrot.slane %v1509_v17, 7  ;;  %v1349_v45 = vld [vmem:[#allocation2 + $0x168] sm:$0x80] }
 0x39c   : > { %v1530_v29 = vor.u32 %v11007_v36, %v1527_v46  ;;  %v11008_v27 = vshll.u32 %v9369_v63, 16  ;;  %v1523_v21 = vrot.slane %v1521_v52, 7  ;;  %v11009_v14 = vshll.u32 %v9375_v37, 16 }
 0x39d   : > { %7105 = vmatpush3.bf16.msra.mxu0 %v8072_v7  ;;  %v11004_v7 = vshrl.u32 %v9369_v63, 16  ;;  %v11010_v38 = vshrl.u32 %v9177_v49, 16  ;;  %v1519_v44 = vsel %vm1351_vm2, %v1511_v59, %v1518_v16  ;;  %v1533_v17 = vshrl.u32 %v1349_v45, 16 }
 0x39e   : > { %7138 = vmatprep.subr.bf16.mxu0 %v9605_v56  ;;  %v9642_v25 = vor.u32 %v11009_v14, %v2693_v22  ;;  %v1531_v52 = vsel %vm1351_vm2, %v1523_v21, %v1530_v29  ;;  %v11012_v2 = vshrl.u32 %v9393_v24, 16  ;;  %v11013_v3 = vshll.u32 %v9177_v49, 16 }
 0x39f   : > { %6983 = vmatmul.mubr.bf16.gmra.mrb[56].mxu1 %v1495_v20  ;;  %v2681_v50 = vrot.slane %v11004_v7, 7  ;;  %v2689_v20 = vrot.slane %v2687_v10, 7  ;;  %v1539_v35 = vrot.slane %v11010_v38, 7  ;;  %v11011_v7 = vshrl.u32 %v9377_v42, 16 }
 0x3a0   : > { %7075 = vmatmul.mubr.bf16.gmra.mrb[16].mxu0 %v2661_v0  ;;  %6986 = vmatprep.mubr.bf16.mxu1 %v1507_v31  ;;  %v2536_v0 = vld [vmem:[#allocation2 + $0x150] sm:$0x80]  ;;  %v2538_v31 = vld [vmem:[#allocation2 + $0x168] sm:$0x80]  ;;  %v2717_v22 = vrot.slane %v11012_v2, 7  ;;  %v1535_v59 = vrot.slane %v1533_v17, 7 }
 0x3a1   : > { %7078 = vmatprep.mubr.bf16.mxu0 %v2673_v41  ;;  %v9638_v33 = vor.u32 %v11008_v27, %v2681_v50  ;;  %v2699_v46 = vshrl.u32 %v2536_v0, 16  ;;  %v2705_v50 = vrot.slane %v11011_v7, 7  ;;  %v2697_v41 = vsel %vm1351_vm2, %v2689_v20, %v9642_v25  ;;  %v2540_v20 = vld [vmem:[#allocation2 + $0x180] sm:$0x80]  ;;  %v8076_v2 = vld [vmem:[#allocation9 + $0x158] sm:$0xff]  }
 0x3a2   : > { %v2711_v10 = vshrl.u32 %v2538_v31, 16  ;;  %v1542_v16 = vor.u32 %v11013_v3, %v1539_v35  ;;  %v11014_v29 = vshll.u32 %v9377_v42, 16  ;;  %v11015_v21 = vshll.u32 %v9393_v24, 16  ;;  %v8119_v7 = vld [vmem:[#allocation2 + $0x20] sm:$0xff]  ;;  %v8078_v3 = vld [vmem:[#allocation9 + $0x168] sm:$0xff]  }
 0x3a3   : > { %v2685_v48 = vsel %vm1351_vm2, %v2677_v51, %v9638_v33  ;;  %v2701_v36 = vrot.slane %v2699_v46, 7  ;;  %v2723_v49 = vshrl.u32 %v2540_v20, 16  ;;  %v11016_v31 = vshrl.u32 %v9395_v12, 16 }
 0x3a4   : > { %v9660_v51 = vor.u32 %v11014_v29, %v2705_v50  ;;  %v2713_v27 = vrot.slane %v2711_v10, 7  ;;  %v9664_v45 = vor.u32 %v11015_v21, %v2717_v22  ;;  %v1543_v14 = vsel %vm1351_vm2, %v1535_v59, %v1542_v16  ;;  %v8074_v50 = vld [vmem:[#allocation9 + $0x148] sm:$0xff]   ;;  %v8075_v10 = vld [vmem:[#allocation9 + $0x150] sm:$0xff]   ;;  %v8077_v22 = vld [vmem:[#allocation9 + $0x160] sm:$0xff]  }
 0x3a5   : > { %v2729_v38 = vrot.slane %v11016_v31, 7  ;;  %v2725_v17 = vrot.slane %v2723_v49, 7  ;;  %v9694_v16 = vld [vmem:[#allocation2 + $0x38] sm:$0xff]  ;;  %v3269_v29 = vld [vmem:[#allocation2 + $0x40] sm:$0x1] }
 0x3a6   : > { %v2709_v0 = vsel %vm1351_vm2, %v2701_v36, %v9660_v51  ;;  %v2721_v35 = vsel %vm1351_vm2, %v2713_v27, %v9664_v45  ;;  %v3318_v27 = vshll.u32 %v3269_v29, 16  ;;  %v3311_v20 = vshrl.u32 %v9694_v16, 16  ;;  %v3273_v49 = vld [vmem:[#allocation2 + $0x70] sm:$0x1]  ;;  %v3275_v31 = vld [vmem:[#allocation2 + $0x88] sm:$0x1] }
 0x3a7   : > { %6987 = vmatmul.mubr.bf16.gmra.mrb[60].mxu1 %v1519_v44  ;;  %v11017_v44 = vmov 0.0  }
 0x3a8   : > { %7079 = vmatmul.mubr.bf16.gmra.mrb[20].mxu0 %v2685_v48  ;;  %6990 = vmatprep.mubr.bf16.mxu1 %v1531_v52  ;;  %v11018_v48 = vshll.u32 %v9395_v12, 16 }
 0x3a9   : > { %7082 = vmatprep.mubr.bf16.mxu0 %v2697_v41  ;;  %v8120_v41 = vld [vmem:[#allocation2 + $0x38] sm:$0xff] }
 0x3aa   : > { %v9677_v52 = vor.u32 %v11018_v48, %v2729_v38  ;;  %v8082_v38 = vld [vmem:[#allocation9 + $0x188] sm:$0xff]   ;;  %v3354_v48 = vshll.u32 %v3275_v31, 16  ;;  %v3289_v31 = vld [vmem:[#allocation2 + $0x130] sm:$0x1] }
 0x3ac   : > { %v2733_v46 = vsel %vm1351_vm2, %v2725_v17, %v9677_v52  ;;  %v3342_v17 = vshll.u32 %v3273_v49, 16 }
 0x3af   : > { %6991 = vmatmul.mubr.bf16.gmra.mrb[64].mxu1 %v1543_v14  ;;  %v3320_v14 = vrot.slane %v3318_v27, 1  ;;  %v8088_v27 = vld [vmem:[#allocation9 + $0x1b8] sm:$0xff]  }
 0x3b0   : > { %7083 = vmatmul.mubr.bf16.gmra.mrb[24].mxu0 %v2709_v0  ;;  %7362 = vmatprep.mubr.msk.f32.mxu1 %vm8429_vm0, %v11017_v44 }
 0x3b1   : > { %7086 = vmatprep.mubr.bf16.mxu0 %v2721_v35 }
 0x3b8   : > { %7087 = vmatmul.mubr.bf16.gmra.mrb[28].mxu0 %v2733_v46  ;;  %v8083_v46 = vld [vmem:[#allocation9 + $0x190] sm:$0xff]  }
 0x3b9   : > { %7106 = vmatprep.mubr.bf16.mxu0 %v8119_v7  ;;  %v3344_v7 = vrot.slane %v3342_v17, 1 }
 0x3c0   : > { %7107 = vmatmul.mubr.bf16.vlgmr.msra.gmra.mrb[0].mxu0 %v8120_v41  ;;  %v3277_v41 = vld [vmem:[#allocation2 + $0xa0] sm:$0x1] }
 0x3c1   : > { %7139 = vmatpush3.bf16.msra.mxu0 %v9605_v56  ;;  %7110 = vmatprep.mubr.bf16.mxu0 %v9307_v11  ;;  %v8079_v11 = vld [vmem:[#allocation9 + $0x170] sm:$0xff]   ;;  %v8080_v56 = vld [vmem:[#allocation9 + $0x178] sm:$0xff]  }
 0x3c2   : > { %7140 = vmatprep.subr.bf16.mxu0 %v8074_v50 }
 0x3c5   : > { %7141 = vmatpush3.bf16.msra.mxu0 %v8074_v50  ;;  %v3356_v50 = vrot.slane %v3354_v48, 1 }
 0x3c6   : > { %7142 = vmatprep.subr.bf16.mxu0 %v8075_v10 }
 0x3c8   : > { %7111 = vmatmul.mubr.bf16.gmra.mrb[4].mxu0 %v9314_v60  ;;  %v3266_v60 = vld [vmem:[#allocation2 + $0x20] sm:$0xff] }
 0x3c9   : > { %7114 = vmatprep.mubr.bf16.mxu0 %v9316_v43  ;;  %7143 = vmatpush3.bf16.msra.mxu0 %v8075_v10  ;;  %v8081_v43 = vld [vmem:[#allocation9 + $0x180] sm:$0xff]   ;;  %v3299_v59 = vshrl.u32 %v3266_v60, 16  ;;  %v3279_v10 = vld [vmem:[#allocation2 + $0xb8] sm:$0x1] }
 0x3ca   : > { %7144 = vmatprep.subr.bf16.mxu0 %v8076_v2 }
 0x3cd   : > { %7145 = vmatpush3.bf16.msra.mxu0 %v8076_v2  ;;  %v8084_v2 = vld [vmem:[#allocation9 + $0x198] sm:$0xff]  }
 0x3ce   : > { %7146 = vmatprep.subr.bf16.mxu0 %v8077_v22 }
 0x3d0   : > { %7115 = vmatmul.mubr.bf16.gmra.mrb[8].mxu0 %v9330_v4  ;;  %v3301_v4 = vshll.u32 %v3266_v60, 16 }
 0x3d1   : > { %7118 = vmatprep.mubr.bf16.mxu0 %v9339_v18  ;;  %7147 = vmatpush3.bf16.msra.mxu0 %v8077_v22  ;;  %v3267_v18 = vld [vmem:[#allocation2 + $0x28] sm:$0x1]  ;;  %v3345_v22 = vsel %vm2043_vm1, %v9399_v13, %v3344_v7  ;;  %v3295_v7 = vld [vmem:[#allocation2 + $0x178] sm:$0x1] }
 0x3d2   : > { %7148 = vmatprep.subr.bf16.mxu0 %v8078_v3 }
 0x3d5   : > { %7149 = vmatpush3.bf16.msra.mxu0 %v8078_v3  ;;  %v3366_v3 = vshll.u32 %v3277_v41, 16 }
 0x3d6   : > { %7150 = vmatprep.subr.bf16.mxu0 %v8079_v11 }
 0x3d8   : > { %7119 = vmatmul.mubr.bf16.gmra.mrb[12].mxu0 %v9348_v1  ;;  %v3303_v1 = vrot.slane %v3301_v4, 1  ;;  %v3281_v4 = vld [vmem:[#allocation2 + $0xd0] sm:$0x1] }
 0x3d9   : > { %7122 = vmatprep.mubr.bf16.mxu0 %v9355_v32  ;;  %7151 = vmatpush3.bf16.msra.mxu0 %v8079_v11  ;;  %v3306_v32 = vshll.u32 %v3267_v18, 16  ;;  %v3378_v11 = vshll.u32 %v3279_v10, 16  ;;  %v3283_v18 = vld [vmem:[#allocation2 + $0xe8] sm:$0x1] }
 0x3da   : > { %7152 = vmatprep.subr.bf16.mxu0 %v8080_v56  ;;  %v3304_v36 = vor.u32 %v3303_v1, %v3299_v59  ;;  %v8086_v1 = vld [vmem:[#allocation9 + $0x1a8] sm:$0xff]   ;;  %v3402_v59 = vshll.u32 %v3283_v18, 16 }
 0x3db   : > { %v3380_v60 = vrot.slane %v3378_v11, 1 }
 0x3dc   : > { %v3404_v29 = vrot.slane %v3402_v59, 1 }
 0x3dd   : > { %7153 = vmatpush3.bf16.msra.mxu0 %v8080_v56  ;;  %v8085_v56 = vld [vmem:[#allocation9 + $0x1a0] sm:$0xff]  }
 0x3de   : > { %7186 = vmatprep.subr.bf16.mxu0 %v8081_v43 }
 0x3e0   : > { %7123 = vmatmul.mubr.bf16.gmra.mrb[16].mxu0 %v9362_v58  ;;  %v3313_v58 = vshll.u32 %v9694_v16, 16 }
 0x3e1   : > { %7126 = vmatprep.mubr.bf16.mxu0 %v9367_v15  ;;  %v3308_v15 = vrot.slane %v3306_v32, 1  ;;  %v3390_v32 = vshll.u32 %v3281_v4, 16  ;;  %v3804_v4 = vrot.slane %v3311_v20, 7 }
 0x3e8   : > { %7127 = vmatmul.mubr.bf16.gmra.mrb[20].mxu0 %v9369_v63  ;;  %v3271_v63 = vld [vmem:[#allocation2 + $0x58] sm:$0x1] }
 0x3e9   : > { %7130 = vmatprep.mubr.bf16.mxu0 %v9375_v37  ;;  %v3315_v37 = vrot.slane %v3313_v58, 1  ;;  %v3330_v21 = vshll.u32 %v3271_v63, 16  ;;  %v3285_v63 = vld [vmem:[#allocation2 + $0x100] sm:$0x1] }
 0x3eb   : > { %v3332_v0 = vrot.slane %v3330_v21, 1 }
 0x3f0   : > { %7131 = vmatmul.mubr.bf16.gmra.mrb[24].mxu0 %v9377_v42  ;;  %v3309_v42 = vsel %vm2043_vm1, %v3304_v36, %v3308_v15  ;;  %v8087_v36 = vld [vmem:[#allocation9 + $0x1b0] sm:$0xff]   ;;  %v3392_v15 = vrot.slane %v3390_v32, 1 }
 0x3f1   : > { %7134 = vmatprep.mubr.bf16.mxu0 %v9393_v24  ;;  %v9705_v24 = vor.u32 %v3315_v37, %v3311_v20  ;;  %v3287_v37 = vld [vmem:[#allocation2 + $0x118] sm:$0x1]  ;;  %v3769_v32 = vld [vmem:[#allocation2 + $0x60] sm:$0x80]  ;;  %v3771_v20 = vld [vmem:[#allocation2 + $0x78] sm:$0x80] }
 0x3f2   : > { %v3426_v21 = vshll.u32 %v3287_v37, 16 }
 0x3f3   : > { %v3321_v35 = vsel %vm2043_vm1, %v9705_v24, %v3320_v14  ;;  %v8089_v14 = vld [vmem:[#allocation9 + $0x1c0] sm:$0xff]  }
 0x3f4   : > { %v3428_v49 = vrot.slane %v3426_v21, 1 }
 0x3f6   : > { %v3429_v17 = vsel %vm2043_vm1, %v9456_v57, %v3428_v49  ;;  %v3765_v57 = vld [vmem:[#allocation2 + $0x30] sm:$0x80] }
 0x3f8   : > { %7135 = vmatmul.mubr.bf16.gmra.mrb[28].mxu0 %v9395_v12  ;;  %v3333_v12 = vsel %vm2043_vm1, %v9387_v53, %v3332_v0  ;;  %v3357_v53 = vsel %vm2043_vm1, %v9403_v62, %v3356_v50  ;;  %v3381_v62 = vsel %vm2043_vm1, %v9423_v8, %v3380_v60  ;;  %v3405_v8 = vsel %vm2043_vm1, %v9441_v34, %v3404_v29 }
 0x3f9   : > { %7154 = vmatprep.mubr.bf16.mxu0 %v3309_v42  ;;  %v3414_v42 = vshll.u32 %v3285_v63, 16  ;;  %v3822_v29 = vshrl.u32 %v3769_v32, 16 }
 0x3fb   : > { %v3416_v0 = vrot.slane %v3414_v42, 1  ;;  %v3824_v37 = vrot.slane %v3822_v29, 7 }
 0x400   : > { %7155 = vmatmul.mubr.bf16.vlgmr.msra.gmra.mrb[0].mxu0 %v3321_v35  ;;  %v3417_v35 = vsel %vm2043_vm1, %v9452_v9, %v3416_v0  ;;  %v3474_v9 = vshll.u32 %v3295_v7, 16  ;;  %v8091_v0 = vld [vmem:[#allocation9 + $0x1d0] sm:$0xff]  }
 0x401   : > { %7187 = vmatpush3.bf16.msra.mxu0 %v8081_v43  ;;  %7158 = vmatprep.mubr.bf16.mxu0 %v3333_v12  ;;  %v3368_v43 = vrot.slane %v3366_v3, 1  ;;  %v3297_v3 = vld [vmem:[#allocation2 + $0x190] sm:$0x1] }
 0x402   : > { %7188 = vmatprep.subr.bf16.mxu0 %v8082_v38 }
 0x403   : > { %v3369_v13 = vsel %vm2043_vm1, %v9409_v26, %v3368_v43  ;;  %v3393_v26 = vsel %vm2043_vm1, %v9430_v39, %v3392_v15  ;;  %v3438_v39 = vshll.u32 %v3289_v31, 16  ;;  %v11020_v43 = vld [vmem:[#allocation22_spill] sm:$0xff] }
 0x405   : > { %7189 = vmatpush3.bf16.msra.mxu0 %v8082_v38  ;;  %v3291_v38 = vld [vmem:[#allocation2 + $0x148] sm:$0x1]  ;;  %v3440_v12 = vrot.slane %v3438_v39, 1 }
 0x406   : > { %7190 = vmatprep.subr.bf16.mxu0 %v8083_v46  ;;  %v3450_v34 = vshll.u32 %v3291_v38, 16  ;;  %v3775_v38 = vld [vmem:[#allocation2 + $0xa8] sm:$0x80] }
 0x407   : > { %v3441_v50 = vsel %vm2043_vm1, %v9460_v61, %v3440_v12  ;;  %v3798_v61 = vshrl.u32 %v3765_v57, 16  ;;  %v8092_v39 = vld [vmem:[#allocation9 + $0x1d8] sm:$0xff]   ;;  %v8093_v12 = vld [vmem:[#allocation9 + $0x1e0] sm:$0xff]  }
 0x408   : > { %7159 = vmatmul.mubr.bf16.gmra.mrb[4].mxu0 %v3345_v22  ;;  %v3452_v48 = vrot.slane %v3450_v34, 1  ;;  %v3476_v22 = vrot.slane %v3474_v9, 1 }
 0x409   : > { %7162 = vmatprep.mubr.bf16.mxu0 %v3357_v53  ;;  %7191 = vmatpush3.bf16.msra.mxu0 %v8083_v46  ;;  %v3293_v46 = vld [vmem:[#allocation2 + $0x160] sm:$0x1]  ;;  %v11019_v53 = vld [vmem:[#allocation21_spill] sm:$0xff]  ;;  %v3800_v18 = vrot.slane %v3798_v61, 7  ;;  %v3783_v61 = vld [vmem:[#allocation2 + $0x108] sm:$0x80] }
 0x40a   : > { %7192 = vmatprep.subr.bf16.mxu0 %v8084_v2  ;;  %v3462_v41 = vshll.u32 %v3293_v46, 16  ;;  %v3453_v10 = vsel %vm2043_vm1, %v9465_v28, %v3452_v48  ;;  %v3477_v60 = vsel %vm2043_vm1, %v11020_v43, %v3476_v22 }
 0x40d   : > { %7193 = vmatpush3.bf16.msra.mxu0 %v8084_v2  ;;  %v3464_v2 = vrot.slane %v3462_v41, 1  ;;  %v3779_v41 = vld [vmem:[#allocation2 + $0xd8] sm:$0x80] }
 0x40e   : > { %7194 = vmatprep.subr.bf16.mxu0 %v8085_v56 }
 0x40f   : > { %v3465_v11 = vsel %vm2043_vm1, %v11019_v53, %v3464_v2  ;;  %v3882_v2 = vshrl.u32 %v3779_v41, 16  ;;  %v8095_v53 = vld [vmem:[#allocation9 + $0x1f0] sm:$0xff]  }
 0x410   : > { %7163 = vmatmul.mubr.bf16.gmra.mrb[8].mxu0 %v3369_v13  ;;  %v3767_v13 = vld [vmem:[#allocation2 + $0x48] sm:$0x80] }
 0x411   : > { %7166 = vmatprep.mubr.bf16.mxu0 %v3381_v62  ;;  %7195 = vmatpush3.bf16.msra.mxu0 %v8085_v56  ;;  %v3486_v56 = vshll.u32 %v3297_v3, 16  ;;  %v11021_v62 = vld [vmem:[#allocation23_spill] sm:$0xff] }
 0x412   : > { %7196 = vmatprep.subr.bf16.mxu0 %v8086_v1 }
 0x413   : > { %v3488_v28 = vrot.slane %v3486_v56, 1  ;;  %v3884_v56 = vrot.slane %v3882_v2, 7 }
 0x415   : > { %7197 = vmatpush3.bf16.msra.mxu0 %v8086_v1  ;;  %v3807_v1 = vor.u32 %v3804_v4, %v3313_v58  ;;  %v3489_v59 = vsel %vm2043_vm1, %v11021_v62, %v3488_v28  ;;  %v3834_v58 = vshrl.u32 %v3771_v20, 16  ;;  %v3785_v4 = vld [vmem:[#allocation2 + $0x120] sm:$0x80]  ;;  %v3892_v28 = vsel %vm1351_vm2, %v3884_v56, %v9587_v23  ;;  %v8097_v62 = vld [vmem:[#allocation9 + $0x200] sm:$0xff]  }
 0x416   : > { %7198 = vmatprep.subr.bf16.mxu0 %v8087_v36 }
 0x417   : > { %v3808_v15 = vsel %vm1351_vm2, %v3800_v18, %v3807_v1  ;;  %v3836_v49 = vrot.slane %v3834_v58, 7  ;;  %v3906_v18 = vshrl.u32 %v3783_v61, 16 }
 0x418   : > { %7167 = vmatmul.mubr.bf16.gmra.mrb[12].mxu0 %v3393_v26  ;;  %v8090_v26 = vld [vmem:[#allocation9 + $0x1c8] sm:$0xff]  }
 0x419   : > { %7170 = vmatprep.mubr.bf16.mxu0 %v3405_v8  ;;  %7199 = vmatpush3.bf16.msra.mxu0 %v8087_v36  ;;  %v3810_v36 = vshrl.u32 %v3767_v13, 16  ;;  %v3832_v8 = vsel %vm1351_vm2, %v3824_v37, %v9531_v40  ;;  %v3918_v13 = vshrl.u32 %v3785_v4, 16  ;;  %v3789_v37 = vld [vmem:[#allocation2 + $0x150] sm:$0x80] }
 0x41a   : > { %7200 = vmatprep.subr.bf16.mxu0 %v8088_v27 }
 0x41b   : > { %v3812_v63 = vrot.slane %v3810_v36, 7  ;;  %v3908_v36 = vrot.slane %v3906_v18, 7  ;;  %v3920_v29 = vrot.slane %v3918_v13, 7  ;;  %v8098_v18 = vld [vmem:[#allocation9 + $0x208] sm:$0xff]   ;;  %v8123_v13 = vld [vmem:[#allocation2 + $0x68] sm:$0xff] }
 0x41d   : > { %7201 = vmatpush3.bf16.msra.mxu0 %v8088_v27  ;;  %v3773_v27 = vld [vmem:[#allocation2 + $0x90] sm:$0x80]  ;;  %v3820_v42 = vsel %vm1351_vm2, %v3812_v63, %v9508_v47  ;;  %v3844_v47 = vsel %vm1351_vm2, %v3836_v49, %v9535_v54  ;;  %v3787_v63 = vld [vmem:[#allocation2 + $0x138] sm:$0x80]  ;;  %v3791_v49 = vld [vmem:[#allocation2 + $0x168] sm:$0x80] }
 0x41e   : > { %7234 = vmatprep.subr.bf16.mxu0 %v8089_v14  ;;  %v3846_v21 = vshrl.u32 %v3773_v27, 16  ;;  %v3930_v20 = vshrl.u32 %v3787_v63, 16  ;;  %v3928_v27 = vsel %vm1351_vm2, %v3920_v29, %v9638_v33  ;;  %v8099_v29 = vld [vmem:[#allocation9 + $0x210] sm:$0xff]  }
 0x420   : > { %7171 = vmatmul.mubr.bf16.gmra.mrb[16].mxu0 %v3417_v35  ;;  %v3848_v31 = vrot.slane %v3846_v21, 7  ;;  %v3777_v35 = vld [vmem:[#allocation2 + $0xc0] sm:$0x80] }
 0x421   : > { %7174 = vmatprep.mubr.bf16.mxu0 %v3429_v17  ;;  %v3858_v17 = vshrl.u32 %v3775_v38, 16  ;;  %v3870_v34 = vshrl.u32 %v3777_v35, 16  ;;  %v3793_v38 = vld [vmem:[#allocation2 + $0x180] sm:$0x80]  ;;  %v3954_v35 = vshrl.u32 %v3791_v49, 16 }
 0x422   : > { %v3856_v40 = vsel %vm1351_vm2, %v3848_v31, %v9557_v6  ;;  %v8094_v6 = vld [vmem:[#allocation9 + $0x1e8] sm:$0xff]   ;;  %v8103_v49 = vld [vmem:[#allocation9 + $0x230] sm:$0xff]  }
 0x423   : > { %v3860_v46 = vrot.slane %v3858_v17, 7 }
 0x425   : > { %v3868_v9 = vsel %vm1351_vm2, %v3860_v46, %v9561_v19  ;;  %v3956_v46 = vrot.slane %v3954_v35, 7  ;;  %v8129_v35 = vld [vmem:[#allocation2 + $0xf8] sm:$0xff] }
 0x428   : > { %7175 = vmatmul.mubr.bf16.gmra.mrb[20].mxu0 %v3441_v50  ;;  %v3872_v50 = vrot.slane %v3870_v34, 7  ;;  %v3795_v34 = vld [vmem:[#allocation2 + $0x198] sm:$0x80] }
 0x429   : > { %7178 = vmatprep.mubr.bf16.mxu0 %v3453_v10  ;;  %v3781_v10 = vld [vmem:[#allocation2 + $0xf0] sm:$0x80] }
 0x42a   : > { %v3880_v22 = vsel %vm1351_vm2, %v3872_v50, %v9583_v55  ;;  %v3894_v3 = vshrl.u32 %v3781_v10, 16  ;;  %v8096_v55 = vld [vmem:[#allocation9 + $0x1f8] sm:$0xff]   ;;  %v3978_v10 = vshrl.u32 %v3795_v34, 16  ;;  %v8132_v34 = vld [vmem:[#allocation2 + $0x140] sm:$0xff] }
 0x430   : > { %7179 = vmatmul.mubr.bf16.gmra.mrb[24].mxu0 %v3465_v11 }
 0x431   : > { %7182 = vmatprep.mubr.bf16.mxu0 %v3477_v60  ;;  %v3896_v60 = vrot.slane %v3894_v3, 7 }
 0x433   : > { %v3904_v1 = vsel %vm1351_vm2, %v3896_v60, %v9611_v5  ;;  %v3916_v5 = vsel %vm1351_vm2, %v3908_v36, %v9615_v30 }
 0x438   : > { %7183 = vmatmul.mubr.bf16.gmra.mrb[28].mxu0 %v3489_v59 }
 0x439   : > { %7202 = vmatprep.mubr.bf16.mxu0 %v3808_v15 }
 0x440   : > { %7203 = vmatmul.mubr.bf16.vlgmr.msra.gmra.mrb[0].mxu0 %v3820_v42 }
 0x441   : > { %7235 = vmatpush3.bf16.msra.mxu0 %v8089_v14  ;;  %7206 = vmatprep.mubr.bf16.mxu0 %v3832_v8  ;;  %v3932_v8 = vrot.slane %v3930_v20, 7  ;;  %v8124_v20 = vld [vmem:[#allocation2 + $0x80] sm:$0xff] }
 0x442   : > { %7236 = vmatprep.subr.bf16.mxu0 %v8090_v26 }
 0x443   : > { %v3940_v30 = vsel %vm1351_vm2, %v3932_v8, %v9642_v25  ;;  %v8126_v8 = vld [vmem:[#allocation2 + $0xb0] sm:$0xff] }
 0x445   : > { %7237 = vmatpush3.bf16.msra.mxu0 %v8090_v26  ;;  %v3942_v26 = vshrl.u32 %v3789_v37, 16 }
 0x446   : > { %7238 = vmatprep.subr.bf16.mxu0 %v8091_v0 }
 0x448   : > { %7207 = vmatmul.mubr.bf16.gmra.mrb[4].mxu0 %v3844_v47  ;;  %v9798_v47 = vld [vmem:[#allocation2 + $0x8] sm:$0xff] }
 0x449   : > { %7210 = vmatprep.mubr.bf16.mxu0 %v3856_v40  ;;  %7239 = vmatpush3.bf16.msra.mxu0 %v8091_v0  ;;  %v3944_v0 = vrot.slane %v3942_v26, 7  ;;  %v3982_v17 = vshrl.u32 %v9798_v47, 16  ;;  %v8102_v26 = vld [vmem:[#allocation9 + $0x228] sm:$0xff]  }
 0x44a   : > { %v9750_v14 = vpop.f32.mrb[36].mxu1  ;;  %7240 = vmatprep.subr.bf16.mxu0 %v8092_v39 }
 0x44b   : > { %v9752_v48 = vpop.f32.mrb[37].mxu1  ;;  %v3952_v33 = vsel %vm1351_vm2, %v3944_v0, %v9660_v51  ;;  %v3984_v51 = vrot.slane %v3982_v17, 7  ;;  %v8127_v0 = vld [vmem:[#allocation2 + $0xc8] sm:$0xff] }
 0x44c   : > { %v9754_v7 = vpop.f32.mrb[38].mxu1 }
 0x44d   : > { %v9756_v54 = vpop.f32.mrb[39].mxu1  ;;  %7241 = vmatpush3.bf16.msra.mxu0 %v8092_v39  ;;  %v3966_v39 = vshrl.u32 %v3793_v38, 16  ;;  %v8104_v38 = vld [vmem:[#allocation9 + $0x238] sm:$0xff]  }
 0x44e   : > { %7242 = vmatprep.subr.bf16.mxu0 %v8093_v12 }
 0x44f   : > { %v3968_v25 = vrot.slane %v3966_v39, 7  ;;  %v8131_v39 = vld [vmem:[#allocation2 + $0x128] sm:$0xff] }
 0x450   : > { %7211 = vmatmul.mubr.bf16.gmra.mrb[8].mxu0 %v3868_v9  ;;  %v3964_v9 = vsel %vm1351_vm2, %v3956_v46, %v9664_v45  ;;  %v8133_v46 = vld [vmem:[#allocation2 + $0x158] sm:$0xff] }
 0x451   : > { %7214 = vmatprep.mubr.bf16.mxu0 %v3880_v22  ;;  %7243 = vmatpush3.bf16.msra.mxu0 %v8093_v12  ;;  %v3976_v2 = vsel %vm1351_vm2, %v3968_v25, %v9677_v52  ;;  %v3980_v22 = vrot.slane %v3978_v10, 7  ;;  %v4522_v25 = vld [vmem:[#allocation2 + $0x40] sm:$0x1]  ;;  %v8134_v10 = vld [vmem:[#allocation2 + $0x170] sm:$0xff] }
 0x452   : > { %v9762_v57 = vpop.f32.mrb[40].mxu1  ;;  %7244 = vmatprep.subr.bf16.mxu0 %v8094_v6 }
 0x453   : > { %v9764_v11 = vpop.f32.mrb[41].mxu1 }
 0x454   : > { %v9766_v43 = vpop.f32.mrb[42].mxu1 }
 0x455   : > { %v9768_v19 = vpop.f32.mrb[43].mxu1  ;;  %7245 = vmatpush3.bf16.msra.mxu0 %v8094_v6  ;;  %v3985_v6 = vshll.u32 %v9798_v47, 16 }
 0x456   : > { %7246 = vmatprep.subr.bf16.mxu0 %v8095_v53 }
 0x457   : > { %v3987_v3 = vor.u32 %v3985_v6, %v3984_v51  ;;  %v4561_v51 = vshll.u32 %v4522_v25, 16  ;;  %v4530_v25 = vld [vmem:[#allocation2 + $0xa0] sm:$0x1] }
 0x458   : > { %7215 = vmatmul.mubr.bf16.gmra.mrb[12].mxu0 %v3892_v28 }
 0x459   : > { %7218 = vmatprep.mubr.bf16.mxu0 %v3904_v1  ;;  %7247 = vmatpush3.bf16.msra.mxu0 %v8095_v53  ;;  %v3988_v4 = vsel %vm1351_vm2, %v3980_v22, %v3987_v3  ;;  %v8122_v1 = vld [vmem:[#allocation2 + $0x50] sm:$0xff]  ;;  %v4525_v22 = vld [vmem:[#allocation2 + $0x68] sm:$0xff] }
 0x45a   : > { %v9774_v32 = vpop.f32.mrb[44].mxu1  ;;  %7248 = vmatprep.subr.bf16.mxu0 %v8096_v55 }
 0x45b   : > { %v9776_v59 = vpop.f32.mrb[45].mxu1 }
 0x45c   : > { %v9778_v15 = vpop.f32.mrb[46].mxu1 }
 0x45d   : > { %v9780_v23 = vpop.f32.mrb[47].mxu1  ;;  %7249 = vmatpush3.bf16.msra.mxu0 %v8096_v55 }
 0x45e   : > { %7282 = vmatprep.subr.bf16.mxu0 %v8097_v62 }
 0x460   : > { %7219 = vmatmul.mubr.bf16.gmra.mrb[16].mxu0 %v3916_v5  ;;  %v8100_v5 = vld [vmem:[#allocation9 + $0x218] sm:$0xff]  }
 0x461   : > { %7222 = vmatprep.mubr.bf16.mxu0 %v3928_v27  ;;  %v8125_v27 = vld [vmem:[#allocation2 + $0x98] sm:$0xff] }
 0x462   : > { %v9786_v42 = vpop.f32.mrb[48].mxu1 }
 0x463   : > { %v9788_v58 = vpop.f32.mrb[49].mxu1 }
 0x464   : > { %v9790_v21 = vpop.f32.mrb[50].mxu1 }
 0x465   : > { %v9792_v31 = vpop.f32.mrb[51].mxu1 }
 0x468   : > { %7223 = vmatmul.mubr.bf16.gmra.mrb[20].mxu0 %v3940_v30  ;;  %v8128_v30 = vld [vmem:[#allocation2 + $0xe0] sm:$0xff] }
 0x469   : > { %7226 = vmatprep.mubr.bf16.mxu0 %v3952_v33  ;;  %v8130_v33 = vld [vmem:[#allocation2 + $0x110] sm:$0xff] }
 0x46a   : > { %v9801_v40 = vpop.f32.mrb[52].mxu1 }
 0x46b   : > { %v9803_v12 = vpop.f32.mrb[53].mxu1 }
 0x46c   : > { %v9805_v50 = vpop.f32.mrb[54].mxu1 }
 0x46d   : > { %v9807_v41 = vpop.f32.mrb[55].mxu1 }
 0x470   : > { %7227 = vmatmul.mubr.bf16.gmra.mrb[24].mxu0 %v3964_v9  ;;  %v4523_v9 = vld [vmem:[#allocation2 + $0x50] sm:$0xff] }
 0x471   : > { %7230 = vmatprep.mubr.bf16.mxu0 %v3976_v2  ;;  %v8135_v2 = vld [vmem:[#allocation2 + $0x188] sm:$0xff]  ;;  %v4568_v3 = vshll.u32 %v4523_v9, 16 }
 0x472   : > { %v9818_v53 = vpop.f32.mrb[56].mxu1 }
 0x473   : > { %v9820_v56 = vpop.f32.mrb[57].mxu1 }
 0x474   : > { %v9822_v60 = vpop.f32.mrb[58].mxu1 }
 0x475   : > { %v9824_v61 = vpop.f32.mrb[59].mxu1 }
 0x478   : > { %7231 = vmatmul.mubr.bf16.gmra.mrb[28].mxu0 %v3988_v4  ;;  %v4563_v4 = vrot.slane %v4561_v51, 1 }
 0x479   : > { %7250 = vmatprep.mubr.bf16.mxu0 %v9694_v16 }
 0x47a   : > { %v9828_v45 = vpop.f32.mrb[60].mxu1 }
 0x47b   : > { %v9830_v52 = vpop.f32.mrb[61].mxu1 }
 0x47c   : > { %v9832_v55 = vpop.f32.mrb[62].mxu1 }
 0x47d   : > { %v9834_v28 = vpop.f32.mrb[63].mxu1 }
 0x480   : > { %7251 = vmatmul.mubr.bf16.vlgmr.msra.gmra.mrb[0].mxu0 %v8122_v1  ;;  %v4580_v1 = vshll.u32 %v4525_v22, 16 }
 0x481   : > { %7283 = vmatpush3.bf16.msra.mxu0 %v8097_v62  ;;  %7254 = vmatprep.mubr.bf16.mxu0 %v8123_v13  ;;  %v8101_v62 = vld [vmem:[#allocation9 + $0x220] sm:$0xff]  }
 0x482   : > { %v9836_v36 = vpop.f32.mrb[64].mxu1  ;;  %7284 = vmatprep.subr.bf16.mxu0 %v8098_v18  ;;  %v4526_v13 = vld [vmem:[#allocation2 + $0x70] sm:$0x1] }
 0x483   : > { %v9838_v63 = vpop.f32.mrb[65].mxu1 }
 0x484   : > { %v9840_v16 = vpop.f32.mrb[66].mxu1 }
 0x485   : > { %v9842_v37 = vpop.f32.mrb[67].mxu1  ;;  %7285 = vmatpush3.bf16.msra.mxu0 %v8098_v18  ;;  %v4524_v18 = vld [vmem:[#allocation2 + $0x58] sm:$0x1] }
 0x486   : > { %7286 = vmatprep.subr.bf16.mxu0 %v8099_v29 }
 0x488   : > { %7255 = vmatmul.mubr.bf16.gmra.mrb[4].mxu0 %v8124_v20  ;;  %v4564_v20 = vsel %vm2043_vm1, %v9705_v24, %v4563_v4  ;;  %v4609_v4 = vshll.u32 %v4530_v25, 16 }
 0x489   : > { %7258 = vmatprep.mubr.bf16.mxu0 %v8125_v27  ;;  %7287 = vmatpush3.bf16.msra.mxu0 %v8099_v29  ;;  %v4570_v29 = vrot.slane %v4568_v3, 1  ;;  %v4582_v27 = vrot.slane %v4580_v1, 1 }
 0x48a   : > { %7288 = vmatprep.subr.bf16.mxu0 %v8100_v5 }
 0x48d   : > { %7289 = vmatpush3.bf16.msra.mxu0 %v8100_v5  ;;  %v4573_v5 = vshll.u32 %v4524_v18, 16  ;;  %v4533_v18 = vld [vmem:[#allocation2 + $0xc8] sm:$0xff] }
 0x48e   : > { %7290 = vmatprep.subr.bf16.mxu0 %v8101_v62  ;;  %v4626_v25 = vshrl.u32 %v4533_v18, 16 }
 0x490   : > { %7259 = vmatmul.mubr.bf16.gmra.mrb[8].mxu0 %v8126_v8  ;;  %v4566_v8 = vshrl.u32 %v4523_v9, 16  ;;  %v4531_v9 = vld [vmem:[#allocation2 + $0xb0] sm:$0xff] }
 0x491   : > { %7262 = vmatprep.mubr.bf16.mxu0 %v8127_v0  ;;  %7291 = vmatpush3.bf16.msra.mxu0 %v8101_v62  ;;  %v4585_v62 = vshll.u32 %v4526_v13, 16  ;;  %v4529_v0 = vld [vmem:[#allocation2 + $0x98] sm:$0xff] }
 0x492   : > { %7292 = vmatprep.subr.bf16.mxu0 %v8102_v26  ;;  %v4602_v1 = vshrl.u32 %v4529_v0, 16 }
 0x495   : > { %7293 = vmatpush3.bf16.msra.mxu0 %v8102_v26  ;;  %v4527_v26 = vld [vmem:[#allocation2 + $0x80] sm:$0xff] }
 0x496   : > { %7294 = vmatprep.subr.bf16.mxu0 %v8103_v49 }
 0x498   : > { %7263 = vmatmul.mubr.bf16.gmra.mrb[12].mxu0 %v8128_v30  ;;  %v4575_v30 = vrot.slane %v4573_v5, 1  ;;  %v4616_v5 = vshll.u32 %v4531_v9, 16 }
 0x499   : > { %7266 = vmatprep.mubr.bf16.mxu0 %v8129_v35  ;;  %7295 = vmatpush3.bf16.msra.mxu0 %v8103_v49  ;;  %v4578_v49 = vshrl.u32 %v4525_v22, 16  ;;  %v4592_v35 = vshll.u32 %v4527_v26, 16  ;;  %v4590_v22 = vshrl.u32 %v4527_v26, 16  ;;  %v4535_v26 = vld [vmem:[#allocation2 + $0xe0] sm:$0xff] }
 0x49a   : > { %7296 = vmatprep.subr.bf16.mxu0 %v8104_v38 }
 0x49b   : > { %v4594_v51 = vrot.slane %v4592_v35, 1 }
 0x49d   : > { %7297 = vmatpush3.bf16.msra.mxu0 %v8104_v38  ;;  %v4571_v38 = vor.u32 %v4570_v29, %v4566_v8  ;;  %v4595_v13 = vor.u32 %v4594_v51, %v4590_v22  ;;  %v4628_v8 = vshll.u32 %v4533_v18, 16  ;;  %v4638_v18 = vshrl.u32 %v4535_v26, 16 }
 0x4a0   : > { %7267 = vmatmul.mubr.bf16.gmra.mrb[16].mxu0 %v8130_v33  ;;  %v4583_v33 = vor.u32 %v4582_v27, %v4578_v49  ;;  %v4611_v27 = vrot.slane %v4609_v4, 1  ;;  %v4534_v49 = vld [vmem:[#allocation2 + $0xd0] sm:$0x1]  ;;  %v4536_v4 = vld [vmem:[#allocation2 + $0xe8] sm:$0x1] }
 0x4a1   : > { %7270 = vmatprep.mubr.bf16.mxu0 %v8131_v39  ;;  %v4587_v39 = vrot.slane %v4585_v62, 1  ;;  %v4532_v62 = vld [vmem:[#allocation2 + $0xb8] sm:$0x1] }
 0x4a2   : > { %v4621_v35 = vshll.u32 %v4532_v62, 16 }
 0x4a3   : > { %v4588_v24 = vsel %vm2043_vm1, %v4583_v33, %v4587_v39  ;;  %v4630_v39 = vrot.slane %v4628_v8, 1  ;;  %v4541_v8 = vld [vmem:[#allocation2 + $0x128] sm:$0xff] }
 0x4a4   : > { %v4623_v51 = vrot.slane %v4621_v35, 1 }
 0x4a8   : > { %7271 = vmatmul.mubr.bf16.gmra.mrb[20].mxu0 %v8132_v34  ;;  %v4528_v34 = vld [vmem:[#allocation2 + $0x88] sm:$0x1] }
 0x4a9   : > { %7274 = vmatprep.mubr.bf16.mxu0 %v8133_v46  ;;  %v4604_v46 = vshll.u32 %v4529_v0, 16  ;;  %v4614_v0 = vshrl.u32 %v4531_v9, 16  ;;  %v4539_v9 = vld [vmem:[#allocation2 + $0x110] sm:$0xff] }
 0x4aa   : > { %v4664_v35 = vshll.u32 %v4539_v9, 16 }
 0x4ab   : > { %v4606_v3 = vrot.slane %v4604_v46, 1  ;;  %v4537_v46 = vld [vmem:[#allocation2 + $0xf8] sm:$0xff] }
 0x4ac   : > { %v4652_v22 = vshll.u32 %v4537_v46, 16 }
 0x4b0   : > { %7275 = vmatmul.mubr.bf16.gmra.mrb[24].mxu0 %v8134_v10  ;;  %v4576_v10 = vsel %vm2043_vm1, %v4571_v38, %v4575_v30  ;;  %v4618_v30 = vrot.slane %v4616_v5, 1  ;;  %v4645_v5 = vshll.u32 %v4536_v4, 16 }
 0x4b1   : > { %7278 = vmatprep.mubr.bf16.mxu0 %v8135_v2  ;;  %v4597_v2 = vshll.u32 %v4528_v34, 16  ;;  %v4633_v34 = vshll.u32 %v4534_v49, 16  ;;  %v4650_v49 = vshrl.u32 %v4537_v46, 16  ;;  %v4662_v46 = vshrl.u32 %v4539_v9, 16  ;;  %v4547_v9 = vld [vmem:[#allocation2 + $0x170] sm:$0xff] }
 0x4b3   : > { %v4599_v29 = vrot.slane %v4597_v2, 1  ;;  %v4640_v2 = vshll.u32 %v4535_v26, 16  ;;  %v4543_v26 = vld [vmem:[#allocation2 + $0x140] sm:$0xff] }
 0x4b5   : > { %v4600_v38 = vsel %vm2043_vm1, %v4595_v13, %v4599_v29  ;;  %v4642_v29 = vrot.slane %v4640_v2, 1 }
 0x4b8   : > { %7279 = vmatmul.mubr.bf16.gmra.mrb[28].mxu0 %v9798_v47  ;;  %v5062_v47 = vld [vmem:[#allocation8 + $0x20] sm:$0xff] }
 0x4b9   : > { %7298 = vmatprep.mubr.bf16.mxu0 %v4564_v20  ;;  %v4607_v20 = vor.u32 %v4606_v3, %v4602_v1  ;;  %v4635_v3 = vrot.slane %v4633_v34, 1  ;;  %v4538_v1 = vld [vmem:[#allocation2 + $0x100] sm:$0x1]  ;;  %v4540_v34 = vld [vmem:[#allocation2 + $0x118] sm:$0x1] }
 0x4ba   : > { %v4657_v62 = vshll.u32 %v4538_v1, 16  ;;  %v4669_v2 = vshll.u32 %v4540_v34, 16  ;;  %v4674_v1 = vshrl.u32 %v4541_v8, 16 }
 0x4bb   : > { %v4612_v33 = vsel %vm2043_vm1, %v4607_v20, %v4611_v27  ;;  %v4654_v27 = vrot.slane %v4652_v22, 1  ;;  %v4545_v22 = vld [vmem:[#allocation2 + $0x158] sm:$0xff] }
 0x4c0   : > { %7299 = vmatmul.mubr.bf16.vlgmr.msra.gmra.mrb[0].mxu0 %v4576_v10  ;;  %v4619_v10 = vor.u32 %v4618_v30, %v4614_v0  ;;  %v4647_v30 = vrot.slane %v4645_v5, 1  ;;  %v4676_v0 = vshll.u32 %v4541_v8, 16  ;;  %v4688_v5 = vshll.u32 %v4543_v26, 16 }
 0x4c1   : > { %7302 = vmatprep.mubr.bf16.mxu0 %v4588_v24  ;;  %v4631_v24 = vor.u32 %v4630_v39, %v4626_v25  ;;  %v4659_v39 = vrot.slane %v4657_v62, 1  ;;  %v4542_v25 = vld [vmem:[#allocation2 + $0x130] sm:$0x1]  ;;  %v4544_v62 = vld [vmem:[#allocation2 + $0x148] sm:$0x1]  ;;  %v4686_v8 = vshrl.u32 %v4543_v26, 16 }
 0x4c2   : > { %v4624_v13 = vsel %vm2043_vm1, %v4619_v10, %v4623_v51  ;;  %v4666_v51 = vrot.slane %v4664_v35, 1  ;;  %v4681_v4 = vshll.u32 %v4542_v25, 16  ;;  %v4693_v35 = vshll.u32 %v4544_v62, 16 }
 0x4c3   : > { %v4636_v20 = vsel %vm2043_vm1, %v4631_v24, %v4635_v3  ;;  %v4678_v3 = vrot.slane %v4676_v0, 1  ;;  %v4549_v0 = vld [vmem:[#allocation2 + $0x188] sm:$0xff]  ;;  %v4698_v25 = vshrl.u32 %v4545_v22, 16  ;;  %v4710_v26 = vshrl.u32 %v4547_v9, 16 }
 0x4c8   : > { %7303 = vmatmul.mubr.bf16.gmra.mrb[4].mxu0 %v4600_v38  ;;  %v4643_v38 = vor.u32 %v4642_v29, %v4638_v18  ;;  %v4671_v29 = vrot.slane %v4669_v2, 1  ;;  %v4700_v18 = vshll.u32 %v4545_v22, 16  ;;  %v4712_v2 = vshll.u32 %v4547_v9, 16 }
 0x4c9   : > { %7306 = vmatprep.mubr.bf16.mxu0 %v4612_v33  ;;  %v4655_v33 = vor.u32 %v4654_v27, %v4650_v49  ;;  %v4683_v27 = vrot.slane %v4681_v4, 1  ;;  %v4546_v49 = vld [vmem:[#allocation2 + $0x160] sm:$0x1]  ;;  %v4548_v4 = vld [vmem:[#allocation2 + $0x178] sm:$0x1]  ;;  %v4722_v22 = vshrl.u32 %v4549_v0, 16 }
 0x4ca   : > { %v4648_v10 = vsel %vm2043_vm1, %v4643_v38, %v4647_v30  ;;  %v4690_v30 = vrot.slane %v4688_v5, 1  ;;  %v4705_v34 = vshll.u32 %v4546_v49, 16  ;;  %v4717_v5 = vshll.u32 %v4548_v4, 16 }
 0x4cb   : > { %v4660_v24 = vsel %vm2043_vm1, %v4655_v33, %v4659_v39  ;;  %v4702_v39 = vrot.slane %v4700_v18, 1  ;;  %v4552_v18 = vld [vmem:[#allocation2 + $0x1a8] sm:$0x1] }
 0x4d0   : > { %7307 = vmatmul.mubr.bf16.gmra.mrb[8].mxu0 %v4624_v13  ;;  %v4667_v13 = vor.u32 %v4666_v51, %v4662_v46  ;;  %v4695_v51 = vrot.slane %v4693_v35, 1  ;;  %v4724_v46 = vshll.u32 %v4549_v0, 16 }
 0x4d1   : > { %7310 = vmatprep.mubr.bf16.mxu0 %v4636_v20  ;;  %v4679_v20 = vor.u32 %v4678_v3, %v4674_v1  ;;  %v4707_v3 = vrot.slane %v4705_v34, 1  ;;  %v4550_v1 = vld [vmem:[#allocation2 + $0x190] sm:$0x1] }
 0x4d2   : > { %v4672_v38 = vsel %vm2043_vm1, %v4667_v13, %v4671_v29  ;;  %v4714_v29 = vrot.slane %v4712_v2, 1  ;;  %v4729_v62 = vshll.u32 %v4550_v1, 16  ;;  %v5064_v1 = vld [vmem:[#allocation8 + $0x30] sm:$0xff] }
 0x4d3   : > { %v4684_v33 = vsel %vm2043_vm1, %v4679_v20, %v4683_v27  ;;  %v4726_v27 = vrot.slane %v4724_v46, 1 }
 0x4d4   : > { %v4715_v49 = vor.u32 %v4714_v29, %v4710_v26  ;;  %v4731_v35 = vrot.slane %v4729_v62, 1  ;;  %v5068_v62 = vld [vmem:[#allocation8 + $0x50] sm:$0xff]  ;;  %v5069_v26 = vld [vmem:[#allocation8 + $0x58] sm:$0xff] }
 0x4d8   : > { %7311 = vmatmul.mubr.bf16.gmra.mrb[12].mxu0 %v4648_v10  ;;  %v4691_v10 = vor.u32 %v4690_v30, %v4686_v8  ;;  %v4727_v30 = vor.u32 %v4726_v27, %v4722_v22  ;;  %v5070_v22 = vld [vmem:[#allocation8 + $0x60] sm:$0xff] }
 0x4d9   : > { %7314 = vmatprep.mubr.bf16.mxu0 %v4660_v24  ;;  %v4703_v24 = vor.u32 %v4702_v39, %v4698_v25  ;;  %v4741_v39 = vshll.u32 %v4552_v18, 16  ;;  %v9886_v18 = vpack.c.bf16 %v5069_v26, %v5068_v62 }
 0x4da   : > { %v4696_v13 = vsel %vm2043_vm1, %v4691_v10, %v4695_v51  ;;  %v4732_v8 = vsel %vm2043_vm1, %v4727_v30, %v4731_v35  ;;  %v5058_v10 = vld [vmem:[#allocation8] sm:$0xff]  ;;  %v5059_v51 = vld [vmem:[#allocation8 + $0x8] sm:$0xff]  ;;  %v5072_v30 = vld [vmem:[#allocation8 + $0x70] sm:$0xff] }
 0x4db   : > { %v4708_v20 = vsel %vm2043_vm1, %v4703_v24, %v4707_v3  ;;  %v4743_v9 = vrot.slane %v4741_v39, 1  ;;  %v9866_v2 = vpack.c.bf16 %v5059_v51, %v5058_v10  ;;  %v5060_v24 = vld [vmem:[#allocation8 + $0x10] sm:$0xff]  ;;  %v5061_v3 = vld [vmem:[#allocation8 + $0x18] sm:$0xff] }
 0x4dc   : > { %v9870_v4 = vpack.c.bf16 %v5061_v3, %v5060_v24  ;;  %v5073_v35 = vld [vmem:[#allocation8 + $0x78] sm:$0xff] }
 0x4dd   : > { %7568 = vmatpush3.bf16.msra.mxu1 %v9866_v2 }
 0x4e0   : > { %7315 = vmatmul.mubr.bf16.gmra.mrb[16].mxu0 %v4672_v38  ;;  %v4719_v38 = vrot.slane %v4717_v5, 1  ;;  %v5066_v5 = vld [vmem:[#allocation8 + $0x40] sm:$0xff] }
 0x4e1   : > { %7318 = vmatprep.mubr.bf16.mxu0 %v4684_v33  ;;  %v4738_v33 = vrot.slane %v3985_v6, 1  ;;  %v11022_v6 = vmov 0.0|0.0  }
 0x4e2   : > { %v4720_v34 = vsel %vm2043_vm1, %v4715_v49, %v4719_v38  ;;  %7569 = vmatprep.subr.bf16.mxu1 %v11022_v6  ;;  %v5071_v49 = vld [vmem:[#allocation8 + $0x68] sm:$0xff] }
 0x4e3   : > { %v4739_v25 = vor.u32 %v4738_v33, %v3982_v17  ;;  %7571 = vmatpush3.bf16.msra.mxu1 %v9870_v4  ;;  %v5063_v17 = vld [vmem:[#allocation8 + $0x28] sm:$0xff]  ;;  %v9889_v38 = vpack.c.bf16 %v5071_v49, %v5070_v22  ;;  %v9893_v33 = vpack.c.bf16 %v5073_v35, %v5072_v30 }
 0x4e4   : > { %7572 = vmatprep.subr.bf16.mxu1 %v11022_v6  ;;  %v9874_v46 = vpack.c.bf16 %v5063_v17, %v5062_v47 }
 0x4e5   : > { %v4744_v0 = vsel %vm2043_vm1, %v4739_v25, %v4743_v9 }
 0x4e7   : > { %7574 = vmatpush3.bf16.msra.mxu1 %v9874_v46 }
 0x4e8   : > { %7319 = vmatmul.mubr.bf16.gmra.mrb[20].mxu0 %v4696_v13  ;;  %7575 = vmatprep.subr.bf16.mxu1 %v11022_v6  ;;  %v5065_v13 = vld [vmem:[#allocation8 + $0x38] sm:$0xff] }
 0x4e9   : > { %7322 = vmatprep.mubr.bf16.mxu0 %v4708_v20  ;;  %v9878_v29 = vpack.c.bf16 %v5065_v13, %v5064_v1  ;;  %v5067_v20 = vld [vmem:[#allocation8 + $0x48] sm:$0xff] }
 0x4ea   : > { %v9882_v27 = vpack.c.bf16 %v5067_v20, %v5066_v5 }
 0x4eb   : > { %7577 = vmatpush3.bf16.msra.mxu1 %v9878_v29 }
 0x4ec   : > { %7578 = vmatprep.subr.bf16.mxu1 %v11022_v6 }
 0x4ef   : > { %7580 = vmatpush3.bf16.msra.mxu1 %v9882_v27 }
 0x4f0   : > { %7323 = vmatmul.mubr.bf16.gmra.mrb[24].mxu0 %v4720_v34  ;;  %7581 = vmatprep.subr.bf16.mxu1 %v11022_v6 }
 0x4f1   : > { %7326 = vmatprep.mubr.bf16.mxu0 %v4732_v8  ;;  %v9902_v8 = vld [vmem:[%s11023_s17] ss:$0 sm:$0xff]  ;;  %s11028_s17 = sld [smem:[#allocation30_spill]] }
 0x4f3   : > { %7583 = vmatpush3.bf16.msra.mxu1 %v9886_v18 }
 0x4f4   : > { %7584 = vmatprep.subr.bf16.mxu1 %v11022_v6 }
 0x4f7   : > { %7586 = vmatpush3.bf16.msra.mxu1 %v9889_v38 }
 0x4f8   : > { %7327 = vmatmul.mubr.bf16.gmra.mrb[28].mxu0 %v4744_v0  ;;  %7587 = vmatprep.subr.bf16.mxu1 %v11022_v6 }
 0x4fb   : > { %7589 = vmatpush3.bf16.msra.mxu1 %v9893_v33 }
 0x4fc   : > { %7590 = vmatprep.subr.bf16.mxu1 %v11022_v6 }
 0x593   : > { %v7300_v39 = vpop.f32.mrb[0].mxu0 }
 0x594   : > { %v7662_v34 = vadd.f32 %v7300_v39, %v9750_v14  ;;  %v4860_v25 = vpop.f32.mrb[1].mxu0 }
 0x595   : > { %v7663_v9 = vadd.f32 %v4860_v25, %v9752_v48  ;;  %v7301_v0 = vpop.f32.mrb[2].mxu0 }
 0x596   : > { %v7664_v10 = vadd.f32 %v7301_v0, %v9754_v7  ;;  %v4863_v51 = vpop.f32.mrb[3].mxu0  ;;  %v9911_v47 = vadd.f32 %v7662_v34, %v9902_v8 }
 0x597   : > { %v9907_v24 = vadd.f32 %v7663_v9, %v9902_v8  ;;  %v7665_v3 = vadd.f32 %v4863_v51, %v9756_v54 }
 0x598   : > { %v9917_v17 = vadd.f32 %v7664_v10, %v9902_v8  ;;  %v5116_v20 = vmul.f32 %v9911_v47, %v9911_v47 }
 0x599   : > { %v9914_v14 = vadd.f32 %v7665_v3, %v9902_v8  ;;  %v5114_v48 = vmul.f32 %v9907_v24, %v9907_v24 }
 0x59a   : > { %v5117_v30 = vmul.f32 %v9917_v17, %v9917_v17 }
 0x59b   : > { %v5076_v7 = vadd.f32 %v9914_v14, %v9907_v24  ;;  %v5115_v1 = vmul.f32 %v9914_v14, %v9914_v14  ;;  %v7304_v13 = vpop.f32.mrb[4].mxu0 }
 0x59c   : > { %v7666_v54 = vadd.f32 %v7304_v13, %v9762_v57  ;;  %v4876_v5 = vpop.f32.mrb[5].mxu0 }
 0x59d   : > { %v5077_v62 = vadd.f32 %v5076_v7, %v9911_v47  ;;  %v5146_v26 = vadd.f32 %v5115_v1, %v5114_v48  ;;  %v7667_v22 = vadd.f32 %v4876_v5, %v9764_v11  ;;  %v7305_v49 = vpop.f32.mrb[6].mxu0 }
 0x59e   : > { %v7668_v35 = vadd.f32 %v7305_v49, %v9766_v43  ;;  %v4879_v39 = vpop.f32.mrb[7].mxu0  ;;  %v9939_v0 = vadd.f32 %v7666_v54, %v9902_v8 }
 0x59f   : > { %v5147_v34 = vadd.f32 %v5146_v26, %v5116_v20  ;;  %v9934_v25 = vadd.f32 %v7667_v22, %v9902_v8  ;;  %v5078_v57 = vadd.f32 %v5077_v62, %v9917_v17  ;;  %v7669_v9 = vadd.f32 %v4879_v39, %v9768_v19 }
 0x5a0   : > { %v9948_v3 = vadd.f32 %v7668_v35, %v9902_v8  ;;  %v5120_v5 = vmul.f32 %v9939_v0, %v9939_v0 }
 0x5a1   : > { %v5079_v11 = vadd.f32 %v5078_v57, %v9934_v25  ;;  %v5118_v10 = vmul.f32 %v9934_v25, %v9934_v25  ;;  %v5148_v51 = vadd.f32 %v5147_v34, %v5117_v30  ;;  %v9945_v43 = vadd.f32 %v7669_v9, %v9902_v8 }
 0x5a2   : > { %v5121_v49 = vmul.f32 %v9948_v3, %v9948_v3 }
 0x5a3   : > { %v5149_v48 = vadd.f32 %v5148_v51, %v5118_v10  ;;  %v5080_v7 = vadd.f32 %v5079_v11, %v9945_v43  ;;  %v5119_v19 = vmul.f32 %v9945_v43, %v9945_v43  ;;  %v7308_v1 = vpop.f32.mrb[8].mxu0 }
 0x5a4   : > { %v7670_v13 = vadd.f32 %v7308_v1, %v9774_v32  ;;  %v4892_v54 = vpop.f32.mrb[9].mxu0 }
 0x5a5   : > { %v5081_v20 = vadd.f32 %v5080_v7, %v9939_v0  ;;  %v5150_v62 = vadd.f32 %v5149_v48, %v5119_v19  ;;  %v7671_v26 = vadd.f32 %v4892_v54, %v9776_v59  ;;  %v7309_v22 = vpop.f32.mrb[10].mxu0 }
 0x5a6   : > { %v7672_v30 = vadd.f32 %v7309_v22, %v9778_v15  ;;  %v4895_v35 = vpop.f32.mrb[11].mxu0  ;;  %v9967_v9 = vadd.f32 %v7670_v13, %v9902_v8 }
 0x5a7   : > { %v5151_v39 = vadd.f32 %v5150_v62, %v5120_v5  ;;  %v9962_v34 = vadd.f32 %v7671_v26, %v9902_v8  ;;  %v5082_v32 = vadd.f32 %v5081_v20, %v9948_v3  ;;  %v7673_v57 = vadd.f32 %v4895_v35, %v9780_v23 }
 0x5a8   : > { %v9976_v51 = vadd.f32 %v7672_v30, %v9902_v8  ;;  %v5124_v54 = vmul.f32 %v9967_v9, %v9967_v9 }
 0x5a9   : > { %v5083_v59 = vadd.f32 %v5082_v32, %v9962_v34  ;;  %v5122_v11 = vmul.f32 %v9962_v34, %v9962_v34  ;;  %v5152_v10 = vadd.f32 %v5151_v39, %v5121_v49  ;;  %v9973_v15 = vadd.f32 %v7673_v57, %v9902_v8 }
 0x5aa   : > { %v5125_v22 = vmul.f32 %v9976_v51, %v9976_v51 }
 0x5ab   : > { %v5153_v48 = vadd.f32 %v5152_v10, %v5122_v11  ;;  %v5084_v7 = vadd.f32 %v5083_v59, %v9973_v15  ;;  %v5123_v23 = vmul.f32 %v9973_v15, %v9973_v15  ;;  %v7312_v19 = vpop.f32.mrb[12].mxu0 }
 0x5ac   : > { %v7674_v1 = vadd.f32 %v7312_v19, %v9786_v42  ;;  %v4908_v13 = vpop.f32.mrb[13].mxu0 }
 0x5ad   : > { %v5085_v5 = vadd.f32 %v5084_v7, %v9967_v9  ;;  %v5154_v20 = vadd.f32 %v5153_v48, %v5123_v23  ;;  %v7675_v62 = vadd.f32 %v4908_v13, %v9788_v58  ;;  %v7313_v26 = vpop.f32.mrb[14].mxu0 }
 0x5ae   : > { %v7676_v49 = vadd.f32 %v7313_v26, %v9790_v21  ;;  %v4911_v30 = vpop.f32.mrb[15].mxu0  ;;  %v9995_v57 = vadd.f32 %v7674_v1, %v9902_v8 }
 0x5af   : > { %v5155_v35 = vadd.f32 %v5154_v20, %v5124_v54  ;;  %v9990_v39 = vadd.f32 %v7675_v62, %v9902_v8  ;;  %v5086_v42 = vadd.f32 %v5085_v5, %v9976_v51  ;;  %v7677_v32 = vadd.f32 %v4911_v30, %v9792_v31 }
 0x5b0   : > { %v10004_v10 = vadd.f32 %v7676_v49, %v9902_v8  ;;  %v5128_v13 = vmul.f32 %v9995_v57, %v9995_v57 }
 0x5b1   : > { %v5087_v58 = vadd.f32 %v5086_v42, %v9990_v39  ;;  %v5126_v59 = vmul.f32 %v9990_v39, %v9990_v39  ;;  %v5156_v11 = vadd.f32 %v5155_v35, %v5125_v22  ;;  %v10001_v21 = vadd.f32 %v7677_v32, %v9902_v8 }
 0x5b2   : > { %v5129_v26 = vmul.f32 %v10004_v10, %v10004_v10 }
 0x5b3   : > { %v5157_v48 = vadd.f32 %v5156_v11, %v5126_v59  ;;  %v5088_v7 = vadd.f32 %v5087_v58, %v10001_v21  ;;  %v5127_v31 = vmul.f32 %v10001_v21, %v10001_v21  ;;  %v7316_v23 = vpop.f32.mrb[16].mxu0 }
 0x5b4   : > { %v7678_v19 = vadd.f32 %v7316_v23, %v9801_v40  ;;  %v4924_v1 = vpop.f32.mrb[17].mxu0 }
 0x5b5   : > { %v5089_v54 = vadd.f32 %v5088_v7, %v9995_v57  ;;  %v5158_v5 = vadd.f32 %v5157_v48, %v5127_v31  ;;  %v7679_v20 = vadd.f32 %v4924_v1, %v9803_v12  ;;  %v7317_v62 = vpop.f32.mrb[18].mxu0 }
 0x5b6   : > { %v7680_v22 = vadd.f32 %v7317_v62, %v9805_v50  ;;  %v4927_v49 = vpop.f32.mrb[19].mxu0  ;;  %v10023_v32 = vadd.f32 %v7678_v19, %v9902_v8 }
 0x5b7   : > { %v5159_v30 = vadd.f32 %v5158_v5, %v5128_v13  ;;  %v10018_v35 = vadd.f32 %v7679_v20, %v9902_v8  ;;  %v5090_v40 = vadd.f32 %v5089_v54, %v10004_v10  ;;  %v7681_v42 = vadd.f32 %v4927_v49, %v9807_v41 }
 0x5b8   : > { %v10032_v11 = vadd.f32 %v7680_v22, %v9902_v8  ;;  %v5132_v1 = vmul.f32 %v10023_v32, %v10023_v32 }
 0x5b9   : > { %v5091_v12 = vadd.f32 %v5090_v40, %v10018_v35  ;;  %v5130_v58 = vmul.f32 %v10018_v35, %v10018_v35  ;;  %v5160_v59 = vadd.f32 %v5159_v30, %v5129_v26  ;;  %v10029_v50 = vadd.f32 %v7681_v42, %v9902_v8 }
 0x5ba   : > { %v5133_v62 = vmul.f32 %v10032_v11, %v10032_v11 }
 0x5bb   : > { %v5161_v48 = vadd.f32 %v5160_v59, %v5130_v58  ;;  %v5092_v7 = vadd.f32 %v5091_v12, %v10029_v50  ;;  %v5131_v41 = vmul.f32 %v10029_v50, %v10029_v50  ;;  %v7320_v31 = vpop.f32.mrb[20].mxu0 }
 0x5bc   : > { %v7682_v23 = vadd.f32 %v7320_v31, %v9818_v53  ;;  %v4940_v19 = vpop.f32.mrb[21].mxu0 }
 0x5bd   : > { %v5093_v13 = vadd.f32 %v5092_v7, %v10023_v32  ;;  %v5162_v54 = vadd.f32 %v5161_v48, %v5131_v41  ;;  %v7683_v5 = vadd.f32 %v4940_v19, %v9820_v56  ;;  %v7321_v20 = vpop.f32.mrb[22].mxu0 }
 0x5be   : > { %v7684_v26 = vadd.f32 %v7321_v20, %v9822_v60  ;;  %v4943_v22 = vpop.f32.mrb[23].mxu0  ;;  %v10051_v42 = vadd.f32 %v7682_v23, %v9902_v8 }
 0x5bf   : > { %v5163_v49 = vadd.f32 %v5162_v54, %v5132_v1  ;;  %v10046_v30 = vadd.f32 %v7683_v5, %v9902_v8  ;;  %v5094_v53 = vadd.f32 %v5093_v13, %v10032_v11  ;;  %v7685_v40 = vadd.f32 %v4943_v22, %v9824_v61 }
 0x5c0   : > { %v10060_v59 = vadd.f32 %v7684_v26, %v9902_v8  ;;  %v5136_v19 = vmul.f32 %v10051_v42, %v10051_v42 }
 0x5c1   : > { %v5095_v56 = vadd.f32 %v5094_v53, %v10046_v30  ;;  %v5134_v12 = vmul.f32 %v10046_v30, %v10046_v30  ;;  %v5164_v58 = vadd.f32 %v5163_v49, %v5133_v62  ;;  %v10057_v60 = vadd.f32 %v7685_v40, %v9902_v8 }
 0x5c2   : > { %v5137_v20 = vmul.f32 %v10060_v59, %v10060_v59 }
 0x5c3   : > { %v5165_v48 = vadd.f32 %v5164_v58, %v5134_v12  ;;  %v5096_v7 = vadd.f32 %v5095_v56, %v10057_v60  ;;  %v5135_v61 = vmul.f32 %v10057_v60, %v10057_v60  ;;  %v7324_v41 = vpop.f32.mrb[24].mxu0 }
 0x5c4   : > { %v7686_v31 = vadd.f32 %v7324_v41, %v9828_v45  ;;  %v4956_v23 = vpop.f32.mrb[25].mxu0 }
 0x5c5   : > { %v5097_v1 = vadd.f32 %v5096_v7, %v10051_v42  ;;  %v5166_v13 = vadd.f32 %v5165_v48, %v5135_v61  ;;  %v7687_v54 = vadd.f32 %v4956_v23, %v9830_v52  ;;  %v7325_v5 = vpop.f32.mrb[26].mxu0 }
 0x5c6   : > { %v7688_v62 = vadd.f32 %v7325_v5, %v9832_v55  ;;  %v4959_v26 = vpop.f32.mrb[27].mxu0  ;;  %v10085_v55 = vadd.f32 %v7686_v31, %v9902_v8 }
 0x5c7   : > { %v5167_v22 = vadd.f32 %v5166_v13, %v5136_v19  ;;  %v10074_v49 = vadd.f32 %v7687_v54, %v9902_v8  ;;  %v5098_v45 = vadd.f32 %v5097_v1, %v10060_v59  ;;  %v7689_v53 = vadd.f32 %v4959_v26, %v9834_v28 }
 0x5c8   : > { %v10089_v7 = vadd.f32 %v7688_v62, %v9902_v8 }
 0x5c9   : > { %v5099_v40 = vadd.f32 %v5098_v45, %v10074_v49  ;;  %v5138_v52 = vmul.f32 %v10074_v49, %v10074_v49  ;;  %v5168_v56 = vadd.f32 %v5167_v22, %v5137_v20  ;;  %v10082_v12 = vadd.f32 %v7689_v53, %v9902_v8 }
 0x5cb   : > { %v5100_v58 = vadd.f32 %v5099_v40, %v10082_v12  ;;  %v7328_v48 = vpop.f32.mrb[28].mxu0  ;;  %v5169_v41 = vadd.f32 %v5168_v56, %v5138_v52  ;;  %v5139_v19 = vmul.f32 %v10082_v12, %v10082_v12  ;;  %v5141_v52 = vmul.f32 %v10089_v7, %v10089_v7 }
 0x5cc   : > { %v7690_v28 = vadd.f32 %v7328_v48, %v9836_v36  ;;  %v4972_v61 = vpop.f32.mrb[29].mxu0 }
 0x5cd   : > { %v5101_v23 = vadd.f32 %v5100_v58, %v10085_v55  ;;  %v7691_v1 = vadd.f32 %v4972_v61, %v9838_v63  ;;  %v7329_v13 = vpop.f32.mrb[30].mxu0  ;;  %v5170_v62 = vadd.f32 %v5169_v41, %v5139_v19  ;;  %v5140_v63 = vmul.f32 %v10085_v55, %v10085_v55 }
 0x5ce   : > { %v7692_v31 = vadd.f32 %v7329_v13, %v9840_v16  ;;  %v4975_v54 = vpop.f32.mrb[31].mxu0  ;;  %v10109_v45 = vadd.f32 %v7690_v28, %v9902_v8 }
 0x5cf   : > { %v10098_v5 = vadd.f32 %v7691_v1, %v9902_v8  ;;  %v5102_v20 = vadd.f32 %v5101_v23, %v10089_v7  ;;  %v7693_v36 = vadd.f32 %v4975_v54, %v9842_v37  ;;  %v5171_v53 = vadd.f32 %v5170_v62, %v5140_v63 }
 0x5d0   : > { %v10113_v40 = vadd.f32 %v7692_v31, %v9902_v8  ;;  %v5144_v31 = vmul.f32 %v10109_v45, %v10109_v45 }
 0x5d1   : > { %v5103_v26 = vadd.f32 %v5102_v20, %v10098_v5  ;;  %v10104_v22 = vadd.f32 %v7693_v36, %v9902_v8  ;;  %v5142_v58 = vmul.f32 %v10098_v5, %v10098_v5  ;;  %v5172_v48 = vadd.f32 %v5171_v53, %v5141_v52  ;;  %v8106_v52 = vld [vmem:[#allocation11 + $0x8] sm:$0xff]  }
 0x5d2   : > { %v5145_v62 = vmul.f32 %v10113_v40, %v10113_v40 }
 0x5d3   : > { %v5104_v16 = vadd.f32 %v5103_v26, %v10104_v22  ;;  %v5173_v41 = vadd.f32 %v5172_v48, %v5142_v58  ;;  %v5143_v19 = vmul.f32 %v10104_v22, %v10104_v22  ;;  %v8112_v58 = vld [vmem:[#allocation11 + $0x38] sm:$0xff]  }
 0x5d5   : > { %v5105_v37 = vadd.f32 %v5104_v16, %v10109_v45  ;;  %v5174_v1 = vadd.f32 %v5173_v41, %v5143_v19 }
 0x5d7   : > { %v5106_v56 = vadd.f32 %v5105_v37, %v10113_v40  ;;  %v5175_v20 = vadd.f32 %v5174_v1, %v5144_v31  ;;  %v8105_v37 = vld [vmem:[#allocation11] sm:$0xff]  }
 0x5d9   : > { %v5107_v61 = vrot.slane %v5106_v56, 4  ;;  %v5176_v26 = vadd.f32 %v5175_v20, %v5145_v62  ;;  %v5075_v20 = vld [vmem:[%s11025_s7] sm:$0x1]  ;;  %v11026_v62 = vld [vmem:[#allocation20_spill] sm:$0xff]  ;;  %s11030_s7 = sld [smem:[#allocation32_spill]] }
 0x5db   : > { %v5108_v28 = vadd.f32 %v5107_v61, %v5106_v56  ;;  %v5177_v63 = vrot.slane %v5176_v26, 4  ;;  %v8109_v56 = vld [vmem:[#allocation11 + $0x20] sm:$0xff]  }
 0x5dd   : > { %v5109_v23 = vrot.slane %v5108_v28, 2  ;;  %v5178_v16 = vadd.f32 %v5177_v63, %v5176_v26 }
 0x5df   : > { %v5110_v8 = vadd.f32 %v5109_v23, %v5108_v28 }
 0x5e1   : > { %v5111_v13 = vrot.slane %v5110_v8, 1 }
 0x5e3   : > { %v5112_v54 = vadd.f32 %v5111_v13, %v5110_v8  ;;  %v5074_v13 = vld [vmem:[%s11024_s16] sm:$0x1]  ;;  %s11029_s16 = sld [smem:[#allocation31_spill]] }
 0x5e5   : > { %v5113_v36 = vmul.f32 0.00390625, %v5112_v54 }
 0x5e7   : > { %7363 = vmatmul.mubr.f32.vlgmr.msra.gmra.mrb[68].mxu1 %v5113_v36 }
 0x5e8   : > { %7592 = vmatpush3.bf16.msra.mxu1 %v9866_v2  ;;  %7397 = vmatprep.mubr.msk.f32.mxu1 %vm8429_vm0, %v11017_v44  ;;  %v5179_v2 = vrot.slane %v5178_v16, 2 }
 0x5e9   : > { %7593 = vmatprep.subr.bf16.mxu1 %v11022_v6 }
 0x5ea   : > { %v5180_v53 = vadd.f32 %v5179_v2, %v5178_v16 }
 0x5ec   : > { %7595 = vmatpush3.bf16.msra.mxu1 %v9870_v4  ;;  %v5181_v4 = vrot.slane %v5180_v53, 1 }
 0x5ed   : > { %7596 = vmatprep.subr.bf16.mxu1 %v11022_v6 }
 0x5f0   : > { %7598 = vmatpush3.bf16.msra.mxu1 %v9874_v46  ;;  %v5182_v46 = vadd.f32 %v5181_v4, %v5180_v53 }
 0x5f1   : > { %7599 = vmatprep.subr.bf16.mxu1 %v11022_v6 }
 0x5f4   : > { %7601 = vmatpush3.bf16.msra.mxu1 %v9878_v29  ;;  %v5183_v29 = vmul.f32 0.00390625, %v5182_v46 }
 0x5f5   : > { %7602 = vmatprep.subr.bf16.mxu1 %v11022_v6 }
 0x5f8   : > { %7604 = vmatpush3.bf16.msra.mxu1 %v9882_v27  ;;  %v8107_v27 = vld [vmem:[#allocation11 + $0x10] sm:$0xff]  }
 0x5f9   : > { %7605 = vmatprep.subr.bf16.mxu1 %v11022_v6 }
 0x5fc   : > { %7607 = vmatpush3.bf16.msra.mxu1 %v9886_v18  ;;  %v8108_v18 = vld [vmem:[#allocation11 + $0x18] sm:$0xff]  }
 0x5fd   : > { %7608 = vmatprep.subr.bf16.mxu1 %v11022_v6 }
 0x600   : > { %7610 = vmatpush3.bf16.msra.mxu1 %v9889_v38  ;;  %v8110_v38 = vld [vmem:[#allocation11 + $0x28] sm:$0xff]  }
 0x601   : > { %7611 = vmatprep.subr.bf16.mxu1 %v11022_v6 }
 0x604   : > { %7613 = vmatpush3.bf16.msra.mxu1 %v9893_v33  ;;  %v8111_v33 = vld [vmem:[#allocation11 + $0x30] sm:$0xff]  }
 0x605   : > { %7400 = vmatprep.subr.bf16.mxu1 %v8105_v37 }
 0x607   : > { %7398 = vmatmul.mubr.f32.vlgmr.msra.gmra.mrb[70].mxu1 %v5183_v29 }
 0x608   : > { %7401 = vmatpush3.bf16.msra.mxu1 %v8105_v37 }
 0x609   : > { %7402 = vmatprep.subr.bf16.mxu1 %v8106_v52 }
 0x60c   : > { %7403 = vmatpush3.bf16.msra.mxu1 %v8106_v52 }
 0x60d   : > { %7404 = vmatprep.subr.bf16.mxu1 %v8107_v27 }
 0x610   : > { %7405 = vmatpush3.bf16.msra.mxu1 %v8107_v27 }
 0x611   : > { %7406 = vmatprep.subr.bf16.mxu1 %v8108_v18 }
 0x614   : > { %7407 = vmatpush3.bf16.msra.mxu1 %v8108_v18 }
 0x615   : > { %7408 = vmatprep.subr.bf16.mxu1 %v8109_v56 }
 0x618   : > { %7409 = vmatpush3.bf16.msra.mxu1 %v8109_v56 }
 0x619   : > { %7410 = vmatprep.subr.bf16.mxu1 %v8110_v38 }
 0x61c   : > { %7411 = vmatpush3.bf16.msra.mxu1 %v8110_v38 }
 0x61d   : > { %7412 = vmatprep.subr.bf16.mxu1 %v8111_v33 }
 0x620   : > { %7413 = vmatpush3.bf16.msra.mxu1 %v8111_v33 }
 0x621   : > { %7414 = vmatprep.subr.bf16.mxu1 %v8112_v58 }
 0x624   : > { %7415 = vmatpush3.bf16.msra.mxu1 %v8112_v58 }
 0x625   : > { %7614 = vmatprep.subr.bf16.mxu1 %v11022_v6 }
 0x6ba   : > { %v5250_v48 = vpop.f32.mrb[68].mxu1 }
 0x6bb   : > { %v7364_v61 = vpop.f32.mrb[69].mxu1  ;;  %v5324_v28 = vmul.f32 %v5250_v48, %v5250_v48 }
 0x6da   : > { %v5320_v41 = vpop.f32.mrb[70].mxu1 }
 0x6db   : > { %v5325_v23 = vsub.f32 %v5320_v41, %v5324_v28  ;;  %v7399_v19 = vpop.f32.mrb[71].mxu1 }
 0x6dd   : > { %v5326_v8 = vmax.f32 %v5325_v23, 0.0 }
 0x6df   : > { %v5327_v1 = vadd.f32 1e-05, %v5326_v8 }
 0x6e1   : > { %8115 = vrsqrt.f32 %v5327_v1 }
 0x6eb   : > { %v8116_v31 = vpop.eup %8115 }
 0x6ec   : > { %v5329_v54 = vmul.f32 %v8116_v31, %v5074_v13 }
 0x6ee   : > { %v5330_v36 = vmul.f32 %v5329_v54, %v5250_v48  ;;  %v5335_v26 = vrot.slane %v5329_v54, %v11026_v62 }
 0x6f0   : > { %v5331_v63 = vsub.f32 %v5075_v20, %v5330_v36  ;;  %v5336_v16 = vmul.f32 %v5335_v26, %v9907_v24  ;;  %v5337_v2 = vmul.f32 %v5335_v26, %v9914_v14  ;;  %v5338_v53 = vmul.f32 %v5335_v26, %v9911_v47 }
 0x6f1   : > { %v5339_v4 = vmul.f32 %v5335_v26, %v9917_v17  ;;  %v5340_v46 = vmul.f32 %v5335_v26, %v9934_v25  ;;  %v5341_v29 = vmul.f32 %v5335_v26, %v9945_v43  ;;  %v5342_v37 = vmul.f32 %v5335_v26, %v9939_v0 }
 0x6f2   : > { %v10160_v52 = vrot.slane %v5331_v63, %v11026_v62  ;;  %v5343_v27 = vmul.f32 %v5335_v26, %v9948_v3  ;;  %v5344_v18 = vmul.f32 %v5335_v26, %v9962_v34  ;;  %v5345_v24 = vmul.f32 %v5335_v26, %v9973_v15 }
 0x6f3   : > { %v5346_v14 = vmul.f32 %v5335_v26, %v9967_v9  ;;  %v5347_v47 = vmul.f32 %v5335_v26, %v9976_v51  ;;  %v5348_v17 = vmul.f32 %v5335_v26, %v9990_v39  ;;  %v5349_v25 = vmul.f32 %v5335_v26, %v10001_v21 }
 0x6f4   : > { %v5350_v43 = vmul.f32 %v5335_v26, %v9995_v57  ;;  %v5351_v0 = vmul.f32 %v5335_v26, %v10004_v10  ;;  %v5352_v56 = vmul.f32 %v5335_v26, %v10018_v35  ;;  %v5353_v3 = vmul.f32 %v5335_v26, %v10029_v50 }
 0x6f5   : > { %v5354_v34 = vmul.f32 %v5335_v26, %v10023_v32  ;;  %v5355_v15 = vmul.f32 %v5335_v26, %v10032_v11  ;;  %v5356_v9 = vmul.f32 %v5335_v26, %v10046_v30  ;;  %v5357_v51 = vmul.f32 %v5335_v26, %v10057_v60 }
 0x6f6   : > { %v5358_v39 = vmul.f32 %v5335_v26, %v10051_v42  ;;  %v10179_v21 = vmul.f32 %v5335_v26, %v10060_v59  ;;  %v10182_v57 = vmul.f32 %v5335_v26, %v10074_v49  ;;  %v10185_v10 = vmul.f32 %v5335_v26, %v10082_v12 }
 0x6f7   : > { %v10188_v35 = vmul.f32 %v5335_v26, %v10085_v55  ;;  %v10191_v32 = vmul.f32 %v5335_v26, %v10089_v7  ;;  %v10194_v50 = vmul.f32 %v5335_v26, %v10098_v5  ;;  %v10197_v11 = vmul.f32 %v5335_v26, %v10104_v22 }
 0x6f8   : > { %v10200_v30 = vmul.f32 %v5335_v26, %v10109_v45  ;;  %v10203_v42 = vmul.f32 %v5335_v26, %v10113_v40  ;;  %v5376_v60 = vadd.f32 %v10160_v52, %v5338_v53  ;;  %v5377_v59 = vadd.f32 %v10160_v52, %v5339_v4 }
 0x6f9   : > { %v5374_v49 = vadd.f32 %v10160_v52, %v5336_v16  ;;  %v5375_v12 = vadd.f32 %v10160_v52, %v5337_v2  ;;  %v5378_v55 = vadd.f32 %v10160_v52, %v5340_v46  ;;  %v5379_v7 = vadd.f32 %v10160_v52, %v5341_v29 }
 0x6fa   : > { %v5408_v5 = vmax.f32 %v5376_v60, 0.0  ;;  %v5409_v22 = vmax.f32 %v5377_v59, 0.0  ;;  %v5380_v45 = vadd.f32 %v10160_v52, %v5342_v37  ;;  %v5381_v38 = vadd.f32 %v10160_v52, %v5343_v27 }
 0x6fb   : > { %v5406_v40 = vmax.f32 %v5374_v49, 0.0  ;;  %v5407_v33 = vmax.f32 %v5375_v12, 0.0  ;;  %v5410_v58 = vmax.f32 %v5378_v55, 0.0  ;;  %v5411_v48 = vmax.f32 %v5379_v7, 0.0 }
 0x6fc   : > { %v5439_v61 = vpack.c.bf16 %v5409_v22, %v5408_v5  ;;  %v5412_v28 = vmax.f32 %v5380_v45, 0.0  ;;  %v5413_v41 = vmax.f32 %v5381_v38, 0.0  ;;  %v5382_v23 = vadd.f32 %v10160_v52, %v5344_v18 }
 0x6fd   : > { %v5438_v19 = vpack.c.bf16 %v5407_v33, %v5406_v40  ;;  %v5440_v8 = vpack.c.bf16 %v5411_v48, %v5410_v58  ;;  %v5383_v1 = vadd.f32 %v10160_v52, %v5345_v24  ;;  %v5384_v13 = vadd.f32 %v10160_v52, %v5346_v14 }
 0x6fe   : > { %v5441_v31 = vpack.c.bf16 %v5413_v41, %v5412_v28  ;;  %v5414_v54 = vmax.f32 %v5382_v23, 0.0  ;;  %v5385_v20 = vadd.f32 %v10160_v52, %v5347_v47  ;;  %v5386_v36 = vadd.f32 %v10160_v52, %v5348_v17 }
 0x6ff   : > { %7416 = vmatprep.mubr.bf16.mxu1 %v5438_v19  ;;  %v5415_v26 = vmax.f32 %v5383_v1, 0.0  ;;  %v5416_v63 = vmax.f32 %v5384_v13, 0.0  ;;  %v5387_v16 = vadd.f32 %v10160_v52, %v5349_v25  ;;  %v5388_v2 = vadd.f32 %v10160_v52, %v5350_v43 }
 0x700   : > { %7417 = vmatmul.mubr.bf16.vlgmr.msra.gmra.mrb[72].mxu1 %v5439_v61  ;;  %v5417_v53 = vmax.f32 %v5385_v20, 0.0  ;;  %v5418_v4 = vmax.f32 %v5386_v36, 0.0  ;;  %v5389_v46 = vadd.f32 %v10160_v52, %v5351_v0  ;;  %v5390_v29 = vadd.f32 %v10160_v52, %v5352_v56  ;;  %v5690_v36 = vld [vmem:[#allocation12 + $0x20] sm:$0xff] }
 0x701   : > { %7420 = vmatprep.mubr.bf16.mxu1 %v5440_v8  ;;  %v5442_v37 = vpack.c.bf16 %v5415_v26, %v5414_v54  ;;  %v5419_v27 = vmax.f32 %v5387_v16, 0.0  ;;  %v5420_v18 = vmax.f32 %v5388_v2, 0.0  ;;  %v5391_v24 = vadd.f32 %v10160_v52, %v5353_v3  ;;  %v5689_v54 = vld [vmem:[#allocation12 + $0x18] sm:$0xff]  ;;  %v5691_v26 = vld [vmem:[#allocation12 + $0x28] sm:$0xff]  ;;  %v5692_v16 = vld [vmem:[#allocation12 + $0x30] sm:$0xff] }
 0x702   : > { %v5443_v14 = vpack.c.bf16 %v5417_v53, %v5416_v63  ;;  %v5421_v47 = vmax.f32 %v5389_v46, 0.0  ;;  %v5422_v17 = vmax.f32 %v5390_v29, 0.0  ;;  %v5392_v25 = vadd.f32 %v10160_v52, %v5354_v34  ;;  %v5693_v2 = vld [vmem:[#allocation12 + $0x38] sm:$0xff]  ;;  %v5695_v46 = vld [vmem:[#allocation12 + $0x48] sm:$0xff] }
 0x703   : > { %v5444_v60 = vpack.c.bf16 %v5419_v27, %v5418_v4  ;;  %v5423_v43 = vmax.f32 %v5391_v24, 0.0  ;;  %v5393_v59 = vadd.f32 %v10160_v52, %v5355_v15  ;;  %v5394_v49 = vadd.f32 %v10160_v52, %v5356_v9  ;;  %v5694_v4 = vld [vmem:[#allocation12 + $0x40] sm:$0xff]  ;;  %v5697_v27 = vld [vmem:[#allocation12 + $0x58] sm:$0xff] }
 0x704   : > { %v5445_v0 = vpack.c.bf16 %v5421_v47, %v5420_v18  ;;  %v5424_v12 = vmax.f32 %v5392_v25, 0.0  ;;  %v5395_v56 = vadd.f32 %v10160_v52, %v5357_v51  ;;  %v5396_v55 = vadd.f32 %v10160_v52, %v5358_v39  ;;  %v5698_v24 = vld [vmem:[#allocation12 + $0x60] sm:$0xff]  ;;  %v5700_v47 = vld [vmem:[#allocation12 + $0x70] sm:$0xff]  ;;  %v5701_v25 = vld [vmem:[#allocation12 + $0x78] sm:$0xff] }
 0x705   : > { %v5446_v7 = vpack.c.bf16 %v5423_v43, %v5422_v17  ;;  %v5425_v5 = vmax.f32 %v5393_v59, 0.0  ;;  %v5426_v3 = vmax.f32 %v5394_v49, 0.0  ;;  %v5397_v22 = vadd.f32 %v10160_v52, %v10179_v21  ;;  %v10283_v43 = vld [vmem:[%s11027_s15] ss:$0 sm:$0xff] }
 0x706   : > { %v5427_v45 = vmax.f32 %v5395_v56, 0.0  ;;  %v5428_v34 = vmax.f32 %v5396_v55, 0.0  ;;  %v5398_v38 = vadd.f32 %v10160_v52, %v10182_v57  ;;  %v5399_v15 = vadd.f32 %v10160_v52, %v10185_v10 }
 0x707   : > { %v5447_v9 = vpack.c.bf16 %v5425_v5, %v5424_v12  ;;  %v5429_v40 = vmax.f32 %v5397_v22, 0.0  ;;  %v5400_v51 = vadd.f32 %v10160_v52, %v10188_v35  ;;  %v5401_v39 = vadd.f32 %v10160_v52, %v10191_v32 }
 0x708   : > { %7421 = vmatmul.mubr.bf16.gmra.mrb[76].mxu1 %v5441_v31  ;;  %v5448_v33 = vpack.c.bf16 %v5427_v45, %v5426_v3  ;;  %v5430_v58 = vmax.f32 %v5398_v38, 0.0  ;;  %v5431_v21 = vmax.f32 %v5399_v15, 0.0  ;;  %v5402_v48 = vadd.f32 %v10160_v52, %v10194_v50 }
 0x709   : > { %7424 = vmatprep.mubr.bf16.mxu1 %v5442_v37  ;;  %v5449_v57 = vpack.c.bf16 %v5429_v40, %v5428_v34  ;;  %v5432_v61 = vmax.f32 %v5400_v51, 0.0  ;;  %v5433_v28 = vmax.f32 %v5401_v39, 0.0  ;;  %v5403_v10 = vadd.f32 %v10160_v52, %v10197_v11  ;;  %v5687_v11 = vld [vmem:[#allocation12 + $0x8] sm:$0xff]  ;;  %v5696_v37 = vld [vmem:[#allocation12 + $0x50] sm:$0xff] }
 0x70a   : > { %v5450_v41 = vpack.c.bf16 %v5431_v21, %v5430_v58  ;;  %v5434_v23 = vmax.f32 %v5402_v48, 0.0  ;;  %v5404_v35 = vadd.f32 %v10160_v52, %v10200_v30  ;;  %v5405_v32 = vadd.f32 %v10160_v52, %v10203_v42  ;;  %v5686_v52 = vld [vmem:[#allocation12] sm:$0xff]  ;;  %v5688_v42 = vld [vmem:[#allocation12 + $0x10] sm:$0xff] }
 0x70b   : > { %v5451_v19 = vpack.c.bf16 %v5433_v28, %v5432_v61  ;;  %v5435_v8 = vmax.f32 %v5403_v10, 0.0  ;;  %v10248_v30 = vpack.c.bf16 %v5687_v11, %v5686_v52  ;;  %v10252_v20 = vpack.c.bf16 %v5689_v54, %v5688_v42 }
 0x70c   : > { %v5436_v1 = vmax.f32 %v5404_v35, 0.0  ;;  %v5437_v13 = vmax.f32 %v5405_v32, 0.0  ;;  %v10256_v63 = vpack.c.bf16 %v5691_v26, %v5690_v36  ;;  %v10260_v53 = vpack.c.bf16 %v5693_v2, %v5692_v16 }
 0x70d   : > { %v5452_v50 = vpack.c.bf16 %v5435_v8, %v5434_v23  ;;  %7616 = vmatpush3.bf16.msra.mxu1 %v10248_v30  ;;  %v10264_v29 = vpack.c.bf16 %v5695_v46, %v5694_v4  ;;  %v10268_v18 = vpack.c.bf16 %v5697_v27, %v5696_v37 }
 0x70e   : > { %v5453_v31 = vpack.c.bf16 %v5437_v13, %v5436_v1  ;;  %7617 = vmatprep.subr.bf16.mxu1 %v11022_v6 }
 0x710   : > { %7425 = vmatmul.mubr.bf16.gmra.mrb[80].mxu1 %v5443_v14  ;;  %v5699_v14 = vld [vmem:[#allocation12 + $0x68] sm:$0xff] }
 0x711   : > { %7428 = vmatprep.mubr.bf16.mxu1 %v5444_v60  ;;  %7619 = vmatpush3.bf16.msra.mxu1 %v10252_v20  ;;  %v10272_v17 = vpack.c.bf16 %v5699_v14, %v5698_v24  ;;  %v10275_v60 = vpack.c.bf16 %v5701_v25, %v5700_v47 }
 0x712   : > { %7620 = vmatprep.subr.bf16.mxu1 %v11022_v6 }
 0x715   : > { %7622 = vmatpush3.bf16.msra.mxu1 %v10256_v63 }
 0x716   : > { %7623 = vmatprep.subr.bf16.mxu1 %v11022_v6 }
 0x718   : > { %7429 = vmatmul.mubr.bf16.gmra.mrb[84].mxu1 %v5445_v0 }
 0x719   : > { %7432 = vmatprep.mubr.bf16.mxu1 %v5446_v7  ;;  %7625 = vmatpush3.bf16.msra.mxu1 %v10260_v53 }
 0x71a   : > { %7626 = vmatprep.subr.bf16.mxu1 %v11022_v6 }
 0x71d   : > { %7628 = vmatpush3.bf16.msra.mxu1 %v10264_v29 }
 0x71e   : > { %7629 = vmatprep.subr.bf16.mxu1 %v11022_v6 }
 0x720   : > { %7433 = vmatmul.mubr.bf16.gmra.mrb[88].mxu1 %v5447_v9 }
 0x721   : > { %7436 = vmatprep.mubr.bf16.mxu1 %v5448_v33  ;;  %7631 = vmatpush3.bf16.msra.mxu1 %v10268_v18 }
 0x722   : > { %7632 = vmatprep.subr.bf16.mxu1 %v11022_v6 }
 0x725   : > { %7634 = vmatpush3.bf16.msra.mxu1 %v10272_v17 }
 0x726   : > { %7635 = vmatprep.subr.bf16.mxu1 %v11022_v6 }
 0x728   : > { %7437 = vmatmul.mubr.bf16.gmra.mrb[92].mxu1 %v5449_v57 }
 0x729   : > { %7440 = vmatprep.mubr.bf16.mxu1 %v5450_v41  ;;  %7637 = vmatpush3.bf16.msra.mxu1 %v10275_v60 }
 0x72a   : > { %7638 = vmatprep.subr.bf16.mxu1 %v11022_v6 }
 0x730   : > { %7441 = vmatmul.mubr.bf16.gmra.mrb[96].mxu1 %v5451_v19 }
 0x731   : > { %7444 = vmatprep.mubr.bf16.mxu1 %v5452_v50 }
 0x738   : > { %7445 = vmatmul.mubr.bf16.gmra.mrb[100].mxu1 %v5453_v31 }
 0x739   : > { %7480 = vmatprep.mubr.msk.f32.mxu1 %vm8429_vm0, %v11017_v44 }
 0x7d3   : > { %v7418_v59 = vpop.f32.mrb[72].mxu1 }
 0x7d4   : > { %v5559_v49 = vpop.f32.mrb[73].mxu1  ;;  %v10289_v55 = vadd.f32 %v7418_v59, %v10283_v43 }
 0x7d5   : > { %v10286_v0 = vadd.f32 %v10283_v43, %v5559_v49  ;;  %v7419_v12 = vpop.f32.mrb[74].mxu1 }
 0x7d6   : > { %v5562_v56 = vpop.f32.mrb[75].mxu1  ;;  %v10297_v3 = vadd.f32 %v7419_v12, %v10283_v43  ;;  %v5744_v34 = vmul.f32 %v10289_v55, %v10289_v55 }
 0x7d7   : > { %v10292_v7 = vadd.f32 %v10283_v43, %v5562_v56  ;;  %v5742_v5 = vmul.f32 %v10286_v0, %v10286_v0 }
 0x7d8   : > { %v5745_v51 = vmul.f32 %v10297_v3, %v10297_v3 }
 0x7d9   : > { %v5704_v22 = vadd.f32 %v10292_v7, %v10286_v0  ;;  %v5743_v45 = vmul.f32 %v10292_v7, %v10292_v7 }
 0x7db   : > { %v5705_v38 = vadd.f32 %v5704_v22, %v10289_v55  ;;  %v5774_v15 = vadd.f32 %v5743_v45, %v5742_v5  ;;  %v7422_v9 = vpop.f32.mrb[76].mxu1 }
 0x7dc   : > { %v5575_v40 = vpop.f32.mrb[77].mxu1  ;;  %v10313_v48 = vadd.f32 %v7422_v9, %v10283_v43 }
 0x7dd   : > { %v5775_v39 = vadd.f32 %v5774_v15, %v5744_v34  ;;  %v10309_v33 = vadd.f32 %v10283_v43, %v5575_v40  ;;  %v5706_v58 = vadd.f32 %v5705_v38, %v10297_v3  ;;  %v7423_v21 = vpop.f32.mrb[78].mxu1 }
 0x7de   : > { %v5578_v57 = vpop.f32.mrb[79].mxu1  ;;  %v10322_v35 = vadd.f32 %v7423_v21, %v10283_v43  ;;  %v5748_v8 = vmul.f32 %v10313_v48, %v10313_v48 }
 0x7df   : > { %v5707_v61 = vadd.f32 %v5706_v58, %v10309_v33  ;;  %v5746_v28 = vmul.f32 %v10309_v33, %v10309_v33  ;;  %v5776_v10 = vadd.f32 %v5775_v39, %v5745_v51  ;;  %v10319_v41 = vadd.f32 %v10283_v43, %v5578_v57 }
 0x7e0   : > { %v5749_v52 = vmul.f32 %v10322_v35, %v10322_v35 }
 0x7e1   : > { %v5777_v23 = vadd.f32 %v5776_v10, %v5746_v28  ;;  %v5708_v32 = vadd.f32 %v5707_v61, %v10319_v41  ;;  %v5747_v19 = vmul.f32 %v10319_v41, %v10319_v41 }
 0x7e3   : > { %v5709_v1 = vadd.f32 %v5708_v32, %v10313_v48  ;;  %v5778_v13 = vadd.f32 %v5777_v23, %v5747_v19  ;;  %v7426_v50 = vpop.f32.mrb[80].mxu1 }
 0x7e4   : > { %v5591_v31 = vpop.f32.mrb[81].mxu1  ;;  %v10337_v26 = vadd.f32 %v7426_v50, %v10283_v43 }
 0x7e5   : > { %v5779_v11 = vadd.f32 %v5778_v13, %v5748_v8  ;;  %v10333_v42 = vadd.f32 %v10283_v43, %v5591_v31  ;;  %v5710_v54 = vadd.f32 %v5709_v1, %v10322_v35  ;;  %v7427_v36 = vpop.f32.mrb[82].mxu1 }
 0x7e6   : > { %v5594_v16 = vpop.f32.mrb[83].mxu1  ;;  %v10346_v24 = vadd.f32 %v7427_v36, %v10283_v43  ;;  %v5752_v25 = vmul.f32 %v10337_v26, %v10337_v26 }
 0x7e7   : > { %v5711_v2 = vadd.f32 %v5710_v54, %v10333_v42  ;;  %v5750_v4 = vmul.f32 %v10333_v42, %v10333_v42  ;;  %v5780_v46 = vadd.f32 %v5779_v11, %v5749_v52  ;;  %v10343_v37 = vadd.f32 %v10283_v43, %v5594_v16 }
 0x7e8   : > { %v5753_v5 = vmul.f32 %v10346_v24, %v10346_v24 }
 0x7e9   : > { %v5781_v27 = vadd.f32 %v5780_v46, %v5750_v4  ;;  %v5712_v14 = vadd.f32 %v5711_v2, %v10343_v37  ;;  %v5751_v47 = vmul.f32 %v10343_v37, %v10343_v37 }
 0x7eb   : > { %v5713_v59 = vadd.f32 %v5712_v14, %v10337_v26  ;;  %v5782_v49 = vadd.f32 %v5781_v27, %v5751_v47  ;;  %v7430_v12 = vpop.f32.mrb[84].mxu1 }
 0x7ec   : > { %v5607_v56 = vpop.f32.mrb[85].mxu1  ;;  %v10361_v15 = vadd.f32 %v7430_v12, %v10283_v43 }
 0x7ed   : > { %v5783_v22 = vadd.f32 %v5782_v49, %v5752_v25  ;;  %v10357_v45 = vadd.f32 %v10283_v43, %v5607_v56  ;;  %v5714_v34 = vadd.f32 %v5713_v59, %v10346_v24  ;;  %v7431_v38 = vpop.f32.mrb[86].mxu1 }
 0x7ee   : > { %v5610_v9 = vpop.f32.mrb[87].mxu1  ;;  %v10370_v57 = vadd.f32 %v7431_v38, %v10283_v43  ;;  %v5756_v10 = vmul.f32 %v10361_v15, %v10361_v15 }
 0x7ef   : > { %v5715_v40 = vadd.f32 %v5714_v34, %v10357_v45  ;;  %v5754_v51 = vmul.f32 %v10357_v45, %v10357_v45  ;;  %v5784_v39 = vadd.f32 %v5783_v22, %v5753_v5  ;;  %v10367_v58 = vadd.f32 %v10283_v43, %v5610_v9 }
 0x7f0   : > { %v5757_v1 = vmul.f32 %v10370_v57, %v10370_v57 }
 0x7f1   : > { %v5785_v21 = vadd.f32 %v5784_v39, %v5754_v51  ;;  %v5716_v61 = vadd.f32 %v5715_v40, %v10367_v58  ;;  %v5755_v28 = vmul.f32 %v10367_v58, %v10367_v58 }
 0x7f3   : > { %v5717_v23 = vadd.f32 %v5716_v61, %v10361_v15  ;;  %v5786_v32 = vadd.f32 %v5785_v21, %v5755_v28  ;;  %v7434_v19 = vpop.f32.mrb[88].mxu1 }
 0x7f4   : > { %v5623_v8 = vpop.f32.mrb[89].mxu1  ;;  %v10385_v11 = vadd.f32 %v7434_v19, %v10283_v43 }
 0x7f5   : > { %v5787_v13 = vadd.f32 %v5786_v32, %v5756_v10  ;;  %v10381_v50 = vadd.f32 %v10283_v43, %v5623_v8  ;;  %v5718_v31 = vadd.f32 %v5717_v23, %v10370_v57  ;;  %v7435_v52 = vpop.f32.mrb[90].mxu1 }
 0x7f6   : > { %v5626_v54 = vpop.f32.mrb[91].mxu1  ;;  %v10394_v27 = vadd.f32 %v7435_v52, %v10283_v43  ;;  %v5760_v25 = vmul.f32 %v10385_v11, %v10385_v11 }
 0x7f7   : > { %v5719_v36 = vadd.f32 %v5718_v31, %v10381_v50  ;;  %v5758_v16 = vmul.f32 %v10381_v50, %v10381_v50  ;;  %v5788_v2 = vadd.f32 %v5787_v13, %v5757_v1  ;;  %v10391_v4 = vadd.f32 %v10283_v43, %v5626_v54 }
 0x7f8   : > { %v5761_v5 = vmul.f32 %v10394_v27, %v10394_v27 }
 0x7f9   : > { %v5789_v46 = vadd.f32 %v5788_v2, %v5758_v16  ;;  %v5720_v14 = vadd.f32 %v5719_v36, %v10391_v4  ;;  %v5759_v47 = vmul.f32 %v10391_v4, %v10391_v4 }
 0x7fb   : > { %v5721_v59 = vadd.f32 %v5720_v14, %v10385_v11  ;;  %v5790_v49 = vadd.f32 %v5789_v46, %v5759_v47  ;;  %v7438_v12 = vpop.f32.mrb[92].mxu1 }
 0x7fc   : > { %v5639_v56 = vpop.f32.mrb[93].mxu1  ;;  %v10409_v40 = vadd.f32 %v7438_v12, %v10283_v43 }
 0x7fd   : > { %v5791_v22 = vadd.f32 %v5790_v49, %v5760_v25  ;;  %v10405_v34 = vadd.f32 %v10283_v43, %v5639_v56  ;;  %v5722_v38 = vadd.f32 %v5721_v59, %v10394_v27  ;;  %v7439_v9 = vpop.f32.mrb[94].mxu1 }
 0x7fe   : > { %v5642_v51 = vpop.f32.mrb[95].mxu1  ;;  %v10418_v23 = vadd.f32 %v7439_v9, %v10283_v43  ;;  %v5764_v8 = vmul.f32 %v10409_v40, %v10409_v40 }
 0x7ff   : > { %v5723_v39 = vadd.f32 %v5722_v38, %v10405_v34  ;;  %v5762_v21 = vmul.f32 %v10405_v34, %v10405_v34  ;;  %v5792_v61 = vadd.f32 %v5791_v22, %v5761_v5  ;;  %v10415_v28 = vadd.f32 %v10283_v43, %v5642_v51 }
 0x800   : > { %v5765_v54 = vmul.f32 %v10418_v23, %v10418_v23 }
 0x801   : > { %v5793_v10 = vadd.f32 %v5792_v61, %v5762_v21  ;;  %v5724_v32 = vadd.f32 %v5723_v39, %v10415_v28  ;;  %v5763_v19 = vmul.f32 %v10415_v28, %v10415_v28 }
 0x803   : > { %v5725_v1 = vadd.f32 %v5724_v32, %v10409_v40  ;;  %v5794_v13 = vadd.f32 %v5793_v10, %v5763_v19  ;;  %v7442_v31 = vpop.f32.mrb[96].mxu1 }
 0x804   : > { %v5655_v52 = vpop.f32.mrb[97].mxu1  ;;  %v10439_v12 = vadd.f32 %v7442_v31, %v10283_v43 }
 0x805   : > { %v5795_v36 = vadd.f32 %v5794_v13, %v5764_v8  ;;  %v10429_v16 = vadd.f32 %v10283_v43, %v5655_v52  ;;  %v5726_v2 = vadd.f32 %v5725_v1, %v10418_v23  ;;  %v7443_v46 = vpop.f32.mrb[98].mxu1 }
 0x806   : > { %v5658_v14 = vpop.f32.mrb[99].mxu1  ;;  %v10443_v22 = vadd.f32 %v7443_v46, %v10283_v43  ;;  %v5768_v13 = vmul.f32 %v10439_v12, %v10439_v12 }
 0x807   : > { %v5727_v47 = vadd.f32 %v5726_v2, %v10429_v16  ;;  %v5766_v25 = vmul.f32 %v10429_v16, %v10429_v16  ;;  %v5796_v59 = vadd.f32 %v5795_v36, %v5765_v54  ;;  %v10436_v49 = vadd.f32 %v10283_v43, %v5658_v14 }
 0x808   : > { %v5769_v46 = vmul.f32 %v10443_v22, %v10443_v22 }
 0x809   : > { %v5728_v56 = vadd.f32 %v5727_v47, %v10436_v49  ;;  %v5797_v5 = vadd.f32 %v5796_v59, %v5766_v25  ;;  %v5767_v9 = vmul.f32 %v10436_v49, %v10436_v49 }
 0x80b   : > { %v5729_v38 = vadd.f32 %v5728_v56, %v10439_v12  ;;  %v7446_v51 = vpop.f32.mrb[100].mxu1  ;;  %v5798_v19 = vadd.f32 %v5797_v5, %v5767_v9 }
 0x80c   : > { %v5671_v39 = vpop.f32.mrb[101].mxu1  ;;  %v10459_v31 = vadd.f32 %v7446_v51, %v10283_v43 }
 0x80d   : > { %v10449_v21 = vadd.f32 %v10283_v43, %v5671_v39  ;;  %v5730_v61 = vadd.f32 %v5729_v38, %v10443_v22  ;;  %v7447_v10 = vpop.f32.mrb[102].mxu1  ;;  %v5799_v54 = vadd.f32 %v5798_v19, %v5768_v13 }
 0x80e   : > { %v5674_v32 = vpop.f32.mrb[103].mxu1  ;;  %v10463_v36 = vadd.f32 %v7447_v10, %v10283_v43 }
 0x80f   : > { %v5731_v8 = vadd.f32 %v5730_v61, %v10449_v21  ;;  %v10454_v1 = vadd.f32 %v10283_v43, %v5674_v32  ;;  %v5770_v47 = vmul.f32 %v10449_v21, %v10449_v21  ;;  %v5800_v25 = vadd.f32 %v5799_v54, %v5769_v46 }
 0x810   : > { %v5772_v61 = vmul.f32 %v10459_v31, %v10459_v31 }
 0x811   : > { %v5732_v52 = vadd.f32 %v5731_v8, %v10454_v1  ;;  %v5801_v5 = vadd.f32 %v5800_v25, %v5770_v47  ;;  %v5771_v9 = vmul.f32 %v10454_v1, %v10454_v1  ;;  %v5773_v8 = vmul.f32 %v10463_v36, %v10463_v36 }
 0x813   : > { %v5733_v2 = vadd.f32 %v5732_v52, %v10459_v31  ;;  %v5802_v51 = vadd.f32 %v5801_v5, %v5771_v9 }
 0x815   : > { %v5734_v14 = vadd.f32 %v5733_v2, %v10463_v36  ;;  %v5803_v32 = vadd.f32 %v5802_v51, %v5772_v61 }
 0x817   : > { %v5735_v59 = vrot.slane %v5734_v14, 4  ;;  %v5804_v13 = vadd.f32 %v5803_v32, %v5773_v8 }
 0x819   : > { %v5736_v56 = vadd.f32 %v5735_v59, %v5734_v14  ;;  %v5805_v52 = vrot.slane %v5804_v13, 4 }
 0x81b   : > { %v5737_v38 = vrot.slane %v5736_v56, 2  ;;  %v5806_v54 = vadd.f32 %v5805_v52, %v5804_v13 }
 0x81d   : > { %v5738_v43 = vadd.f32 %v5737_v38, %v5736_v56 }
 0x81f   : > { %v5739_v39 = vrot.slane %v5738_v43, 1 }
 0x821   : > { %v5740_v10 = vadd.f32 %v5739_v39, %v5738_v43 }
 0x823   : > { %v5741_v19 = vmul.f32 0.00390625, %v5740_v10 }
 0x825   : > { %7481 = vmatmul.mubr.f32.vlgmr.msra.gmra.mrb[104].mxu1 %v5741_v19 }
 0x826   : > { %7640 = vmatpush3.bf16.msra.mxu1 %v10248_v30  ;;  %7515 = vmatprep.mubr.msk.f32.mxu1 %vm8429_vm0, %v11017_v44  ;;  %v5807_v30 = vrot.slane %v5806_v54, 2 }
 0x827   : > { %7641 = vmatprep.subr.bf16.mxu1 %v11022_v6 }
 0x828   : > { %v5808_v44 = vadd.f32 %v5807_v30, %v5806_v54 }
 0x82a   : > { %7643 = vmatpush3.bf16.msra.mxu1 %v10252_v20  ;;  %v5809_v20 = vrot.slane %v5808_v44, 1 }
 0x82b   : > { %7644 = vmatprep.subr.bf16.mxu1 %v11022_v6 }
 0x82e   : > { %7646 = vmatpush3.bf16.msra.mxu1 %v10256_v63  ;;  %v5810_v63 = vadd.f32 %v5809_v20, %v5808_v44 }
 0x82f   : > { %7647 = vmatprep.subr.bf16.mxu1 %v11022_v6 }
 0x832   : > { %7649 = vmatpush3.bf16.msra.mxu1 %v10260_v53  ;;  %v5811_v53 = vmul.f32 0.00390625, %v5810_v63 }
 0x833   : > { %7650 = vmatprep.subr.bf16.mxu1 %v11022_v6 }
 0x836   : > { %7652 = vmatpush3.bf16.msra.mxu1 %v10264_v29 }
 0x837   : > { %7653 = vmatprep.subr.bf16.mxu1 %v11022_v6 }
 0x83a   : > { %7655 = vmatpush3.bf16.msra.mxu1 %v10268_v18 }
 0x83b   : > { %7656 = vmatprep.subr.bf16.mxu1 %v11022_v6 }
 0x83e   : > { %7658 = vmatpush3.bf16.msra.mxu1 %v10272_v17  ;;  %v5702_v17 = vld [vmem:[%s11028_s17] sm:$0x1]  ;;  %s8344_s17 = scalar_lea.vmem %s8343_s9, 8192 }
 0x83f   : > { %7659 = vmatprep.subr.bf16.mxu1 %v11022_v6 }
 0x842   : > { %7661 = vmatpush3.bf16.msra.mxu1 %v10275_v60  ;;  %v5703_v60 = vld [vmem:[%s11029_s16] sm:$0x1] }
 0x845   : > { %7516 = vmatmul.mubr.f32.vlgmr.msra.gmra.mrb[106].mxu1 %v5811_v53 }
 0x8f8   : > { %v5878_v2 = vpop.f32.mrb[104].mxu1 }
 0x8f9   : > { %v7482_v46 = vpop.f32.mrb[105].mxu1  ;;  %v5952_v29 = vmul.f32 %v5878_v2, %v5878_v2 }
 0x918   : > { %v5948_v14 = vpop.f32.mrb[106].mxu1 }
 0x919   : > { %v5953_v47 = vsub.f32 %v5948_v14, %v5952_v29  ;;  %v7517_v25 = vpop.f32.mrb[107].mxu1 }
 0x91b   : > { %v5954_v59 = vmax.f32 %v5953_v47, 0.0 }
 0x91d   : > { %v5955_v18 = vadd.f32 1e-05, %v5954_v59 }
 0x91f   : > { %8117 = vrsqrt.f32 %v5955_v18 }
 0x929   : > { %v8118_v56 = vpop.eup %8117 }
 0x92a   : > { %v5957_v6 = vmul.f32 %v8118_v56, %v5702_v17 }
 0x92c   : > { %v5958_v5 = vmul.f32 %v5957_v6, %v5878_v2  ;;  %v5963_v38 = vrot.slane %v5957_v6, %v11026_v62 }
 0x92e   : > { %v5959_v9 = vsub.f32 %v5703_v60, %v5958_v5  ;;  %v5964_v43 = vmul.f32 %v5963_v38, %v10286_v0  ;;  %v5965_v51 = vmul.f32 %v5963_v38, %v10292_v7  ;;  %v5966_v39 = vmul.f32 %v5963_v38, %v10289_v55 }
 0x92f   : > { %v5967_v61 = vmul.f32 %v5963_v38, %v10297_v3  ;;  %v5968_v10 = vmul.f32 %v5963_v38, %v10309_v33  ;;  %v5969_v32 = vmul.f32 %v5963_v38, %v10319_v41  ;;  %v5970_v19 = vmul.f32 %v5963_v38, %v10313_v48 }
 0x930   : > { %v6000_v8 = vrot.slane %v5959_v9, %v11026_v62  ;;  %v5971_v13 = vmul.f32 %v5963_v38, %v10322_v35  ;;  %v5972_v52 = vmul.f32 %v5963_v38, %v10333_v42  ;;  %v5973_v0 = vmul.f32 %v5963_v38, %v10343_v37 }
 0x931   : > { %v5974_v7 = vmul.f32 %v5963_v38, %v10337_v26  ;;  %v5975_v55 = vmul.f32 %v5963_v38, %v10346_v24  ;;  %v5976_v3 = vmul.f32 %v5963_v38, %v10357_v45  ;;  %v5977_v33 = vmul.f32 %v5963_v38, %v10367_v58 }
 0x932   : > { %v5978_v41 = vmul.f32 %v5963_v38, %v10361_v15  ;;  %v5979_v48 = vmul.f32 %v5963_v38, %v10370_v57  ;;  %v5980_v62 = vmul.f32 %v5963_v38, %v10381_v50  ;;  %v5981_v35 = vmul.f32 %v5963_v38, %v10391_v4 }
 0x933   : > { %v5982_v42 = vmul.f32 %v5963_v38, %v10385_v11  ;;  %v5983_v37 = vmul.f32 %v5963_v38, %v10394_v27  ;;  %v5984_v26 = vmul.f32 %v5963_v38, %v10405_v34  ;;  %v5985_v24 = vmul.f32 %v5963_v38, %v10415_v28 }
 0x934   : > { %v5986_v45 = vmul.f32 %v5963_v38, %v10409_v40  ;;  %v5987_v58 = vmul.f32 %v5963_v38, %v10418_v23  ;;  %v5988_v15 = vmul.f32 %v5963_v38, %v10429_v16  ;;  %v5989_v57 = vmul.f32 %v5963_v38, %v10436_v49 }
 0x935   : > { %v5990_v50 = vmul.f32 %v5963_v38, %v10439_v12  ;;  %v5991_v4 = vmul.f32 %v5963_v38, %v10443_v22  ;;  %v5992_v11 = vmul.f32 %v5963_v38, %v10449_v21  ;;  %v5993_v27 = vmul.f32 %v5963_v38, %v10454_v1 }
 0x936   : > { %v5994_v34 = vmul.f32 %v5963_v38, %v10459_v31  ;;  %v5995_v28 = vmul.f32 %v5963_v38, %v10463_v36  ;;  %v10534_v54 = vadd.f32 %v6000_v8, %v5964_v43  ;;  %v10536_v40 = vadd.f32 %v6000_v8, %v5965_v51 }
 0x937   : > { %v10538_v23 = vadd.f32 %v6000_v8, %v5966_v39  ;;  %v10540_v16 = vadd.f32 %v6000_v8, %v5967_v61  ;;  %v10542_v49 = vadd.f32 %v6000_v8, %v5968_v10  ;;  %v10544_v12 = vadd.f32 %v6000_v8, %v5969_v32 }
 0x938   : > { %v10546_v22 = vadd.f32 %v6000_v8, %v5970_v19  ;;  %v10548_v21 = vadd.f32 %v6000_v8, %v5971_v13  ;;  %v10550_v1 = vadd.f32 %v6000_v8, %v5972_v52  ;;  %v10552_v31 = vadd.f32 %v6000_v8, %v5973_v0 }
 0x939   : > { %v10554_v36 = vadd.f32 %v6000_v8, %v5974_v7  ;;  %v10556_v30 = vadd.f32 %v6000_v8, %v5975_v55  ;;  %v10558_v44 = vadd.f32 %v6000_v8, %v5976_v3  ;;  %v10560_v20 = vadd.f32 %v6000_v8, %v5977_v33 }
 0x93a   : > { %v10562_v63 = vadd.f32 %v6000_v8, %v5978_v41  ;;  %v10564_v53 = vadd.f32 %v6000_v8, %v5979_v48  ;;  %v10566_v2 = vadd.f32 %v6000_v8, %v5980_v62  ;;  %v10568_v46 = vadd.f32 %v6000_v8, %v5981_v35 }
 0x93b   : > { %v10570_v29 = vadd.f32 %v6000_v8, %v5982_v42  ;;  %v10572_v14 = vadd.f32 %v6000_v8, %v5983_v37  ;;  %v10574_v47 = vadd.f32 %v6000_v8, %v5984_v26  ;;  %v10576_v25 = vadd.f32 %v6000_v8, %v5985_v24 }
 0x93c   : > { %v10578_v59 = vadd.f32 %v6000_v8, %v5986_v45  ;;  %v10580_v18 = vadd.f32 %v6000_v8, %v5987_v58  ;;  %v10582_v17 = vadd.f32 %v6000_v8, %v5988_v15  ;;  %v10584_v56 = vadd.f32 %v6000_v8, %v5989_v57 }
 0x93d   : > { %v10586_v6 = vadd.f32 %v6000_v8, %v5990_v50  ;;  %v10588_v60 = vadd.f32 %v6000_v8, %v5991_v4  ;;  %v10590_v5 = vadd.f32 %v6000_v8, %v5992_v11  ;;  %v10592_v38 = vadd.f32 %v6000_v8, %v5993_v27 }
 0x93e   : > { %v10594_v9 = vadd.f32 %v6000_v8, %v5994_v34  ;;  %v10596_v43 = vadd.f32 %v6000_v8, %v5995_v28  ;;  %v6034_v51 = vmax.f32 %v10534_v54, 0.0  ;;  %v6035_v39 = vmax.f32 %v10536_v40, 0.0  ;;  %v8136_v54 = vld [vmem:[%s8770_s28] sm:$0xff] }
 0x93f   : > { %v6036_v61 = vmax.f32 %v10538_v23, 0.0  ;;  %v6037_v10 = vmax.f32 %v10540_v16, 0.0  ;;  %v6038_v32 = vmax.f32 %v10542_v49, 0.0  ;;  %v6039_v19 = vmax.f32 %v10544_v12, 0.0  ;;  %v8137_v23 = vld [vmem:[%s8770_s28 + $0x8] sm:$0xff]  ;;  %v8138_v49 = vld [vmem:[%s8770_s28 + $0x10] sm:$0xff] }
 0x940   : > { %v6040_v13 = vmax.f32 %v10546_v22, 0.0  ;;  %v6041_v52 = vmax.f32 %v10548_v21, 0.0  ;;  %v6042_v0 = vmax.f32 %v10550_v1, 0.0  ;;  %v6043_v8 = vmax.f32 %v10552_v31, 0.0  ;;  %v8139_v22 = vld [vmem:[%s8770_s28 + $0x18] sm:$0xff]  ;;  %v8140_v1 = vld [vmem:[%s8770_s28 + $0x20] sm:$0xff] }
 0x941   : > { %v6044_v7 = vmax.f32 %v10554_v36, 0.0  ;;  %v6045_v55 = vmax.f32 %v10556_v30, 0.0  ;;  %v6046_v3 = vmax.f32 %v10558_v44, 0.0  ;;  %v6047_v33 = vmax.f32 %v10560_v20, 0.0  ;;  %v8141_v36 = vld [vmem:[%s8770_s28 + $0x28] sm:$0xff]  ;;  %v8142_v44 = vld [vmem:[%s8770_s28 + $0x30] sm:$0xff] }
 0x942   : > { %v6048_v41 = vmax.f32 %v10562_v63, 0.0  ;;  %v6049_v48 = vmax.f32 %v10564_v53, 0.0  ;;  %v6050_v62 = vmax.f32 %v10566_v2, 0.0  ;;  %v6051_v35 = vmax.f32 %v10568_v46, 0.0  ;;  %v8143_v63 = vld [vmem:[%s8770_s28 + $0x38] sm:$0xff]  ;;  %v8144_v2 = vld [vmem:[%s8770_s28 + $0x40] sm:$0xff] }
 0x943   : > { %v6052_v42 = vmax.f32 %v10570_v29, 0.0  ;;  %v6053_v37 = vmax.f32 %v10572_v14, 0.0  ;;  %v6054_v26 = vmax.f32 %v10574_v47, 0.0  ;;  %v6055_v24 = vmax.f32 %v10576_v25, 0.0  ;;  %v8145_v29 = vld [vmem:[%s8770_s28 + $0x48] sm:$0xff]  ;;  %v8146_v47 = vld [vmem:[%s8770_s28 + $0x50] sm:$0xff] }
 0x944   : > { %v6056_v45 = vmax.f32 %v10578_v59, 0.0  ;;  %v6057_v58 = vmax.f32 %v10580_v18, 0.0  ;;  %v6058_v15 = vmax.f32 %v10582_v17, 0.0  ;;  %v6059_v57 = vmax.f32 %v10584_v56, 0.0  ;;  %v8147_v59 = vld [vmem:[%s8770_s28 + $0x58] sm:$0xff]  ;;  %v8148_v17 = vld [vmem:[%s8770_s28 + $0x60] sm:$0xff] }
 0x945   : > { %v6060_v50 = vmax.f32 %v10586_v6, 0.0  ;;  %v6061_v4 = vmax.f32 %v10588_v60, 0.0  ;;  %v6062_v11 = vmax.f32 %v10590_v5, 0.0  ;;  %v6063_v27 = vmax.f32 %v10592_v38, 0.0  ;;  %v8149_v6 = vld [vmem:[%s8770_s28 + $0x68] sm:$0xff]  ;;  %v8150_v5 = vld [vmem:[%s8770_s28 + $0x70] sm:$0xff] }
 0x946   : > { %v6064_v34 = vmax.f32 %v10594_v9, 0.0  ;;  %v6065_v28 = vmax.f32 %v10596_v43, 0.0  ;;  %v10631_v40 = vadd.f32 %v8136_v54, %v6034_v51  ;;  %v10634_v16 = vadd.f32 %v8137_v23, %v6035_v39  ;;  %v8151_v51 = vld [vmem:[%s8770_s28 + $0x78] sm:$0xff] }
 0x947   : > { %v10637_v12 = vadd.f32 %v8138_v49, %v6036_v61  ;;  %v10640_v21 = vadd.f32 %v8139_v22, %v6037_v10  ;;  %v10643_v31 = vadd.f32 %v8140_v1, %v6038_v32  ;;  %v10646_v30 = vadd.f32 %v8141_v36, %v6039_v19  ;;  %v8152_v61 = vld [vmem:[%s8770_s28 + $0x80] sm:$0xff]  ;;  %v8153_v32 = vld [vmem:[%s8770_s28 + $0x88] sm:$0xff]  ;;  %v8163_v22 = vld [vmem:[%s8770_s28 + $0xd8] sm:$0xff] }
 0x948   : > { %v10649_v20 = vadd.f32 %v8142_v44, %v6040_v13  ;;  %v10652_v53 = vadd.f32 %v8143_v63, %v6041_v52  ;;  %v10655_v46 = vadd.f32 %v8144_v2, %v6042_v0  ;;  %v10658_v14 = vadd.f32 %v8145_v29, %v6043_v8  ;;  %v8154_v13 = vld [vmem:[%s8770_s28 + $0x90] sm:$0xff]  ;;  %v8155_v0 = vld [vmem:[%s8770_s28 + $0x98] sm:$0xff]  ;;  %v8164_v1 = vld [vmem:[%s8770_s28 + $0xe0] sm:$0xff] }
 0x949   : > { %v10661_v25 = vadd.f32 %v8146_v47, %v6044_v7  ;;  %v10664_v18 = vadd.f32 %v8147_v59, %v6045_v55  ;;  %v10667_v56 = vadd.f32 %v8148_v17, %v6046_v3  ;;  %v10670_v60 = vadd.f32 %v8149_v6, %v6047_v33  ;;  %v8156_v7 = vld [vmem:[%s8770_s28 + $0xa0] sm:$0xff]  ;;  %v8157_v3 = vld [vmem:[%s8770_s28 + $0xa8] sm:$0xff] }
 0x94a   : > { %v10673_v38 = vadd.f32 %v8150_v5, %v6048_v41  ;;  %v10676_v39 = vadd.f32 %v8151_v51, %v6049_v48  ;;  %v10679_v10 = vadd.f32 %v8152_v61, %v6050_v62  ;;  %v10682_v19 = vadd.f32 %v8153_v32, %v6051_v35  ;;  %v8158_v41 = vld [vmem:[%s8770_s28 + $0xb0] sm:$0xff]  ;;  %v8159_v62 = vld [vmem:[%s8770_s28 + $0xb8] sm:$0xff] }
 0x94b   : > { %v10685_v52 = vadd.f32 %v8154_v13, %v6052_v42  ;;  %v10688_v8 = vadd.f32 %v8155_v0, %v6053_v37  ;;  %v10691_v55 = vadd.f32 %v8156_v7, %v6054_v26  ;;  %v10694_v33 = vadd.f32 %v8157_v3, %v6055_v24  ;;  %v8160_v42 = vld [vmem:[%s8770_s28 + $0xc0] sm:$0xff]  ;;  %v8161_v37 = vld [vmem:[%s8770_s28 + $0xc8] sm:$0xff]  ;;  %v8162_v26 = vld [vmem:[%s8770_s28 + $0xd0] sm:$0xff] }
 0x94c   : > { %v10697_v48 = vadd.f32 %v8158_v41, %v6056_v45  ;;  %v10700_v35 = vadd.f32 %v8159_v62, %v6057_v58  ;;  %v10703_v54 = vadd.f32 %v8160_v42, %v6058_v15  ;;  %v10706_v23 = vadd.f32 %v8161_v37, %v6059_v57  ;;  %v8165_v45 = vld [vmem:[%s8770_s28 + $0xe8] sm:$0xff]  ;;  %v8166_v58 = vld [vmem:[%s8770_s28 + $0xf0] sm:$0xff]  ;;  %v8167_v57 = vld [vmem:[%s8770_s28 + $0xf8] sm:$0xff]  ;;  %s10742_s28 = scalar_lea.vmem [#allocation14], %s6309_s13  ;;  %s6413_s13 = sshll.u32 %s8536_s24, 12 }
 0x94d   : > { %v10709_v49 = vadd.f32 %v8162_v26, %v6060_v50  ;;  %v10712_v24 = vadd.f32 %v8163_v22, %v6061_v4  ;;  %v10715_v36 = vadd.f32 %v8164_v1, %v6062_v11  ;;  %v10718_v44 = vadd.f32 %v8165_v45, %v6063_v27  ;;  %s6176_s25 = sshll.u32 %s10742_s28, 4  ;;  %s10791_s8 = scalar_lea.hbm %s11030_s7, %s6413_s13  ;;  %s10793_s25 = int_to_ptr.vmem [resolvable:$true] %s6176_s25 }
 0x94e   : > { %v10723_v15 = vadd.f32 %v8166_v58, %v6064_v34  ;;  %v10728_v50 = vadd.f32 %v8167_v57, %v6065_v28  ;;  %v6098_v4 = vmax.f32 %v10631_v40, 0.0  ;;  %v6099_v63 = vmax.f32 %v10634_v16, 0.0  ;;  %s8338_s15 = scalar_lea.vmem %s10793_s25, 4096  ;;  %p8345_p13 = scmp.lt.s32.totalorder %s10793_s25, %s8343_s9 }
 0x94f   : > { %v6100_v11 = vmax.f32 %v10637_v12, 0.0  ;;  %v6101_v2 = vmax.f32 %v10640_v21, 0.0  ;;  %v6102_v27 = vmax.f32 %v10643_v31, 0.0  ;;  %v6103_v29 = vmax.f32 %v10646_v30, 0.0  ;;  %p8339_p7 = scmp.ne.s32.totalorder %s10793_s25, %s8338_s15  ;;  %p8346_p0 = scmp.lt.s32.totalorder %s8344_s17, %s8338_s15 }
 0x950   : > { %v6104_v9 = vmax.f32 %v10649_v20, 0.0  ;;  %v6105_v34 = vmax.f32 %v10652_v53, 0.0  ;;  %v6106_v43 = vmax.f32 %v10655_v46, 0.0  ;;  %v6107_v28 = vmax.f32 %v10658_v14, 0.0  ;;  %6130 = vst [vmem:[%s10742_s28] sm:$0xff] %v6098_v4  ;;  %6131 = vst [vmem:[%s10742_s28 + $0x8] sm:$0xff] %v6099_v63 }
 0x951   : > { %v6108_v40 = vmax.f32 %v10661_v25, 0.0  ;;  %v6109_v16 = vmax.f32 %v10664_v18, 0.0  ;;  %v6110_v12 = vmax.f32 %v10667_v56, 0.0  ;;  %v6111_v21 = vmax.f32 %v10670_v60, 0.0  ;;  %6132 = vst [vmem:[%s10742_s28 + $0x10] sm:$0xff] %v6100_v11  ;;  %6133 = vst [vmem:[%s10742_s28 + $0x18] sm:$0xff] %v6101_v2  ;;  %p8340_p12 = pnand %p8339_p7, %p11031_p4  ;;  %p8347_p2 = por %p8346_p0, %p8345_p13 }
 0x952   : > { %6134 = vst [vmem:[%s10742_s28 + $0x20] sm:$0xff] %v6102_v27  ;;  %6135 = vst [vmem:[%s10742_s28 + $0x28] sm:$0xff] %v6103_v29  ;;  %v6112_v31 = vmax.f32 %v10673_v38, 0.0  ;;  %v6113_v30 = vmax.f32 %v10676_v39, 0.0  ;;  %v6114_v20 = vmax.f32 %v10679_v10, 0.0  ;;  %v6115_v53 = vmax.f32 %v10682_v19, 0.0 }
 0x953   : > { %6136 = vst [vmem:[%s10742_s28 + $0x30] sm:$0xff] %v6104_v9  ;;  %6137 = vst [vmem:[%s10742_s28 + $0x38] sm:$0xff] %v6105_v34  ;;  %v6116_v46 = vmax.f32 %v10685_v52, 0.0  ;;  %v6117_v14 = vmax.f32 %v10688_v8, 0.0  ;;  %v6118_v47 = vmax.f32 %v10691_v55, 0.0  ;;  %v6119_v25 = vmax.f32 %v10694_v33, 0.0  ;;  %p8341_p1 = pneg %p8340_p12 }
 0x954   : > { %6138 = vst [vmem:[%s10742_s28 + $0x40] sm:$0xff] %v6106_v43  ;;  %6139 = vst [vmem:[%s10742_s28 + $0x48] sm:$0xff] %v6107_v28  ;;  %v6120_v59 = vmax.f32 %v10697_v48, 0.0  ;;  %v6121_v18 = vmax.f32 %v10700_v35, 0.0  ;;  %v6122_v17 = vmax.f32 %v10703_v54, 0.0  ;;  %v6123_v56 = vmax.f32 %v10706_v23, 0.0 }
 0x955   : > { %6140 = vst [vmem:[%s10742_s28 + $0x50] sm:$0xff] %v6108_v40  ;;  %6141 = vst [vmem:[%s10742_s28 + $0x58] sm:$0xff] %v6109_v16  ;;  %v6124_v6 = vmax.f32 %v10709_v49, 0.0  ;;  %v6125_v60 = vmax.f32 %v10712_v24, 0.0  ;;  %v6126_v5 = vmax.f32 %v10715_v36, 0.0  ;;  %v6127_v38 = vmax.f32 %v10718_v44, 0.0  ;;  %p8348_p8 = pnand %p8347_p2, %p8341_p1 }
 0x956   : > { %6142 = vst [vmem:[%s10742_s28 + $0x60] sm:$0xff] %v6110_v12  ;;  %6143 = vst [vmem:[%s10742_s28 + $0x68] sm:$0xff] %v6111_v21  ;;  %v6128_v51 = vmax.f32 %v10723_v15, 0.0  ;;  %v6129_v39 = vmax.f32 %v10728_v50, 0.0 }
 0x957   : > { %6144 = vst [vmem:[%s10742_s28 + $0x70] sm:$0xff] %v6112_v31  ;;  %6145 = vst [vmem:[%s10742_s28 + $0x78] sm:$0xff] %v6113_v30 }
 0x958   : > { %6146 = vst [vmem:[%s10742_s28 + $0x80] sm:$0xff] %v6114_v20  ;;  %6147 = vst [vmem:[%s10742_s28 + $0x88] sm:$0xff] %v6115_v53 }
 0x959   : > { %6148 = vst [vmem:[%s10742_s28 + $0x90] sm:$0xff] %v6116_v46  ;;  %6149 = vst [vmem:[%s10742_s28 + $0x98] sm:$0xff] %v6117_v14 }
 0x95a   : > { %6150 = vst [vmem:[%s10742_s28 + $0xa0] sm:$0xff] %v6118_v47  ;;  %6151 = vst [vmem:[%s10742_s28 + $0xa8] sm:$0xff] %v6119_v25 }
 0x95b   : > { %6152 = vst [vmem:[%s10742_s28 + $0xb0] sm:$0xff] %v6120_v59  ;;  %6153 = vst [vmem:[%s10742_s28 + $0xb8] sm:$0xff] %v6121_v18 }
 0x95c   : > { %6154 = vst [vmem:[%s10742_s28 + $0xc0] sm:$0xff] %v6122_v17  ;;  %6155 = vst [vmem:[%s10742_s28 + $0xc8] sm:$0xff] %v6123_v56 }
 0x95d   : > { %6156 = vst [vmem:[%s10742_s28 + $0xd0] sm:$0xff] %v6124_v6  ;;  %6157 = vst [vmem:[%s10742_s28 + $0xd8] sm:$0xff] %v6125_v60 }
 0x95e   : > { %6158 = vst [vmem:[%s10742_s28 + $0xe0] sm:$0xff] %v6126_v5  ;;  %6159 = vst [vmem:[%s10742_s28 + $0xe8] sm:$0xff] %v6127_v38 }
 0x95f   : > { %6160 = vst [vmem:[%s10742_s28 + $0xf0] sm:$0xff] %v6128_v51  ;;  %6161 = vst [vmem:[%s10742_s28 + $0xf8] sm:$0xff] %v6129_v39 }
 0x960   : > { %8351 = shalt.err (!%p8348_p8)
}
 0x961   : > { %s8352_s29 = scalar_lea.hbm %s10791_s8, 4096  ;;  %s8356_s28 = scalar_lea.hbm %s11030_s7, 8192 }
 0x962   : > { %p8353_p6 = scmp.ne.s32.totalorder %s10791_s8, %s8352_s29  ;;  %p8357_p3 = scmp.lt.u32.totalorder %s10791_s8, %s11030_s7 }
 0x963   : > { %p8358_p5 = scmp.lt.u32.totalorder %s8356_s28, %s8352_s29  ;;  %p8360_p7 = scmp.lt.u32.totalorder %s8352_s29, %s10791_s8 }
 0x964   : > { %p8354_p10 = pnand %p8353_p6, %p11031_p4 }
 0x965   : > { %p8359_p9 = por %p8358_p5, %p8357_p3 }
 0x966   : > { %p8355_p11 = pneg %p8354_p10 }
 0x967   : > { %p8361_p12 = por %p8360_p7, %p8359_p9 }
 0x969   : > { %p8362_p1 = pnand %p8361_p12, %p8355_p11 }
 0x96b   : > { %8365 = shalt.err (!%p8362_p1)
}
 0x96c   : > { %s8433_s23 = smov 128   ;;  %s8434_s15 = smov 8  }
 0x96d   : > { %7940 = dma.vmem_to_hbm [thread:$0]  (%p11031_p4), %s10793_s25, 4096, %s10791_s8, %s6163_s30, %s8433_s23, %s8433_s23, %s8434_s15  }
 0x96e PF: > { %s6191_s12 = sand.u32 1, %s8404_s18   ;;  %p11032_p13 = scmp.ne.s32.totalorder %s10947_s11, 0 }
 0x96f   : > { %p11033_p0 = scmp.ge.s32.totalorder %s8416_s21, 2  ;;  %s6192_s9 = scalar_lea.sflag [#allocation5], %s6191_s12 }
 0x971   : > { %p7963_p2 = pnand %p11033_p0, %p11032_p13 }
 0x973   : > { %8399 = dma.done.wait (!%p7963_p2), %s6192_s9, 4096  }
 0x974   : > { %8401 = vsyncadd (!%p7963_p2), %s6192_s9, 4294963200  ;;  %p31_p8 = scmp.ge.s32.totalorder %s8688_s26, 4   ;;  %s11034_s18 = smov %s8408_s19 }
 0x975   : > { %s11035_s19 = smov %s8412_s20  ;;  %s11036_s20 = smov %s8700_s6 }
 0x976   : > { %s11037_s21 = smov %s8688_s26  ;;  %33 = sbr.rel (!%p31_p8) target bundleno = 18 (0x12), region = 156 }
 0x97d   :  { %6197 = vsyncpa [#allocation4], 1 }
 0x97e   :  { %6199 = vsyncpa [#allocation4 + $0x1], 1 }
 0x97f   :  { %6200 = vsyncpa [#allocation7], 1 }
 0x980   :  { %6201 = vsyncpa [#allocation10], 1 }
 0x981   :  { %6202 = vsyncpa [#allocation13], 1 }
 0x982   :  { %6203 = vsyncpa [#allocation5], 1 }
 0x983   :  { %6205 = vsyncpa [#allocation5 + $0x1], 1 }

</bundles_post_ra>
